<compile_context>
chip_gen: v6e
topology: v6e:2x2x1
jax: 0.10.0
libtpu: 0.0.40
codegen_flags: <defaults>
</compile_context>

<pallas_src>
import functools

import numpy as np
import jax
import jax.numpy as jnp
from jax.experimental import pallas as pl
from jax.experimental.pallas import tpu as pltpu

jax.config.update("jax_default_matmul_precision", "highest")


# ----------------------------------------------------------------------------- kernel
def _gpm_kernel(xf_ref, la_ref, w1_ref, b1_ref, w2_ref, b2_ref,
                p_ref, wg_ref, bg_ref, wfr_ref, r9_ref, l_ref, bias9_ref,
                out_ref, *, C, T, n_rel1, wf0_scaled):
    f32 = jnp.float32
    xf = xf_ref[...]                                            # [B*S, C*T]

    # --- short + medium temporal branches, fused into two matmuls (Toeplitz / block-diag) ---
    h = jnp.maximum(jnp.dot(xf, w1_ref[...], preferred_element_type=f32) + b1_ref[...], 0.0)
    sm = jnp.maximum(jnp.dot(h, w2_ref[...], preferred_element_type=f32) + b2_ref[...], 0.0)  # [B*S, 2*Fconv]

    # --- long-term branch: masked per-channel max over time (ReLU folded into the 0-fill) ---
    lane = jax.lax.broadcasted_iota(jnp.int32, xf.shape, 1)
    longs = [jnp.max(jnp.where((lane >= c * T) & (lane < (c + 1) * T), xf, 0.0),
                     axis=1, keepdims=True) for c in range(C)]

    X = jnp.concatenate([sm] + longs, axis=1)                   # [B*S, Ffeat]

    # --- RGCN (mean aggregation) with node selection folded in:
    #     Xcat = [Sel@X | Sel@A_1@X | ...], then one stacked-weight matmul + LeakyReLU(0.01)
    aggs = [jnp.dot(p_ref[r], X, preferred_element_type=f32) for r in range(n_rel1)]
    xcat = jnp.concatenate(aggs, axis=1)                        # [B*S_sel, (R+1)*Ffeat]
    g = jnp.dot(xcat, wg_ref[...], preferred_element_type=f32) + bg_ref[...]
    g = jnp.where(g > 0, g, 0.01 * g)                           # [B*S_sel, Ffeat]

    # --- final 1x1 conv + re-layout to lane-dense logits [B, S_sel+1] (cash logit stays 0) ---
    scores = jnp.dot(g, wfr_ref[...], preferred_element_type=f32)   # [B*S_sel, 1]
    placed = scores * r9_ref[...]                                    # [B*S_sel, S_sel+1]
    la = la_ref[...]                                                 # [B, S_sel+1]
    col = jax.lax.broadcasted_iota(jnp.int32, la.shape, 1)
    last_stocks = jnp.where(col == 0, 0.0, la)                       # zero the cash column
    logits = (jnp.dot(l_ref[...], placed, preferred_element_type=f32)
              + wf0_scaled * last_stocks + bias9_ref[...])           # [B, S_sel+1]

    # --- softmax over the lane axis (exact divide: output is probabilities) ---
    m = jnp.max(logits, axis=1, keepdims=True)
    e = jnp.exp(logits - m)
    out_ref[...] = e / jnp.sum(e, axis=1, keepdims=True)


# ----------------------------------------------------------------------------- host-side prep
def _build_rel_adjacency(edge_index, edge_type, num_nodes):
    """Dense normalized adjacency per relation (RGCN mean aggregation)."""
    ei = np.asarray(edge_index)
    et = np.asarray(edge_type)
    rel_ids = np.unique(et)
    A = np.zeros((rel_ids.shape[0], num_nodes, num_nodes), np.float32)
    for ridx, r in enumerate(rel_ids):
        mask = et == r
        for src, dst in zip(ei[0, mask], ei[1, mask]):
            A[ridx, dst, src] += 1.0
        deg = A[ridx].sum(axis=1, keepdims=True)
        A[ridx] = np.where(deg > 0, A[ridx] / np.maximum(deg, 1.0), 0.0)
    return A


def gpm_simplified_forward(observation, last_action, params, edge_index, edge_type,
                           nodes_to_select, temperature=1.0):
    (W1s, b1s, W2s, b2s, W1m, b1m, W2m, b2m, Wroot, Wrel, bg, Wf, bf) = params
    B, C, S, T = observation.shape
    k_s, k_m = W1s.shape[-1], W1m.shape[-1]
    T1s, T1m = T - k_s + 1, T - k_m + 1
    Fconv = W2s.shape[0]
    Ffeat = 2 * Fconv + C
    sel_idx = np.asarray(nodes_to_select)
    S_sel = sel_idx.shape[0]
    R = int(np.unique(np.asarray(edge_type)).shape[0])
    N, Nsel, A_out = B * S, B * S_sel, S_sel + 1
    inv_t = 1.0 / float(temperature)

    # ---- stage-1 Toeplitz conv weights (short | medium), fused ----
    def toeplitz(W1, b1, k, T1):
        Wn = np.asarray(W1, np.float32)
        Cmid = Wn.shape[0]
        M = np.zeros((C * T, Cmid * T1), np.float32)
        for co in range(Cmid):
            for ci in range(C):
                for t in range(T1):
                    M[ci * T + t: ci * T + t + k, co * T1 + t] = Wn[co, ci, 0, :]
        bexp = np.repeat(np.asarray(b1, np.float32), T1)[None, :]
        return M, bexp

    Ms, bs_exp = toeplitz(W1s, b1s, k_s, T1s)
    Mm, bm_exp = toeplitz(W1m, b1m, k_m, T1m)
    n_s1, n_m1 = Ms.shape[1], Mm.shape[1]
    W1cat = np.concatenate([Ms, Mm], axis=1)                       # [C*T, n_s1+n_m1]
    b1cat = np.concatenate([bs_exp, bm_exp], axis=1)

    def flat2(W2):
        Wn = np.asarray(W2, np.float32)                            # [F, Cm, 1, T1]
        return np.transpose(Wn[:, :, 0, :], (1, 2, 0)).reshape(-1, Wn.shape[0])

    W2bd = np.zeros((n_s1 + n_m1, 2 * Fconv), np.float32)          # block-diagonal stage-2
    W2bd[:n_s1, :Fconv] = flat2(W2s)
    W2bd[n_s1:, Fconv:] = flat2(W2m)
    b2cat = np.concatenate([np.asarray(b2s, np.float32),
                            np.asarray(b2m, np.float32)])[None, :]

    # ---- RGCN: block-diagonal batch adjacency with node selection folded in ----
    A = _build_rel_adjacency(edge_index, edge_type, S)             # [R, S, S]
    Sel = np.zeros((S_sel, S), np.float32)
    Sel[np.arange(S_sel), sel_idx] = 1.0
    eyeB = np.eye(B, dtype=np.float32)
    SelB = np.kron(eyeB, Sel)                                      # [Nsel, N]
    Pstack = np.stack([SelB] + [SelB @ np.kron(eyeB, A[r]) for r in range(R)], axis=0)

    Wrel_np = np.asarray(Wrel, np.float32)
    Wstack = np.concatenate([np.asarray(Wroot, np.float32)]
                            + [Wrel_np[r] for r in range(R)], axis=0)   # [(R+1)*Ffeat, Ffeat]
    bg_row = np.asarray(bg, np.float32)[None, :]

    # ---- final 1x1 conv constants (temperature folded in; output placement matrices) ----
    wf_vec = np.asarray(Wf, np.float32)[0, :, 0, 0]                # [Ffeat + 1]
    wfr = (wf_vec[1:] * inv_t).reshape(Ffeat, 1)
    wf0_scaled = float(wf_vec[0]) * inv_t
    bias9 = np.zeros((1, A_out), np.float32)
    bias9[0, 1:] = float(np.asarray(bf, np.float32).reshape(-1)[0]) * inv_t
    R9 = np.zeros((Nsel, A_out), np.float32)                       # sublane row -> lane slot
    R9[np.arange(Nsel), 1 + (np.arange(Nsel) % S_sel)] = 1.0
    Lmat = np.zeros((B, Nsel), np.float32)                         # sublane row -> batch row
    Lmat[np.arange(Nsel) // S_sel, np.arange(Nsel)] = 1.0

    # ---- data layout glue: NCHW -> [B*S, C*T] ----
    obs_flat = jnp.asarray(observation, jnp.float32).transpose(0, 2, 1, 3).reshape(N, C * T)
    la = jnp.asarray(last_action, jnp.float32)                     # [B, S_sel + 1]

    kernel = functools.partial(_gpm_kernel, C=C, T=T, n_rel1=R + 1, wf0_scaled=wf0_scaled)

    in_arrays = [obs_flat, la,
                 jnp.asarray(W1cat), jnp.asarray(b1cat),
                 jnp.asarray(W2bd), jnp.asarray(b2cat),
                 jnp.asarray(Pstack), jnp.asarray(Wstack), jnp.asarray(bg_row),
                 jnp.asarray(wfr), jnp.asarray(R9), jnp.asarray(Lmat), jnp.asarray(bias9)]

    def full(shape):
        nd = len(shape)
        return pl.BlockSpec(shape, lambda i, _nd=nd: (0,) * _nd)

    in_specs = [full(a.shape) for a in in_arrays]

    out = pl.pallas_call(
        kernel,
        out_shape=jax.ShapeDtypeStruct((B, A_out), jnp.float32),
        grid_spec=pltpu.PrefetchScalarGridSpec(
            num_scalar_prefetch=0,
            grid=(1,),                                             # single step: batch lives on sublanes
            in_specs=in_specs,
            out_specs=pl.BlockSpec((B, A_out), lambda i: (0, 0)),  # lane-dense output
        ),
        compiler_params=pltpu.CompilerParams(dimension_semantics=("arbitrary",)),
    )(*in_arrays)

    return out                                                     # [B, S_sel + 1]


# ----------------------------------------------------------------------------- pure-JAX reference
def ref_forward(observation, last_action, params, edge_index, edge_type, nodes_to_select,
                temperature=1.0):
    (W1s, b1s, W2s, b2s, W1m, b1m, W2m, b2m, Wroot, Wrel, bg, Wf, bf) = params
    B, C, S, T = observation.shape

    def branch(W1, b1, W2, b2):
        k = W1.shape[-1]
        T1 = T - k + 1
        patches = jnp.stack([observation[..., dk:dk + T1] for dk in range(k)], axis=-1)
        h1 = jnp.einsum('bcstk,ock->bost', patches, W1[:, :, 0, :]) + b1[None, :, None, None]
        h1 = jax.nn.relu(h1)
        out = jnp.einsum('bcst,oct->bos', h1, W2[:, :, 0, :]) + b2[None, :, None]
        return jax.nn.relu(out)

    short = branch(W1s, b1s, W2s, b2s)
    med = branch(W1m, b1m, W2m, b2m)
    longf = jax.nn.relu(jnp.max(observation, axis=-1))
    temporal = jnp.concatenate([short, med, longf], axis=1)          # [B, Ffeat, S]
    X = jnp.transpose(temporal, (0, 2, 1))                           # [B, S, Ffeat]

    A = jnp.asarray(_build_rel_adjacency(edge_index, edge_type, S))
    g = jnp.einsum('bsf,fg->bsg', X, Wroot) + bg
    for r in range(A.shape[0]):
        g = g + jnp.einsum('ij,bjf,fg->big', A[r], X, Wrel[r])
    g = jnp.where(g > 0, g, 0.01 * g)

    gsel = g[:, np.asarray(nodes_to_select), :]                      # [B, S_sel, Ffeat]
    ls = last_action[:, 1:]
    feats = jnp.concatenate([ls[..., None], gsel], axis=-1)          # [B, S_sel, Ffeat+1]
    asset_logits = jnp.einsum('bsf,f->bs', feats, Wf[0, :, 0, 0]) + bf[0]
    logits = jnp.concatenate([jnp.zeros((B, 1)), asset_logits], axis=1) / temperature
    return jax.nn.softmax(logits, axis=-1)


# ----------------------------------------------------------------------------- main
if __name__ == "__main__":
    key = jax.random.PRNGKey(0)
    B, C, S, T = 2, 3, 8, 50            # batch, initial_features, num_stocks, time_window
    k_s, k_m = 3, 21
    Cm, Fconv = 3, 20                   # conv_mid_features, conv_final_features
    T1s, T1m = T - k_s + 1, T - k_m + 1
    Ffeat = 2 * Fconv + C               # 43
    R = 2

    edge_index = np.array([[0, 1, 2, 3, 4, 5, 6, 7, 0, 2, 4, 6],
                           [1, 2, 3, 4, 5, 6, 7, 0, 4, 6, 0, 2]], dtype=np.int64)
    edge_type = np.array([0] * 8 + [1] * 4, dtype=np.int64)
    nodes_to_select = np.array([2, 0, 3, 1, 6, 4, 7, 5], dtype=np.int64)
    S_sel = nodes_to_select.shape[0]

    keys = jax.random.split(key, 16)

    def w(k, shape, s=0.1):
        return s * jax.random.normal(k, shape, jnp.float32)

    W1s = w(keys[0], (Cm, C, 1, k_s));     b1s = w(keys[1], (Cm,), 0.05)
    W2s = w(keys[2], (Fconv, Cm, 1, T1s)); b2s = w(keys[3], (Fconv,), 0.05)
    W1m = w(keys[4], (Cm, C, 1, k_m));     b1m = w(keys[5], (Cm,), 0.05)
    W2m = w(keys[6], (Fconv, Cm, 1, T1m)); b2m = w(keys[7], (Fconv,), 0.05)
    Wroot = w(keys[8], (Ffeat, Ffeat))
    Wrel = w(keys[9], (R, Ffeat, Ffeat))
    bg = w(keys[10], (Ffeat,), 0.05)
    Wf = w(keys[11], (1, Ffeat + 1, 1, 1))
    bf = w(keys[12], (1,), 0.05)
    params = (W1s, b1s, W2s, b2s, W1m, b1m, W2m, b2m, Wroot, Wrel, bg, Wf, bf)

    obs = jax.random.normal(keys[13], (B, C, S, T), jnp.float32)
    last_action = jax.nn.softmax(jax.random.normal(keys[14], (B, S_sel + 1), jnp.float32), axis=-1)

    out = gpm_simplified_forward(obs, last_action, params, edge_index, edge_type,
                                 nodes_to_select, temperature=1.0)
    out = jax.block_until_ready(out)

    ref = jax.block_until_ready(
        ref_forward(obs, last_action, params, edge_index, edge_type, nodes_to_select, 1.0))

    assert out.shape == (B, S_sel + 1)
    np.testing.assert_allclose(np.asarray(out), np.asarray(ref), rtol=2e-3, atol=2e-4)
    np.testing.assert_allclose(np.asarray(out).sum(axis=-1), np.ones(B), rtol=1e-5, atol=1e-5)
    print("KERNEL_OK")
</pallas_src>

<mosaic_0001>
module attributes {stable_mosaic.version = 11 : i64} {
  func.func @_gpm_kernel(%arg0: i32, %arg1: memref<16x150xf32, #tpu.memory_space<vmem>>, %arg2: memref<2x9xf32, #tpu.memory_space<vmem>>, %arg3: memref<150x234xf32, #tpu.memory_space<vmem>>, %arg4: memref<1x234xf32, #tpu.memory_space<vmem>>, %arg5: memref<234x40xf32, #tpu.memory_space<vmem>>, %arg6: memref<1x40xf32, #tpu.memory_space<vmem>>, %arg7: memref<3x16x16xf32, #tpu.memory_space<vmem>>, %arg8: memref<129x43xf32, #tpu.memory_space<vmem>>, %arg9: memref<1x43xf32, #tpu.memory_space<vmem>>, %arg10: memref<43x1xf32, #tpu.memory_space<vmem>>, %arg11: memref<16x9xf32, #tpu.memory_space<vmem>>, %arg12: memref<2x16xf32, #tpu.memory_space<vmem>>, %arg13: memref<1x9xf32, #tpu.memory_space<vmem>>, %arg14: memref<2x9xf32, #tpu.memory_space<vmem>>) attributes {dimension_semantics = [#tpu.dimension_semantics<arbitrary>], iteration_bounds = array<i64: 1>, scalar_prefetch = 0 : i64, scratch_operands = 0 : i64, tpu.core_type = #tpu.core_type<tc>, window_params = [{pipeline_mode = #tpu.pipeline_mode<synchronous>, transform_indices = @transform_0, window_bounds = array<i64: 16, 150>}, {pipeline_mode = #tpu.pipeline_mode<synchronous>, transform_indices = @transform_1, window_bounds = array<i64: 2, 9>}, {pipeline_mode = #tpu.pipeline_mode<synchronous>, transform_indices = @transform_2, window_bounds = array<i64: 150, 234>}, {pipeline_mode = #tpu.pipeline_mode<synchronous>, transform_indices = @transform_3, window_bounds = array<i64: 1, 234>}, {pipeline_mode = #tpu.pipeline_mode<synchronous>, transform_indices = @transform_4, window_bounds = array<i64: 234, 40>}, {pipeline_mode = #tpu.pipeline_mode<synchronous>, transform_indices = @transform_5, window_bounds = array<i64: 1, 40>}, {pipeline_mode = #tpu.pipeline_mode<synchronous>, transform_indices = @transform_6, window_bounds = array<i64: 3, 16, 16>}, {pipeline_mode = #tpu.pipeline_mode<synchronous>, transform_indices = @transform_7, window_bounds = array<i64: 129, 43>}, {pipeline_mode = #tpu.pipeline_mode<synchronous>, transform_indices = @transform_8, window_bounds = array<i64: 1, 43>}, {pipeline_mode = #tpu.pipeline_mode<synchronous>, transform_indices = @transform_9, window_bounds = array<i64: 43, 1>}, {pipeline_mode = #tpu.pipeline_mode<synchronous>, transform_indices = @transform_10, window_bounds = array<i64: 16, 9>}, {pipeline_mode = #tpu.pipeline_mode<synchronous>, transform_indices = @transform_11, window_bounds = array<i64: 2, 16>}, {pipeline_mode = #tpu.pipeline_mode<synchronous>, transform_indices = @transform_12, window_bounds = array<i64: 1, 9>}, {pipeline_mode = #tpu.pipeline_mode<synchronous>, transform_indices = @transform_13, window_bounds = array<i64: 2, 9>}]} {
    %c0 = arith.constant 0 : index
    %c0_0 = arith.constant 0 : index
    %0 = vector.load %arg1[%c0, %c0_0] : memref<16x150xf32, #tpu.memory_space<vmem>>, vector<16x150xf32>
    %c0_1 = arith.constant 0 : index
    %c0_2 = arith.constant 0 : index
    %1 = vector.load %arg3[%c0_1, %c0_2] : memref<150x234xf32, #tpu.memory_space<vmem>>, vector<150x234xf32>
    %cst = arith.constant dense<0.000000e+00> : vector<16x234xf32>
    %2 = tpu.matmul %0, %1, %cst {dimension_numbers = #tpu.dot_dimension_numbers<[1], [0], [0], [1], [0, 0, 1, 1], [], []>, precision = #tpu.contract_precision<fp32>} : vector<16x150xf32>, vector<150x234xf32>, vector<16x234xf32> -> vector<16x234xf32>
    %c0_3 = arith.constant 0 : index
    %c0_4 = arith.constant 0 : index
    %3 = vector.load %arg4[%c0_3, %c0_4] : memref<1x234xf32, #tpu.memory_space<vmem>>, vector<1x234xf32>
    %4 = vector.broadcast %3 : vector<1x234xf32> to vector<16x234xf32>
    %5 = arith.addf %2, %4 : vector<16x234xf32>
    %cst_5 = arith.constant 0.000000e+00 : f32
    %6 = vector.broadcast %cst_5 : f32 to vector<16x234xf32>
    %7 = arith.maximumf %5, %6 : vector<16x234xf32>
    %c0_6 = arith.constant 0 : index
    %c0_7 = arith.constant 0 : index
    %8 = vector.load %arg5[%c0_6, %c0_7] : memref<234x40xf32, #tpu.memory_space<vmem>>, vector<234x40xf32>
    %cst_8 = arith.constant dense<0.000000e+00> : vector<16x40xf32>
    %9 = tpu.matmul %7, %8, %cst_8 {dimension_numbers = #tpu.dot_dimension_numbers<[1], [0], [0], [1], [0, 0, 1, 1], [], []>, precision = #tpu.contract_precision<fp32>} : vector<16x234xf32>, vector<234x40xf32>, vector<16x40xf32> -> vector<16x40xf32>
    %c0_9 = arith.constant 0 : index
    %c0_10 = arith.constant 0 : index
    %10 = vector.load %arg6[%c0_9, %c0_10] : memref<1x40xf32, #tpu.memory_space<vmem>>, vector<1x40xf32>
    %11 = vector.broadcast %10 : vector<1x40xf32> to vector<16x40xf32>
    %12 = arith.addf %9, %11 : vector<16x40xf32>
    %cst_11 = arith.constant 0.000000e+00 : f32
    %13 = vector.broadcast %cst_11 : f32 to vector<16x40xf32>
    %14 = arith.maximumf %12, %13 : vector<16x40xf32>
    %15 = tpu.iota {dimensions = array<i32: 1>} : vector<16x150xi32>
    %c0_i32 = arith.constant 0 : i32
    %16 = vector.broadcast %c0_i32 : i32 to vector<16x150xi32>
    %17 = arith.cmpi sge, %15, %16 : vector<16x150xi32>
    %c50_i32 = arith.constant 50 : i32
    %18 = vector.broadcast %c50_i32 : i32 to vector<16x150xi32>
    %19 = arith.cmpi slt, %15, %18 : vector<16x150xi32>
    %20 = arith.andi %17, %19 : vector<16x150xi1>
    %cst_12 = arith.constant 0.000000e+00 : f32
    %21 = vector.broadcast %cst_12 : f32 to vector<16x150xf32>
    %22 = arith.select %20, %0, %21 : vector<16x150xi1>, vector<16x150xf32>
    %cst_13 = arith.constant dense<0xFF800000> : vector<16xf32>
    %23 = vector.multi_reduction <maximumf>, %22, %cst_13 [1] : vector<16x150xf32> to vector<16xf32>
    %24 = vector.shape_cast %23 : vector<16xf32> to vector<16x1xf32>
    %c50_i32_14 = arith.constant 50 : i32
    %25 = vector.broadcast %c50_i32_14 : i32 to vector<16x150xi32>
    %26 = arith.cmpi sge, %15, %25 : vector<16x150xi32>
    %c100_i32 = arith.constant 100 : i32
    %27 = vector.broadcast %c100_i32 : i32 to vector<16x150xi32>
    %28 = arith.cmpi slt, %15, %27 : vector<16x150xi32>
    %29 = arith.andi %26, %28 : vector<16x150xi1>
    %cst_15 = arith.constant 0.000000e+00 : f32
    %30 = vector.broadcast %cst_15 : f32 to vector<16x150xf32>
    %31 = arith.select %29, %0, %30 : vector<16x150xi1>, vector<16x150xf32>
    %cst_16 = arith.constant dense<0xFF800000> : vector<16xf32>
    %32 = vector.multi_reduction <maximumf>, %31, %cst_16 [1] : vector<16x150xf32> to vector<16xf32>
    %33 = vector.shape_cast %32 : vector<16xf32> to vector<16x1xf32>
    %c100_i32_17 = arith.constant 100 : i32
    %34 = vector.broadcast %c100_i32_17 : i32 to vector<16x150xi32>
    %35 = arith.cmpi sge, %15, %34 : vector<16x150xi32>
    %c150_i32 = arith.constant 150 : i32
    %36 = vector.broadcast %c150_i32 : i32 to vector<16x150xi32>
    %37 = arith.cmpi slt, %15, %36 : vector<16x150xi32>
    %38 = arith.andi %35, %37 : vector<16x150xi1>
    %cst_18 = arith.constant 0.000000e+00 : f32
    %39 = vector.broadcast %cst_18 : f32 to vector<16x150xf32>
    %40 = arith.select %38, %0, %39 : vector<16x150xi1>, vector<16x150xf32>
    %cst_19 = arith.constant dense<0xFF800000> : vector<16xf32>
    %41 = vector.multi_reduction <maximumf>, %40, %cst_19 [1] : vector<16x150xf32> to vector<16xf32>
    %42 = vector.shape_cast %41 : vector<16xf32> to vector<16x1xf32>
    %43 = tpu.concatenate %14, %24, %33, %42 in 1 : vector<16x40xf32>, vector<16x1xf32>, vector<16x1xf32>, vector<16x1xf32> -> vector<16x43xf32>
    %c0_20 = arith.constant 0 : index
    %c0_21 = arith.constant 0 : index
    %c0_22 = arith.constant 0 : index
    %44 = vector.load %arg7[%c0_20, %c0_21, %c0_22] : memref<3x16x16xf32, #tpu.memory_space<vmem>>, vector<1x16x16xf32>
    %45 = vector.shape_cast %44 : vector<1x16x16xf32> to vector<16x16xf32>
    %cst_23 = arith.constant dense<0.000000e+00> : vector<16x43xf32>
    %46 = tpu.matmul %45, %43, %cst_23 {dimension_numbers = #tpu.dot_dimension_numbers<[1], [0], [0], [1], [0, 0, 1, 1], [], []>, precision = #tpu.contract_precision<fp32>} : vector<16x16xf32>, vector<16x43xf32>, vector<16x43xf32> -> vector<16x43xf32>
    %c1 = arith.constant 1 : index
    %c0_24 = arith.constant 0 : index
    %c0_25 = arith.constant 0 : index
    %47 = vector.load %arg7[%c1, %c0_24, %c0_25] : memref<3x16x16xf32, #tpu.memory_space<vmem>>, vector<1x16x16xf32>
    %48 = vector.shape_cast %47 : vector<1x16x16xf32> to vector<16x16xf32>
    %cst_26 = arith.constant dense<0.000000e+00> : vector<16x43xf32>
    %49 = tpu.matmul %48, %43, %cst_26 {dimension_numbers = #tpu.dot_dimension_numbers<[1], [0], [0], [1], [0, 0, 1, 1], [], []>, precision = #tpu.contract_precision<fp32>} : vector<16x16xf32>, vector<16x43xf32>, vector<16x43xf32> -> vector<16x43xf32>
    %c2 = arith.constant 2 : index
    %c0_27 = arith.constant 0 : index
    %c0_28 = arith.constant 0 : index
    %50 = vector.load %arg7[%c2, %c0_27, %c0_28] : memref<3x16x16xf32, #tpu.memory_space<vmem>>, vector<1x16x16xf32>
    %51 = vector.shape_cast %50 : vector<1x16x16xf32> to vector<16x16xf32>
    %cst_29 = arith.constant dense<0.000000e+00> : vector<16x43xf32>
    %52 = tpu.matmul %51, %43, %cst_29 {dimension_numbers = #tpu.dot_dimension_numbers<[1], [0], [0], [1], [0, 0, 1, 1], [], []>, precision = #tpu.contract_precision<fp32>} : vector<16x16xf32>, vector<16x43xf32>, vector<16x43xf32> -> vector<16x43xf32>
    %53 = tpu.concatenate %46, %49, %52 in 1 : vector<16x43xf32>, vector<16x43xf32>, vector<16x43xf32> -> vector<16x129xf32>
    %c0_30 = arith.constant 0 : index
    %c0_31 = arith.constant 0 : index
    %54 = vector.load %arg8[%c0_30, %c0_31] : memref<129x43xf32, #tpu.memory_space<vmem>>, vector<129x43xf32>
    %cst_32 = arith.constant dense<0.000000e+00> : vector<16x43xf32>
    %55 = tpu.matmul %53, %54, %cst_32 {dimension_numbers = #tpu.dot_dimension_numbers<[1], [0], [0], [1], [0, 0, 1, 1], [], []>, precision = #tpu.contract_precision<fp32>} : vector<16x129xf32>, vector<129x43xf32>, vector<16x43xf32> -> vector<16x43xf32>
    %c0_33 = arith.constant 0 : index
    %c0_34 = arith.constant 0 : index
    %56 = vector.load %arg9[%c0_33, %c0_34] : memref<1x43xf32, #tpu.memory_space<vmem>>, vector<1x43xf32>
    %57 = vector.broadcast %56 : vector<1x43xf32> to vector<16x43xf32>
    %58 = arith.addf %55, %57 : vector<16x43xf32>
    %cst_35 = arith.constant 0.000000e+00 : f32
    %59 = vector.broadcast %cst_35 : f32 to vector<16x43xf32>
    %60 = arith.cmpf ogt, %58, %59 : vector<16x43xf32>
    %cst_36 = arith.constant 0.00999999977 : f32
    %61 = vector.broadcast %cst_36 : f32 to vector<16x43xf32>
    %62 = arith.mulf %61, %58 : vector<16x43xf32>
    %63 = arith.select %60, %58, %62 : vector<16x43xi1>, vector<16x43xf32>
    %c0_37 = arith.constant 0 : index
    %c0_38 = arith.constant 0 : index
    %64 = vector.load %arg10[%c0_37, %c0_38] : memref<43x1xf32, #tpu.memory_space<vmem>>, vector<43x1xf32>
    %cst_39 = arith.constant dense<0.000000e+00> : vector<16x1xf32>
    %65 = tpu.matmul %63, %64, %cst_39 {dimension_numbers = #tpu.dot_dimension_numbers<[1], [0], [0], [1], [0, 0, 1, 1], [], []>, precision = #tpu.contract_precision<fp32>} : vector<16x43xf32>, vector<43x1xf32>, vector<16x1xf32> -> vector<16x1xf32>
    %c0_40 = arith.constant 0 : index
    %c0_41 = arith.constant 0 : index
    %66 = vector.load %arg11[%c0_40, %c0_41] : memref<16x9xf32, #tpu.memory_space<vmem>>, vector<16x9xf32>
    %67 = vector.broadcast %65 : vector<16x1xf32> to vector<16x9xf32>
    %68 = arith.mulf %67, %66 : vector<16x9xf32>
    %c0_42 = arith.constant 0 : index
    %c0_43 = arith.constant 0 : index
    %69 = vector.load %arg2[%c0_42, %c0_43] : memref<2x9xf32, #tpu.memory_space<vmem>>, vector<2x9xf32>
    %70 = tpu.iota {dimensions = array<i32: 1>} : vector<2x9xi32>
    %c0_i32_44 = arith.constant 0 : i32
    %71 = vector.broadcast %c0_i32_44 : i32 to vector<2x9xi32>
    %72 = arith.cmpi eq, %70, %71 : vector<2x9xi32>
    %cst_45 = arith.constant 0.000000e+00 : f32
    %73 = vector.broadcast %cst_45 : f32 to vector<2x9xf32>
    %74 = arith.select %72, %73, %69 : vector<2x9xi1>, vector<2x9xf32>
    %c0_46 = arith.constant 0 : index
    %c0_47 = arith.constant 0 : index
    %75 = vector.load %arg12[%c0_46, %c0_47] : memref<2x16xf32, #tpu.memory_space<vmem>>, vector<2x16xf32>
    %cst_48 = arith.constant dense<0.000000e+00> : vector<2x9xf32>
    %76 = tpu.matmul %75, %68, %cst_48 {dimension_numbers = #tpu.dot_dimension_numbers<[1], [0], [0], [1], [0, 0, 1, 1], [], []>, precision = #tpu.contract_precision<fp32>} : vector<2x16xf32>, vector<16x9xf32>, vector<2x9xf32> -> vector<2x9xf32>
    %cst_49 = arith.constant 0.00951265544 : f32
    %77 = vector.broadcast %cst_49 : f32 to vector<2x9xf32>
    %78 = arith.mulf %77, %74 : vector<2x9xf32>
    %79 = arith.addf %76, %78 : vector<2x9xf32>
    %c0_50 = arith.constant 0 : index
    %c0_51 = arith.constant 0 : index
    %80 = vector.load %arg13[%c0_50, %c0_51] : memref<1x9xf32, #tpu.memory_space<vmem>>, vector<1x9xf32>
    %81 = vector.broadcast %80 : vector<1x9xf32> to vector<2x9xf32>
    %82 = arith.addf %79, %81 : vector<2x9xf32>
    %cst_52 = arith.constant dense<0xFF800000> : vector<2xf32>
    %83 = vector.multi_reduction <maximumf>, %82, %cst_52 [1] : vector<2x9xf32> to vector<2xf32>
    %84 = vector.shape_cast %83 : vector<2xf32> to vector<2x1xf32>
    %85 = vector.broadcast %84 : vector<2x1xf32> to vector<2x9xf32>
    %86 = arith.subf %82, %85 : vector<2x9xf32>
    %87 = math.exp %86 : vector<2x9xf32>
    %cst_53 = arith.constant dense<0.000000e+00> : vector<2xf32>
    %88 = vector.multi_reduction <add>, %87, %cst_53 [1] : vector<2x9xf32> to vector<2xf32>
    %89 = vector.shape_cast %88 : vector<2xf32> to vector<2x1xf32>
    %90 = vector.broadcast %89 : vector<2x1xf32> to vector<2x9xf32>
    %91 = arith.divf %87, %90 : vector<2x9xf32>
    %c0_54 = arith.constant 0 : index
    %c0_55 = arith.constant 0 : index
    %92 = vector.load %arg14[%c0_54, %c0_55] : memref<2x9xf32, #tpu.memory_space<vmem>>, vector<2x9xf32>
    tpu.vector_store %arg14[%c0_54, %c0_55], %91 {strides = array<i32>} : memref<2x9xf32, #tpu.memory_space<vmem>>, vector<2x9xf32>,
    return
  }
  func.func @transform_0(%arg0: i32) -> (i32, i32) {
    %c0_i32 = arith.constant 0 : i32
    %c0_i32_0 = arith.constant 0 : i32
    %c0_i32_1 = arith.constant 0 : i32
    return %c0_i32, %c0_i32_0 : i32, i32
  }
  func.func @transform_1(%arg0: i32) -> (i32, i32) {
    %c0_i32 = arith.constant 0 : i32
    %c0_i32_0 = arith.constant 0 : i32
    %c0_i32_1 = arith.constant 0 : i32
    return %c0_i32, %c0_i32_0 : i32, i32
  }
  func.func @transform_2(%arg0: i32) -> (i32, i32) {
    %c0_i32 = arith.constant 0 : i32
    %c0_i32_0 = arith.constant 0 : i32
    %c0_i32_1 = arith.constant 0 : i32
    return %c0_i32, %c0_i32_0 : i32, i32
  }
  func.func @transform_3(%arg0: i32) -> (i32, i32) {
    %c0_i32 = arith.constant 0 : i32
    %c0_i32_0 = arith.constant 0 : i32
    %c0_i32_1 = arith.constant 0 : i32
    return %c0_i32, %c0_i32_0 : i32, i32
  }
  func.func @transform_4(%arg0: i32) -> (i32, i32) {
    %c0_i32 = arith.constant 0 : i32
    %c0_i32_0 = arith.constant 0 : i32
    %c0_i32_1 = arith.constant 0 : i32
    return %c0_i32, %c0_i32_0 : i32, i32
  }
  func.func @transform_5(%arg0: i32) -> (i32, i32) {
    %c0_i32 = arith.constant 0 : i32
    %c0_i32_0 = arith.constant 0 : i32
    %c0_i32_1 = arith.constant 0 : i32
    return %c0_i32, %c0_i32_0 : i32, i32
  }
  func.func @transform_6(%arg0: i32) -> (i32, i32, i32) {
    %c0_i32 = arith.constant 0 : i32
    %c0_i32_0 = arith.constant 0 : i32
    %c0_i32_1 = arith.constant 0 : i32
    %c0_i32_2 = arith.constant 0 : i32
    return %c0_i32, %c0_i32_0, %c0_i32_1 : i32, i32, i32
  }
  func.func @transform_7(%arg0: i32) -> (i32, i32) {
    %c0_i32 = arith.constant 0 : i32
    %c0_i32_0 = arith.constant 0 : i32
    %c0_i32_1 = arith.constant 0 : i32
    return %c0_i32, %c0_i32_0 : i32, i32
  }
  func.func @transform_8(%arg0: i32) -> (i32, i32) {
    %c0_i32 = arith.constant 0 : i32
    %c0_i32_0 = arith.constant 0 : i32
    %c0_i32_1 = arith.constant 0 : i32
    return %c0_i32, %c0_i32_0 : i32, i32
  }
  func.func @transform_9(%arg0: i32) -> (i32, i32) {
    %c0_i32 = arith.constant 0 : i32
    %c0_i32_0 = arith.constant 0 : i32
    %c0_i32_1 = arith.constant 0 : i32
    return %c0_i32, %c0_i32_0 : i32, i32
  }
  func.func @transform_10(%arg0: i32) -> (i32, i32) {
    %c0_i32 = arith.constant 0 : i32
    %c0_i32_0 = arith.constant 0 : i32
    %c0_i32_1 = arith.constant 0 : i32
    return %c0_i32, %c0_i32_0 : i32, i32
  }
  func.func @transform_11(%arg0: i32) -> (i32, i32) {
    %c0_i32 = arith.constant 0 : i32
    %c0_i32_0 = arith.constant 0 : i32
    %c0_i32_1 = arith.constant 0 : i32
    return %c0_i32, %c0_i32_0 : i32, i32
  }
  func.func @transform_12(%arg0: i32) -> (i32, i32) {
    %c0_i32 = arith.constant 0 : i32
    %c0_i32_0 = arith.constant 0 : i32
    %c0_i32_1 = arith.constant 0 : i32
    return %c0_i32, %c0_i32_0 : i32, i32
  }
  func.func @transform_13(%arg0: i32) -> (i32, i32) {
    %c0_i32 = arith.constant 0 : i32
    %c0_i32_0 = arith.constant 0 : i32
    %c0_i32_1 = arith.constant 0 : i32
    return %c0_i32, %c0_i32_0 : i32, i32
  }
}

</mosaic_0001>

<bundles_post_ra>
// kernel: tpu_custom_call.1
= control target key start
LH: loop header
LB: loop body
LE: loop exit
PB: predicated region body
PF: predicated region fallthrough
CT: control target
= control target key end

     0   :  { %s8644_s0 = inlined_call_operand.vmem [shape: f32[16,150], index: 0, kind: input, shape index: {}]   ;;  %s8645_s1 = inlined_call_operand.vmem [shape: f32[2,9], index: 1, kind: input, shape index: {}]   ;;  %s8646_s2 = inlined_call_operand.vmem [shape: f32[150,234], index: 2, kind: input, shape index: {}]   ;;  %s8647_s3 = inlined_call_operand.vmem [shape: f32[1,234], index: 3, kind: input, shape index: {}]   ;;  %s8648_s4 = inlined_call_operand.vmem [shape: f32[234,40], index: 4, kind: input, shape index: {}]   ;;  %s8649_s5 = inlined_call_operand.vmem [shape: f32[1,40], index: 5, kind: input, shape index: {}]   ;;  %s8650_s6 = inlined_call_operand.vmem [shape: f32[3,16,16], index: 6, kind: input, shape index: {}]   ;;  %s8651_s7 = inlined_call_operand.vmem [shape: f32[129,43], index: 7, kind: input, shape index: {}]   ;;  %s8652_s8 = inlined_call_operand.vmem [shape: f32[1,43], index: 8, kind: input, shape index: {}]   ;;  %s8653_s9 = inlined_call_operand.vmem [shape: f32[43,1], index: 9, kind: input, shape index: {}]   ;;  %s8654_s10 = inlined_call_operand.vmem [shape: f32[16,9], index: 10, kind: input, shape index: {}]   ;;  %s8655_s11 = inlined_call_operand.vmem [shape: f32[2,16], index: 11, kind: input, shape index: {}]   ;;  %s8656_s12 = inlined_call_operand.vmem [shape: f32[1,9], index: 12, kind: input, shape index: {}]   ;;  %s8657_s13 = inlined_call_operand.hbm [shape: f32[2,9], index: 13, kind: output, shape index: {}]  }
   0x1   :  { %v80_v0 = vld [vmem:[%s8646_s2 + $0xf8] sm:$0xff]  ;;  %v79_v1 = vld [vmem:[%s8646_s2 + $0xf0] sm:$0xff]  ;;  %v78_v2 = vld [vmem:[%s8646_s2 + $0xe8] sm:$0xff] }
   0x2   :  { %v6064_v3 = vand.u32 4294901760, %v80_v0  ;;  %v6066_v4 = vand.u32 4294901760, %v79_v1  ;;  %v6068_v5 = vand.u32 4294901760, %v78_v2  ;;  %v77_v6 = vld [vmem:[%s8646_s2 + $0xe0] sm:$0xff]  ;;  %v76_v7 = vld [vmem:[%s8646_s2 + $0xd8] sm:$0xff]  ;;  %v75_v8 = vld [vmem:[%s8646_s2 + $0xd0] sm:$0xff] }
   0x3   :  { %v6079_v9 = vand.u32 4294901760, %v77_v6  ;;  %v6081_v10 = vand.u32 4294901760, %v76_v7  ;;  %v6083_v11 = vand.u32 4294901760, %v75_v8  ;;  %v74_v12 = vld [vmem:[%s8646_s2 + $0xc8] sm:$0xff]  ;;  %v73_v13 = vld [vmem:[%s8646_s2 + $0xc0] sm:$0xff]  ;;  %v72_v14 = vld [vmem:[%s8646_s2 + $0xb8] sm:$0xff] }
   0x4   :  { %114 = vmatprep.subr.mxu0 %v6064_v3  ;;  %v6095_v15 = vand.u32 4294901760, %v74_v12  ;;  %v6097_v16 = vand.u32 4294901760, %v73_v13  ;;  %v6099_v17 = vand.u32 4294901760, %v72_v14  ;;  %v6102_v18 = vsub.f32 %v80_v0, %v6064_v3  ;;  %v6107_v19 = vld [vmem:[%s8646_s2 + $0xb0] sm:$0xff]  ;;  %v6112_v20 = vld [vmem:[%s8646_s2 + $0xa8] sm:$0xff]  ;;  %v6117_v21 = vld [vmem:[%s8646_s2 + $0xa0] sm:$0xff] }
   0x5   :  { %116 = vmatpush1.msra.mxu0 %v6066_v4  ;;  %v6121_v22 = vand.u32 4294901760, %v6107_v19  ;;  %v6124_v23 = vsub.f32 %v79_v1, %v6066_v4  ;;  %v6127_v24 = vand.u32 4294901760, %v6112_v20  ;;  %v6130_v25 = vsub.f32 %v78_v2, %v6068_v5  ;;  %v6135_v26 = vld [vmem:[%s8646_s2 + $0x98] sm:$0xff]  ;;  %v6140_v27 = vld [vmem:[%s8646_s2 + $0x90] sm:$0xff]  ;;  %v6145_v28 = vld [vmem:[%s8646_s2 + $0x88] sm:$0xff] }
   0x6   :  { %8881 = vst [vmem:[#allocation5_spill] sm:$0xff] %v6102_v18  ;;  %118 = vmatprep.subr.mxu0 %v6068_v5  ;;  %v8671_v29 = vand.u32 4294901760, %v6102_v18  ;;  %v6150_v30 = vand.u32 4294901760, %v6117_v21  ;;  %v6153_v31 = vsub.f32 %v77_v6, %v6079_v9  ;;  %v6156_v32 = vand.u32 4294901760, %v6135_v26  ;;  %v6170_v37 = vld [vmem:[%s8646_s2 + $0x80] sm:$0xff]  ;;  %v6197_v46 = vld [vmem:[%s8646_s2 + $0x78] sm:$0xff] }
   0x7   :  { %120 = vmatpush1.msra.mxu0 %v6079_v9  ;;  %v8670_v33 = vand.u32 4294901760, %v6124_v23  ;;  %v8668_v34 = vand.u32 4294901760, %v6130_v25  ;;  %v6162_v35 = vsub.f32 %v76_v7, %v6081_v10  ;;  %v6165_v36 = vand.u32 4294901760, %v6140_v27  ;;  %v6210_v51 = vld [vmem:[%s8646_s2 + $0x70] sm:$0xff]  ;;  %v6220_v56 = vld [vmem:[%s8646_s2 + $0x68] sm:$0xff]  ;;  %v6235_v61 = vld [vmem:[%s8646_s2 + $0x60] sm:$0xff] }
   0x8   :  { %8882 = vst [vmem:[#allocation6_spill] sm:$0xff] %v6150_v30  ;;  %8883 = vst [vmem:[#allocation7_spill] sm:$0xff] %v6156_v32  ;;  %122 = vmatprep.subr.mxu0 %v6081_v10  ;;  %v251_v38 = vsub.f32 %v6102_v18, %v8671_v29  ;;  %v8667_v39 = vand.u32 4294901760, %v6153_v31  ;;  %v6178_v40 = vsub.f32 %v75_v8, %v6083_v11  ;;  %v6181_v41 = vand.u32 4294901760, %v6145_v28  ;;  %v6250_v2 = vld [vmem:[%s8646_s2 + $0x58] sm:$0xff] }
   0x9   :  { %8884 = vst [vmem:[#allocation8_spill] sm:$0xff] %v6165_v36  ;;  %124 = vmatpush1.msra.mxu0 %v6083_v11  ;;  %v257_v42 = vsub.f32 %v6124_v23, %v8670_v33  ;;  %v263_v43 = vsub.f32 %v6130_v25, %v8668_v34  ;;  %v8665_v44 = vand.u32 4294901760, %v6162_v35  ;;  %v6192_v45 = vsub.f32 %v74_v12, %v6095_v15 }
   0xa   :  { %8885 = vst [vmem:[#allocation9_spill] sm:$0xff] %v6181_v41  ;;  %126 = vmatprep.subr.mxu0 %v6095_v15  ;;  %v252_v47 = vand.u32 4294901760, %v251_v38  ;;  %v269_v48 = vsub.f32 %v6153_v31, %v8667_v39  ;;  %v8663_v49 = vand.u32 4294901760, %v6178_v40  ;;  %v6205_v50 = vand.u32 4294901760, %v6170_v37 }
   0xb   :  { %128 = vmatpush1.msra.mxu0 %v6097_v16  ;;  %v258_v52 = vand.u32 4294901760, %v257_v42  ;;  %v264_v53 = vand.u32 4294901760, %v263_v43  ;;  %v275_v54 = vsub.f32 %v6162_v35, %v8665_v44  ;;  %v8662_v55 = vand.u32 4294901760, %v6192_v45 }
   0xc   :  { %8886 = vst [vmem:[#allocation10_spill] sm:$0xff] %v6205_v50  ;;  %130 = vmatprep.subr.mxu0 %v6099_v17  ;;  %253 = vmatprep.subr.mxu1 %v252_v47  ;;  %v270_v57 = vand.u32 4294901760, %v269_v48  ;;  %v281_v58 = vsub.f32 %v6178_v40, %v8663_v49  ;;  %v6227_v59 = vsub.f32 %v73_v13, %v6097_v16  ;;  %v6230_v60 = vand.u32 4294901760, %v6197_v46  ;;  %v6264_v13 = vld [vmem:[%s8646_s2 + $0x50] sm:$0xff] }
   0xd   :  { %132 = vmatpush1.msra.mxu0 %v6121_v22  ;;  %259 = vmatpush1.msra.mxu1 %v258_v52  ;;  %v276_v62 = vand.u32 4294901760, %v275_v54  ;;  %v287_v63 = vsub.f32 %v6192_v45, %v8662_v55  ;;  %v6242_v0 = vsub.f32 %v72_v14, %v6099_v17  ;;  %v6245_v1 = vand.u32 4294901760, %v6210_v51 }
   0xe   :  { %8887 = vst [vmem:[#allocation11_spill] sm:$0xff] %v6230_v60  ;;  %134 = vmatprep.subr.mxu0 %v6127_v24  ;;  %265 = vmatprep.subr.mxu1 %v264_v53  ;;  %v282_v6 = vand.u32 4294901760, %v281_v58  ;;  %v8660_v7 = vand.u32 4294901760, %v6227_v59  ;;  %v6256_v8 = vsub.f32 %v6107_v19, %v6121_v22  ;;  %v6259_v12 = vand.u32 4294901760, %v6220_v56 }
   0xf   :  { %8888 = vst [vmem:[#allocation12_spill] sm:$0xff] %v6245_v1  ;;  %136 = vmatpush1.msra.mxu0 %v6150_v30  ;;  %271 = vmatpush1.msra.mxu1 %v270_v57  ;;  %v288_v14 = vand.u32 4294901760, %v287_v63  ;;  %v8658_v38 = vand.u32 4294901760, %v6242_v0  ;;  %v6270_v42 = vsub.f32 %v6112_v20, %v6127_v24  ;;  %v6273_v19 = vand.u32 4294901760, %v6235_v61 }
  0x10   :  { %8889 = vst [vmem:[#allocation13_spill] sm:$0xff] %v6259_v12 }
  0x11   :  { %8890 = vst [vmem:[#allocation14_spill] sm:$0xff] %v6273_v19 }
  0x12   :  { %18 = vsyncpa [#allocation3], 0  ;;  %138 = vmatprep.subr.mxu0 %v6156_v32  ;;  %277 = vmatprep.subr.mxu1 %v276_v62  ;;  %v293_v43 = vsub.f32 %v6227_v59, %v8660_v7  ;;  %v8659_v47 = vand.u32 4294901760, %v6256_v8  ;;  %v6282_v48 = vsub.f32 %v6117_v21, %v6150_v30  ;;  %v6285_v20 = vand.u32 4294901760, %v6250_v2  ;;  %v6290_v52 = vld [vmem:[%s8646_s2 + $0x48] sm:$0xff]  ;;  %v6343_v49 = vld [vmem:[%s8646_s2 + $0x30] sm:$0xff] }
  0x13   :  { %140 = vmatpush1.msra.mxu0 %v6165_v36  ;;  %283 = vmatpush1.msra.mxu1 %v282_v6  ;;  %v299_v53 = vsub.f32 %v6242_v0, %v8658_v38  ;;  %v8661_v54 = vand.u32 4294901760, %v6270_v42  ;;  %v6299_v21 = vsub.f32 %v6135_v26, %v6156_v32  ;;  %v6302_v57 = vand.u32 4294901760, %v6264_v13  ;;  %v6316_v26 = vld [vmem:[%s8646_s2 + $0x40] sm:$0xff]  ;;  %v6359_v44 = vld [vmem:[%s8646_s2 + $0x28] sm:$0xff]  ;;  %v6386_v33 = vld [vmem:[%s8646_s2 + $0x18] sm:$0xff]  ;;  %s5981_s20 = smov 86  }
  0x14   :  { %8891 = vst [vmem:[#allocation15_spill] sm:$0xff] %v6285_v20  ;;  %142 = vmatprep.subr.mxu0 %v6181_v41  ;;  %289 = vmatprep.subr.mxu1 %v288_v14  ;;  %v294_v58 = vand.u32 4294901760, %v293_v43  ;;  %v305_v62 = vsub.f32 %v6256_v8, %v8659_v47  ;;  %v8664_v63 = vand.u32 4294901760, %v6282_v48  ;;  %v6311_v6 = vsub.f32 %v6140_v27, %v6165_v36  ;;  %v6329_v27 = vld [vmem:[%s8646_s2 + $0x38] sm:$0xff]  ;;  %s5984_s18 = smov [#allocation2]  }
  0x15   :  { %8892 = vst [vmem:[#allocation16_spill] sm:$0xff] %v6302_v57  ;;  %144 = vmatpush1.msra.mxu0 %v6205_v50  ;;  %v300_v38 = vand.u32 4294901760, %v299_v53  ;;  %v311_v14 = vsub.f32 %v6270_v42, %v8661_v54  ;;  %v8666_v43 = vand.u32 4294901760, %v6299_v21  ;;  %v6324_v47 = vand.u32 4294901760, %v6290_v52 }
  0x16   :  { %295 = vmatpush1.msra.mxu1 %v294_v58  ;;  %146 = vmatprep.subr.mxu0 %v6230_v60  ;;  %v306_v7 = vand.u32 4294901760, %v305_v62  ;;  %v317_v53 = vsub.f32 %v6282_v48, %v8664_v63  ;;  %v8669_v54 = vand.u32 4294901760, %v6311_v6  ;;  %v6338_v55 = vsub.f32 %v6145_v28, %v6181_v41 }
  0x17   :  { %8893 = vst [vmem:[#allocation17_spill] sm:$0xff] %v6324_v47  ;;  %301 = vmatprep.subr.mxu1 %v300_v38  ;;  %148 = vmatpush1.msra.mxu0 %v6245_v1  ;;  %v312_v58 = vand.u32 4294901760, %v311_v14  ;;  %v323_v62 = vsub.f32 %v6299_v21, %v8666_v43  ;;  %v6350_v63 = vand.u32 4294901760, %v6316_v26  ;;  %v6354_v28 = vsub.f32 %v6170_v37, %v6205_v50  ;;  %v6372_v37 = vld [vmem:[%s8646_s2 + $0x20] sm:$0xff] }
  0x18   :  { %vm106_vm0 = vcmask 1045504   ;;  %307 = vmatpush1.msra.mxu1 %v306_v7  ;;  %150 = vmatprep.subr.mxu0 %v6259_v12  ;;  %v318_v38 = vand.u32 4294901760, %v317_v53  ;;  %v329_v14 = vsub.f32 %v6311_v6, %v8669_v54  ;;  %v8674_v43 = vand.u32 4294901760, %v6338_v55 }
  0x19   :  { %8894 = vst [vmem:[#allocation18_spill] sm:$0xff] %v6350_v63  ;;  %v6367_v39 = vand.u32 4294901760, %v6329_v27  ;;  %313 = vmatprep.subr.mxu1 %v312_v58  ;;  %152 = vmatpush1.msra.mxu0 %v6273_v19  ;;  %v324_v7 = vand.u32 4294901760, %v323_v62  ;;  %v8675_v53 = vand.u32 4294901760, %v6354_v28  ;;  %v6378_v34 = vsub.f32 %v6197_v46, %v6230_v60 }
  0x1a   :  { %v6381_v54 = vand.u32 4294901760, %v6343_v49  ;;  %319 = vmatpush1.msra.mxu1 %v318_v38  ;;  %154 = vmatprep.subr.mxu0 %v6285_v20  ;;  %v330_v58 = vand.u32 4294901760, %v329_v14  ;;  %v335_v62 = vsub.f32 %v6338_v55, %v8674_v43  ;;  %v6394_v46 = vsub.f32 %v6210_v51, %v6245_v1  ;;  %v6414_v51 = vld [vmem:[%s8646_s2 + $0x10] sm:$0xff] }
  0x1b   :  { %8895 = vst [vmem:[#allocation19_spill] sm:$0xff] %v6367_v39  ;;  %v6397_v29 = vand.u32 4294901760, %v6359_v44  ;;  %325 = vmatprep.subr.mxu1 %v324_v7  ;;  %156 = vmatpush1.msra.mxu0 %v6302_v57  ;;  %v341_v38 = vsub.f32 %v6354_v28, %v8675_v53  ;;  %v6406_v60 = vsub.f32 %v6220_v56, %v6259_v12  ;;  %v6409_v43 = vand.u32 4294901760, %v6372_v37  ;;  %v6428_v12 = vld [vmem:[%s8646_s2 + $0x8] sm:$0xff] }
  0x1c   :  { %8896 = vst [vmem:[#allocation20_spill] sm:$0xff] %v6381_v54  ;;  %331 = vmatpush1.msra.mxu1 %v330_v58  ;;  %158 = vmatprep.subr.mxu0 %v6324_v47  ;;  %v336_v7 = vand.u32 4294901760, %v335_v62  ;;  %v6420_v14 = vsub.f32 %v6235_v61, %v6273_v19  ;;  %v6423_v56 = vand.u32 4294901760, %v6386_v33  ;;  %v8901_v1 = vand.u32 4294901760, %v6378_v34 }
  0x1d   :  { %8897 = vst [vmem:[#allocation21_spill] sm:$0xff] %v6397_v29  ;;  %8898 = vst [vmem:[#allocation22_spill] sm:$0xff] %v6409_v43  ;;  %160 = vmatpush1.msra.mxu0 %v6350_v63  ;;  %v342_v58 = vand.u32 4294901760, %v341_v38  ;;  %v8692_v53 = vand.u32 4294901760, %v6406_v60  ;;  %v6437_v61 = vsub.f32 %v6250_v2, %v6285_v20  ;;  %v8903_v19 = vand.u32 4294901760, %v6394_v46  ;;  %v6454_v2 = vld [vmem:[%s8646_s2] sm:$0xff] }
  0x1e   :  { %8899 = vst [vmem:[#allocation23_spill] sm:$0xff] %v6420_v14  ;;  %8900 = vst [vmem:[#allocation24_spill] sm:$0xff] %v6423_v56  ;;  %v347_v62 = vsub.f32 %v6378_v34, %v8901_v1  ;;  %337 = vmatprep.subr.mxu1 %v336_v7  ;;  %162 = vmatprep.subr.mxu0 %v6367_v39  ;;  %v6445_v38 = vand.u32 4294901760, %v6414_v51  ;;  %v6449_v1 = vsub.f32 %v6264_v13, %v6302_v57  ;;  %vm99_vm1 = vcmask 179200   ;;  %v86_v13 = vld [vmem:[%s8646_s2 + $0x128] sm:$0x3f] }
  0x1f   :  { %8902 = vst [vmem:[#allocation25_spill] sm:$0xff] %v6437_v61  ;;  %v353_v50 = vsub.f32 %v6394_v46, %v8903_v19  ;;  %343 = vmatpush1.msra.mxu1 %v342_v58  ;;  %164 = vmatpush1.msra.mxu0 %v6381_v54  ;;  %v359_v19 = vsub.f32 %v6406_v60, %v8692_v53  ;;  %v6462_v20 = vand.u32 4294901760, %v6428_v12  ;;  %v8907_v58 = vand.u32 4294901760, %v6420_v14 }
  0x20   :  { %8904 = vst [vmem:[#allocation26_spill] sm:$0xff] %v6445_v38  ;;  %8905 = vst [vmem:[#allocation27_spill] sm:$0xff] %v6449_v1  ;;  %v348_v7 = vand.u32 4294901760, %v347_v62  ;;  %166 = vmatprep.subr.mxu0 %v6397_v29  ;;  %v8701_v36 = vand.u32 4294901760, %v6449_v1  ;;  %v6474_v53 = vsub.f32 %v6290_v52, %v6324_v47  ;;  %v8909_v32 = vand.u32 4294901760, %v6437_v61 }
  0x21   :  { %8906 = vst [vmem:[#allocation28_spill] sm:$0xff] %v6462_v20  ;;  %v354_v57 = vand.u32 4294901760, %v353_v50  ;;  %v365_v62 = vsub.f32 %v6420_v14, %v8907_v58  ;;  %v360_v41 = vand.u32 4294901760, %v359_v19  ;;  %168 = vmatpush1.msra.mxu0 %v6409_v43  ;;  %v6481_v30 = vand.u32 4294901760, %v6454_v2  ;;  %v85_v52 = vld [vmem:[%s8646_s2 + $0x120] sm:$0x3f] }
  0x22   :  { %8908 = vst [vmem:[#allocation29_spill] sm:$0xff] %v6474_v53  ;;  %349 = vmatprep.subr.mxu1 %v348_v7  ;;  %v371_v50 = vsub.f32 %v6437_v61, %v8909_v32  ;;  %v6485_v58 = vsub.f32 %v6316_v26, %v6350_v63  ;;  %170 = vmatprep.subr.mxu0 %v6423_v56  ;;  %v6496_v47 = vsel %vm106_vm0, %v86_v13, 0  ;;  %v6501_v26 = vld [vmem:[%s8646_s2 + $0x118] sm:$0xff]  ;;  %v6515_v13 = vld [vmem:[%s8646_s2 + $0x110] sm:$0xff]  ;;  %vm1169_vm2 = vcmask 1041408  }
  0x23   :  { %355 = vmatpush1.msra.mxu1 %v354_v57  ;;  %v366_v7 = vand.u32 4294901760, %v365_v62  ;;  %v377_v19 = vsub.f32 %v6449_v1, %v8701_v36  ;;  %172 = vmatpush1.msra.mxu0 %v6445_v38  ;;  %v6506_v62 = vand.u32 4294901760, %v6496_v47  ;;  %v6510_v36 = vsub.f32 %v6329_v27, %v6367_v39  ;;  %v6531_v39 = vld [vmem:[%s8646_s2 + $0x108] sm:$0xff] }
  0x24   :  { %8910 = vst [vmem:[#allocation30_spill] sm:$0xff] %v6485_v58  ;;  %361 = vmatprep.subr.mxu1 %v360_v41  ;;  %v372_v63 = vand.u32 4294901760, %v371_v50  ;;  %174 = vmatprep.subr.mxu0 %v6462_v20  ;;  %v8912_v41 = vand.u32 4294901760, %v6474_v53  ;;  %v6522_v57 = vsel %vm106_vm0, %v85_v52, 0  ;;  %v6526_v27 = vsub.f32 %v6343_v49, %v6381_v54  ;;  %v6547_v54 = vld [vmem:[%s8646_s2 + $0x100] sm:$0xff] }
  0x25   :  { %8911 = vst [vmem:[#allocation31_spill] sm:$0xff] %v6510_v36  ;;  %367 = vmatpush1.msra.mxu1 %v366_v7  ;;  %v378_v32 = vand.u32 4294901760, %v377_v19  ;;  %176 = vmatpush1.msra.mxu0 %v6481_v30  ;;  %v8914_v7 = vand.u32 4294901760, %v6485_v58  ;;  %v6539_v52 = vand.u32 4294901760, %v6522_v57  ;;  %v6542_v49 = vand.u32 4294901760, %v6501_v26 }
  0x26   :  { %v383_v50 = vsub.f32 %v6474_v53, %v8912_v41  ;;  %8913 = vst [vmem:[#allocation32_spill] sm:$0xff] %v6526_v27  ;;  %373 = vmatprep.subr.mxu1 %v372_v63  ;;  %204 = vmatprep.subr.mxu0 %v6506_v62  ;;  %v8718_v53 = vand.u32 4294901760, %v6526_v27  ;;  %v6556_v41 = vand.u32 4294901760, %v6515_v13  ;;  %v8917_v61 = vand.u32 4294901760, %v6510_v36 }
  0x27   :  { %v389_v19 = vsub.f32 %v6485_v58, %v8914_v7  ;;  %8915 = vst [vmem:[#allocation33_spill] sm:$0xff] %v6539_v52  ;;  %379 = vmatpush1.msra.mxu1 %v378_v32  ;;  %v6553_v7 = vsub.f32 %v6359_v44, %v6397_v29  ;;  %v46_v58 = vld [vmem:[%s8644_s0 + $0x8] sm:$0xff]  ;;  %206 = vmatpush2.msra.mxu0 %v6539_v52  ;;  %v6570_v44 = vand.u32 4294901760, %v6531_v39  ;;  %vm1162_vm3 = vcmask 867328  }
  0x28   :  { %v384_v63 = vand.u32 4294901760, %v383_v50  ;;  %v395_v32 = vsub.f32 %v6510_v36, %v8917_v61  ;;  %v6567_v50 = vsub.f32 %v6372_v37, %v6409_v43  ;;  %v401_v29 = vsub.f32 %v6526_v27, %v8718_v53  ;;  %208 = vmatprep.subr.mxu0 %v6542_v49  ;;  %v45_v37 = vld [vmem:[%s8644_s0] sm:$0xff] }
  0x29   :  { %8916 = vst [vmem:[#allocation34_spill] sm:$0xff] %v6553_v7  ;;  %v390_v1 = vand.u32 4294901760, %v389_v19  ;;  %v6579_v61 = vsub.f32 %v6386_v33, %v6423_v56  ;;  %v6582_v36 = vand.u32 4294901760, %v6547_v54  ;;  %210 = vmatpush2.msra.mxu0 %v6556_v41  ;;  %v6591_v19 = vsub.f32 %v6414_v51, %v6445_v38 }
  0x2a   :  { %8918 = vst [vmem:[#allocation35_spill] sm:$0xff] %v6567_v50  ;;  %385 = vmatprep.subr.mxu1 %v384_v63  ;;  %v396_v63 = vand.u32 4294901760, %v395_v32  ;;  %v8729_v53 = vand.u32 4294901760, %v6567_v50  ;;  %v101_v33 = vsel %vm99_vm1, %v46_v58, 0  ;;  %v402_v56 = vand.u32 4294901760, %v401_v29  ;;  %212 = vmatprep.subr.mxu0 %v6570_v44 }
  0x2b   :  { %391 = vmatpush1.msra.mxu1 %v390_v1  ;;  %8919 = vst [vmem:[#allocation36_spill] sm:$0xff] %v6591_v19  ;;  %v8920_v43 = vand.u32 4294901760, %v6553_v7  ;;  %v8732_v1 = vand.u32 4294901760, %v6579_v61  ;;  %v6599_v32 = vand.u32 4294901760, %v101_v33  ;;  %214 = vmatpush2.msra.mxu0 %v6582_v36  ;;  %v6608_v29 = vsub.f32 %v6428_v12, %v6462_v20 }
  0x2c   :  { %397 = vmatprep.subr.mxu1 %v396_v63  ;;  %v413_v14 = vsub.f32 %v6567_v50, %v8729_v53  ;;  %521 = vmatprep.subr.mxu0 %v6102_v18  ;;  %v6621_v53 = vsub.f32 %v6454_v2, %v6481_v30  ;;  %v8924_v12 = vand.u32 4294901760, %v6591_v19  ;;  %vm2135_vm10 = vcmask 130048  }
  0x2d   :  { %v407_v27 = vsub.f32 %v6553_v7, %v8920_v43  ;;  %8921 = vst [vmem:[#allocation37_spill] sm:$0xff] %v6599_v32  ;;  %v6610_v43 = vand.u32 4294901760, %v45_v37  ;;  %403 = vmatpush1.msra.mxu1 %v402_v56  ;;  %v419_v63 = vsub.f32 %v6579_v61, %v8732_v1  ;;  %v6616_v38 = vsub.f32 %v101_v33, %v6599_v32 }
  0x2e   :  { %8923 = vst [vmem:[#allocation39_spill] sm:$0xff] %v6621_v53  ;;  %v414_v51 = vand.u32 4294901760, %v413_v14  ;;  %v425_v20 = vsub.f32 %v6591_v19, %v8924_v12  ;;  %v8734_v56 = vand.u32 4294901760, %v6608_v29  ;;  %503 = vmatprep.mubr.f32.mxu1 %v6599_v32  ;;  %v8738_v18 = vand.u32 4294901760, %v6621_v53 }
  0x2f   :  { %8922 = vst [vmem:[#allocation38_spill] sm:$0xff] %v6610_v43  ;;  %v408_v58 = vand.u32 4294901760, %v407_v27  ;;  %v6628_v27 = vsub.f32 %v45_v37, %v6610_v43  ;;  %v420_v33 = vand.u32 4294901760, %v419_v63  ;;  %v8735_v1 = vand.u32 4294901760, %v6616_v38 }
  0x30   :  { %v6635_v14 = vsub.f32 %v6496_v47, %v6506_v62  ;;  %v426_v2 = vand.u32 4294901760, %v425_v20  ;;  %v431_v12 = vsub.f32 %v6608_v29, %v8734_v56  ;;  %v437_v47 = vsub.f32 %v6621_v53, %v8738_v18 }
  0x31   :  { %409 = vmatprep.subr.mxu1 %v408_v58  ;;  %v8741_v37 = vand.u32 4294901760, %v6628_v27  ;;  %v6643_v58 = vsub.f32 %v6522_v57, %v6539_v52  ;;  %v218_v63 = vsub.f32 %v6616_v38, %v8735_v1  ;;  %v6662_v1 = vsub.f32 %v6515_v13, %v6556_v41 }
  0x32   :  { %415 = vmatpush1.msra.mxu1 %v414_v51  ;;  %v8747_v20 = vand.u32 4294901760, %v6635_v14  ;;  %v6654_v51 = vsub.f32 %v6501_v26, %v6542_v49  ;;  %v432_v56 = vand.u32 4294901760, %v431_v12  ;;  %v438_v18 = vand.u32 4294901760, %v437_v47 }
  0x33   :  { %421 = vmatprep.subr.mxu1 %v420_v33  ;;  %v224_v57 = vsub.f32 %v6628_v27, %v8741_v37  ;;  %v8742_v33 = vand.u32 4294901760, %v6643_v58  ;;  %v219_v32 = vand.u32 4294901760, %v218_v63  ;;  %v8745_v37 = vand.u32 4294901760, %v6662_v1 }
  0x34   :  { %8925 = vst [vmem:[#allocation40_spill] sm:$0xff] %v6654_v51  ;;  %427 = vmatpush1.msra.mxu1 %v426_v2  ;;  %v469_v52 = vsub.f32 %v6635_v14, %v8747_v20  ;;  %v8746_v26 = vand.u32 4294901760, %v6654_v51  ;;  %v6674_v13 = vsub.f32 %v6531_v39, %v6570_v44  ;;  %v8934_v20 = vld [vmem:[#allocation9_spill] sm:$0xff]  ;;  %vm2124_vm11 = vcmask 326656  }
  0x35   :  { %433 = vmatprep.subr.mxu1 %v432_v56  ;;  %v225_v2 = vand.u32 4294901760, %v224_v57  ;;  %v475_v12 = vsub.f32 %v6643_v58, %v8742_v33  ;;  %220 = vmatprep.mubr.f32.mxu0 %v219_v32  ;;  %v6681_v56 = vsub.f32 %v6547_v54, %v6582_v36  ;;  %v487_v33 = vsub.f32 %v6662_v1, %v8745_v37  ;;  %v8932_v37 = vld [vmem:[#allocation8_spill] sm:$0xff] }
  0x36   :  { %439 = vmatpush1.msra.mxu1 %v438_v18  ;;  %v470_v63 = vand.u32 4294901760, %v469_v52  ;;  %v481_v47 = vsub.f32 %v6654_v51, %v8746_v26  ;;  %v8744_v39 = vand.u32 4294901760, %v6674_v13  ;;  %v8933_v26 = vld [vmem:[#allocation29_spill] sm:$0xff]  ;;  %vm2127_vm12 = vcmask 334848  }
  0x37   :  { %8926 = vst [vmem:[#allocation41_spill] sm:$0xff] %v6681_v56  ;;  %226 = vmatmul.mubr.f32.vlgmr.msra.gmra.mxu0 %v225_v2  ;;  %v476_v57 = vand.u32 4294901760, %v475_v12  ;;  %v8743_v52 = vand.u32 4294901760, %v6681_v56  ;;  %v488_v32 = vand.u32 4294901760, %v487_v33  ;;  %v48_v33 = vld [vmem:[%s8644_s0 + $0x18] sm:$0xff]  ;;  %vm2130_vm13 = vcmask 343040  }
  0x38   :  { %524 = vmatpush1.msra.mxu0 %v6124_v23  ;;  %471 = vmatprep.subr.mxu1 %v470_v63  ;;  %v482_v18 = vand.u32 4294901760, %v481_v47  ;;  %v493_v54 = vsub.f32 %v6674_v13, %v8744_v39  ;;  %v104_v47 = vsel %vm99_vm1, %v48_v33, 0  ;;  %v8929_v33 = vld [vmem:[#allocation25_spill] sm:$0xff]  ;;  %v8931_v39 = vld [vmem:[#allocation27_spill] sm:$0xff]  ;;  %vm3717_vm14 = vcmask 1040384  }
  0x39   :  { %527 = vmatprep.subr.mxu0 %v6130_v25  ;;  %477 = vmatpush2.msra.mxu1 %v476_v57  ;;  %v499_v2 = vsub.f32 %v6681_v56, %v8743_v52  ;;  %v47_v57 = vld [vmem:[%s8644_s0 + $0x10] sm:$0xff]  ;;  %vm3682_vm15 = vcmask 351232   ;;  %vm3685_vm0 = vcmask 703488  }
  0x3a   :  { %530 = vmatpush1.msra.mxu0 %v6153_v31  ;;  %483 = vmatprep.subr.mxu1 %v482_v18  ;;  %v494_v12 = vand.u32 4294901760, %v493_v54  ;;  %v6720_v18 = vand.u32 4294901760, %v104_v47  ;;  %v8930_v52 = vld [vmem:[#allocation7_spill] sm:$0xff] }
  0x3b   :  { %533 = vmatprep.subr.mxu0 %v6162_v35  ;;  %489 = vmatpush2.msra.mxu1 %v488_v32  ;;  %v500_v63 = vand.u32 4294901760, %v499_v2  ;;  %v6726_v32 = vand.u32 4294901760, %v47_v57  ;;  %v8927_v2 = vld [vmem:[#allocation23_spill] sm:$0xff] }
  0x3c   :  { %536 = vmatpush1.msra.mxu0 %v6178_v40  ;;  %495 = vmatprep.subr.mxu1 %v494_v12  ;;  %v6733_v54 = vsub.f32 %v104_v47, %v6720_v18 }
  0x3d   :  { %539 = vmatprep.subr.mxu0 %v6192_v45  ;;  %501 = vmatpush2.msra.mxu1 %v500_v63  ;;  %v6740_v12 = vsub.f32 %v47_v57, %v6726_v32  ;;  %v8928_v63 = vld [vmem:[#allocation6_spill] sm:$0xff] }
  0x3e   :  { %542 = vmatpush1.msra.mxu0 %v6227_v59  ;;  %505 = vmatmul.mubr.f32.vlgmr.msra.gmra.mxu1 %v6610_v43  ;;  %v8750_v47 = vand.u32 4294901760, %v6733_v54  ;;  %v8935_v43 = vld [vmem:[#allocation30_spill] sm:$0xff] }
  0x3f   :  { %545 = vmatprep.subr.mxu0 %v6242_v0  ;;  %681 = vmatprep.subr.mxu1 %v6064_v3  ;;  %v8753_v57 = vand.u32 4294901760, %v6740_v12 }
  0x40   :  { %548 = vmatpush1.msra.mxu0 %v6256_v8  ;;  %683 = vmatpush1.msra.mxu1 %v6066_v4 }
  0x41   :  { %551 = vmatprep.subr.mxu0 %v6270_v42  ;;  %685 = vmatprep.subr.mxu1 %v6068_v5 }
  0x42   :  { %554 = vmatpush1.msra.mxu0 %v6282_v48  ;;  %687 = vmatpush1.msra.mxu1 %v6079_v9 }
  0x43   :  { %557 = vmatprep.subr.mxu0 %v6299_v21  ;;  %689 = vmatprep.subr.mxu1 %v6081_v10 }
  0x44   :  { %560 = vmatpush1.msra.mxu0 %v6311_v6  ;;  %691 = vmatpush1.msra.mxu1 %v6083_v11 }
  0x45   :  { %563 = vmatprep.subr.mxu0 %v6338_v55  ;;  %693 = vmatprep.subr.mxu1 %v6095_v15 }
  0x46   :  { %566 = vmatpush1.msra.mxu0 %v6354_v28  ;;  %695 = vmatpush1.msra.mxu1 %v6097_v16 }
  0x47   :  { %569 = vmatprep.subr.mxu0 %v6378_v34  ;;  %697 = vmatprep.subr.mxu1 %v6099_v17 }
  0x48   :  { %572 = vmatpush1.msra.mxu0 %v6394_v46  ;;  %699 = vmatpush1.msra.mxu1 %v6121_v22 }
  0x49   :  { %575 = vmatprep.subr.mxu0 %v6406_v60  ;;  %701 = vmatprep.subr.mxu1 %v6127_v24 }
  0x4a   :  { %578 = vmatpush1.msra.mxu0 %v8927_v2  ;;  %703 = vmatpush1.msra.mxu1 %v8928_v63  ;;  %v8936_v2 = vld [vmem:[#allocation10_spill] sm:$0xff]  ;;  %v8937_v63 = vld [vmem:[#allocation31_spill] sm:$0xff] }
  0x4b   :  { %581 = vmatprep.subr.mxu0 %v8929_v33  ;;  %705 = vmatprep.subr.mxu1 %v8930_v52  ;;  %v8938_v33 = vld [vmem:[#allocation11_spill] sm:$0xff]  ;;  %v8939_v52 = vld [vmem:[#allocation32_spill] sm:$0xff] }
  0x4c   :  { %584 = vmatpush1.msra.mxu0 %v8931_v39  ;;  %707 = vmatpush1.msra.mxu1 %v8932_v37  ;;  %v234_v37 = vsub.f32 %v6733_v54, %v8750_v47  ;;  %v8940_v39 = vld [vmem:[#allocation12_spill] sm:$0xff] }
  0x4d   :  { %587 = vmatprep.subr.mxu0 %v8933_v26  ;;  %709 = vmatprep.subr.mxu1 %v8934_v20  ;;  %v8941_v20 = vld [vmem:[#allocation13_spill] sm:$0xff] }
  0x4e   :  { %590 = vmatpush1.msra.mxu0 %v8935_v43  ;;  %711 = vmatpush1.msra.mxu1 %v8936_v2  ;;  %v8942_v2 = vld [vmem:[#allocation14_spill] sm:$0xff]  ;;  %v235_v47 = vand.u32 4294901760, %v234_v37  ;;  %v8949_v37 = vld [vmem:[#allocation21_spill] sm:$0xff] }
  0x4f   :  { %593 = vmatprep.subr.mxu0 %v8937_v63  ;;  %713 = vmatprep.subr.mxu1 %v8938_v33  ;;  %v240_v63 = vsub.f32 %v6740_v12, %v8753_v57  ;;  %v8947_v57 = vld [vmem:[#allocation19_spill] sm:$0xff] }
  0x50   :  { %596 = vmatpush1.msra.mxu0 %v8939_v52  ;;  %715 = vmatpush1.msra.mxu1 %v8940_v39  ;;  %v8943_v52 = vld [vmem:[#allocation15_spill] sm:$0xff]  ;;  %v8944_v39 = vld [vmem:[#allocation16_spill] sm:$0xff] }
  0x51   :  { %599 = vmatprep.subr.mxu0 %v6553_v7  ;;  %717 = vmatprep.subr.mxu1 %v8941_v20  ;;  %v8945_v20 = vld [vmem:[#allocation17_spill] sm:$0xff]  ;;  %v8946_v7 = vld [vmem:[#allocation18_spill] sm:$0xff] }
  0x52   :  { %602 = vmatpush1.msra.mxu0 %v6567_v50  ;;  %719 = vmatpush1.msra.mxu1 %v8942_v2  ;;  %v241_v50 = vand.u32 4294901760, %v240_v63  ;;  %v8951_v63 = vld [vmem:[#allocation24_spill] sm:$0xff] }
  0x53   :  { %605 = vmatprep.subr.mxu0 %v6579_v61  ;;  %721 = vmatprep.subr.mxu1 %v8943_v52 }
  0x54   :  { %608 = vmatpush1.msra.mxu0 %v6591_v19  ;;  %723 = vmatpush1.msra.mxu1 %v8944_v39  ;;  %v8948_v19 = vld [vmem:[#allocation20_spill] sm:$0xff] }
  0x55   :  { %611 = vmatprep.subr.mxu0 %v6608_v29  ;;  %725 = vmatprep.subr.mxu1 %v8945_v20 }
  0x56   :  { %614 = vmatpush1.msra.mxu0 %v6621_v53  ;;  %727 = vmatpush1.msra.mxu1 %v8946_v7  ;;  %v8950_v53 = vld [vmem:[#allocation22_spill] sm:$0xff] }
  0x57   :  { %643 = vmatprep.subr.mxu0 %v6635_v14  ;;  %729 = vmatprep.subr.mxu1 %v8947_v57 }
  0x58   :  { %236 = vmatprep.mubr.f32.mxu0 %v235_v47  ;;  %646 = vmatpush2.msra.mxu0 %v6643_v58  ;;  %v8952_v47 = vld [vmem:[#allocation26_spill] sm:$0xff] }
  0x59   :  { %731 = vmatpush1.msra.mxu1 %v8948_v19  ;;  %242 = vmatmul.mubr.f32.gmra.mxu0 %v241_v50  ;;  %v8953_v50 = vld [vmem:[#allocation28_spill] sm:$0xff] }
  0x5a   :  { %649 = vmatprep.subr.mxu0 %v6654_v51  ;;  %733 = vmatprep.subr.mxu1 %v8949_v37  ;;  %v8954_v51 = vld [vmem:[#allocation5_spill] sm:$0xff] }
  0x5b   :  { %652 = vmatpush2.msra.mxu0 %v6662_v1  ;;  %735 = vmatpush1.msra.mxu1 %v8950_v53  ;;  %v8955_v37 = vand.u32 4294901760, %v8954_v51  ;;  %v8956_v53 = vand.u32 4294901760, %v6124_v23  ;;  %v8960_v23 = vand.u32 4294901760, %v6162_v35  ;;  %v8964_v35 = vand.u32 4294901760, %v6227_v59 }
  0x5c   :  { %655 = vmatprep.subr.mxu0 %v6674_v13  ;;  %737 = vmatprep.subr.mxu1 %v8951_v63  ;;  %v8965_v51 = vand.u32 4294901760, %v6628_v27  ;;  %v8969_v59 = vand.u32 4294901760, %v6733_v54 }
  0x5d   :  { %658 = vmatpush2.msra.mxu0 %v6681_v56  ;;  %661 = vmatprep.mubr.f32.mxu0 %v6616_v38  ;;  %v8957_v56 = vand.u32 4294901760, %v6130_v25  ;;  %v8961_v25 = vand.u32 4294901760, %v6178_v40  ;;  %v8967_v40 = vand.u32 4294901760, %v6256_v8  ;;  %v8976_v8 = vand.u32 4294901760, %v6378_v34 }
  0x5e   :  { %739 = vmatpush1.msra.mxu1 %v8952_v47  ;;  %664 = vmatmul.mubr.f32.vlgmr.msra.gmra.mxu0 %v6628_v27  ;;  %v8958_v47 = vand.u32 4294901760, %v6153_v31  ;;  %v8962_v31 = vand.u32 4294901760, %v6192_v45  ;;  %v8968_v45 = vand.u32 4294901760, %v6270_v42  ;;  %v8981_v42 = vld [vmem:[#allocation6_spill] sm:$0xff] }
  0x5f   :  { %741 = vmatprep.subr.mxu1 %v8953_v50  ;;  %810 = vmatprep.subr.mxu0 %v8955_v37  ;;  %v8959_v50 = vld [vmem:[#allocation33_spill] sm:$0xff]  ;;  %v8996_v37 = vld [vmem:[#allocation12_spill] sm:$0xff] }
  0x60   :  { %743 = vmatpush1.msra.mxu1 %v6481_v30  ;;  %814 = vmatpush1.msra.mxu0 %v8956_v53  ;;  %v8963_v53 = vand.u32 4294901760, %v6616_v38  ;;  %v8970_v38 = vand.u32 4294901760, %v6282_v48  ;;  %v8984_v48 = vld [vmem:[#allocation7_spill] sm:$0xff] }
  0x61   :  { %511 = vmatprep.mubr.f32.mxu1 %v6720_v18  ;;  %771 = vmatprep.subr.mxu1 %v6506_v62 }
  0x62   :  { %818 = vmatprep.subr.mxu0 %v8957_v56  ;;  %513 = vmatmul.mubr.f32.gmra.mxu1 %v6726_v32  ;;  %v8966_v56 = vand.u32 4294901760, %v6242_v0  ;;  %v8972_v0 = vand.u32 4294901760, %v6299_v21 }
  0x63   :  { %822 = vmatpush1.msra.mxu0 %v8958_v47  ;;  %773 = vmatpush2.msra.mxu1 %v8959_v50  ;;  %v8997_v47 = vld [vmem:[#allocation34_spill] sm:$0xff] }
  0x64   :  { %671 = vmatprep.mubr.f32.mxu0 %v6733_v54  ;;  %775 = vmatprep.subr.mxu1 %v6542_v49  ;;  %v8994_v54 = vld [vmem:[#allocation32_spill] sm:$0xff] }
  0x65   :  { %826 = vmatprep.subr.mxu0 %v8960_v23  ;;  %674 = vmatmul.mubr.f32.gmra.mxu0 %v6740_v12  ;;  %v8999_v23 = vld [vmem:[#allocation13_spill] sm:$0xff] }
  0x66   :  { %777 = vmatpush2.msra.mxu1 %v6556_v41  ;;  %830 = vmatpush1.msra.mxu0 %v8961_v25  ;;  %v9000_v25 = vld [vmem:[#allocation35_spill] sm:$0xff] }
  0x67   :  { %779 = vmatprep.subr.mxu1 %v6570_v44  ;;  %834 = vmatprep.subr.mxu0 %v8962_v31  ;;  %v9002_v31 = vand.u32 4294901760, %v6579_v61  ;;  %v9008_v61 = vand.u32 4294901760, %v6635_v14  ;;  %v9016_v14 = vld [vmem:[#allocation41_spill] sm:$0xff] }
  0x68   :  { %781 = vmatpush2.msra.mxu1 %v6582_v36  ;;  %785 = vmatprep.mubr.f32.mxu1 %v8963_v53 }
  0x69   :  { %838 = vmatpush1.msra.mxu0 %v8964_v35  ;;  %789 = vmatmul.mubr.f32.vlgmr.msra.gmra.mxu1 %v8965_v51  ;;  %v9005_v35 = vand.u32 4294901760, %v6608_v29  ;;  %v9006_v51 = vld [vmem:[#allocation39_spill] sm:$0xff] }
  0x6a   :  { %842 = vmatprep.subr.mxu0 %v8966_v56  ;;  %1003 = vmatprep.subr.mxu1 %v6064_v3  ;;  %v8971_v3 = vand.u32 4294901760, %v6740_v12  ;;  %v8995_v12 = vand.u32 4294901760, %v8994_v54  ;;  %v9007_v56 = vand.u32 4294901760, %v9006_v51 }
  0x6b   :  { %846 = vmatpush1.msra.mxu0 %v8967_v40  ;;  %1005 = vmatpush1.msra.mxu1 %v6066_v4  ;;  %v8973_v4 = vand.u32 4294901760, %v6311_v6  ;;  %v8987_v6 = vld [vmem:[#allocation8_spill] sm:$0xff]  ;;  %v9014_v40 = vld [vmem:[#allocation22_spill] sm:$0xff] }
  0x6c   :  { %850 = vmatprep.subr.mxu0 %v8968_v45  ;;  %1007 = vmatprep.subr.mxu1 %v6068_v5  ;;  %v8974_v5 = vand.u32 4294901760, %v6338_v55  ;;  %v9020_v45 = vld [vmem:[#allocation38_spill] sm:$0xff] }
  0x6d   :  { %797 = vmatprep.mubr.f32.mxu1 %v8969_v59  ;;  %854 = vmatpush1.msra.mxu0 %v8970_v38  ;;  %v9021_v59 = vld [vmem:[#allocation28_spill] sm:$0xff] }
  0x6e   :  { %1009 = vmatpush1.msra.mxu1 %v6079_v9  ;;  %858 = vmatprep.subr.mxu0 %v8972_v0  ;;  %v8975_v9 = vand.u32 4294901760, %v6354_v28  ;;  %v8991_v28 = vld [vmem:[#allocation10_spill] sm:$0xff] }
  0x6f   :  { %801 = vmatmul.mubr.f32.gmra.mxu1 %v8971_v3  ;;  %1011 = vmatprep.subr.mxu1 %v6081_v10  ;;  %v8977_v10 = vand.u32 4294901760, %v6394_v46  ;;  %v8992_v46 = vld [vmem:[#allocation31_spill] sm:$0xff] }
  0x70   :  { %862 = vmatpush1.msra.mxu0 %v8973_v4  ;;  %1013 = vmatpush1.msra.mxu1 %v6083_v11  ;;  %v8978_v11 = vand.u32 4294901760, %v6406_v60  ;;  %v8989_v60 = vld [vmem:[#allocation9_spill] sm:$0xff]  ;;  %v8993_v27 = vand.u32 4294901760, %v8992_v46  ;;  %v1136_v4 = vld [vmem:[%s8648_s4 + $0x58] sm:$0xff] }
  0x71   :  { %866 = vmatprep.subr.mxu0 %v8974_v5  ;;  %1015 = vmatprep.subr.mxu1 %v6095_v15  ;;  %v8979_v15 = vld [vmem:[#allocation23_spill] sm:$0xff] }
  0x72   :  { %870 = vmatpush1.msra.mxu0 %v8975_v9  ;;  %1017 = vmatpush1.msra.mxu1 %v6097_v16  ;;  %v8980_v55 = vand.u32 4294901760, %v8979_v15  ;;  %v8982_v16 = vld [vmem:[#allocation25_spill] sm:$0xff]  ;;  %v1135_v15 = vld [vmem:[%s8648_s4 + $0x50] sm:$0xff] }
  0x73   :  { %874 = vmatprep.subr.mxu0 %v8976_v8  ;;  %1019 = vmatprep.subr.mxu1 %v6099_v17  ;;  %v8983_v34 = vand.u32 4294901760, %v8982_v16  ;;  %v8985_v17 = vld [vmem:[#allocation27_spill] sm:$0xff] }
  0x74   :  { %878 = vmatpush1.msra.mxu0 %v8977_v10  ;;  %1021 = vmatpush1.msra.mxu1 %v6121_v22  ;;  %v8986_v21 = vand.u32 4294901760, %v8985_v17  ;;  %v8988_v22 = vand.u32 4294901760, %v8933_v26  ;;  %v8998_v26 = vand.u32 4294901760, %v8997_v47  ;;  %v1134_v17 = vld [vmem:[%s8648_s4 + $0x48] sm:$0xff]  ;;  %v1132_v47 = vld [vmem:[%s8648_s4 + $0x38] sm:$0xff] }
  0x75   :  { %882 = vmatprep.subr.mxu0 %v8978_v11  ;;  %1023 = vmatprep.subr.mxu1 %v6127_v24  ;;  %v8990_v24 = vand.u32 4294901760, %v8935_v43  ;;  %v9001_v43 = vand.u32 4294901760, %v9000_v25  ;;  %v6980_v11 = vand.u32 4294901760, %v1136_v4 }
  0x76   :  { %886 = vmatpush1.msra.mxu0 %v8980_v55  ;;  %1025 = vmatpush1.msra.mxu1 %v8981_v42 }
  0x77   :  { %890 = vmatprep.subr.mxu0 %v8983_v34  ;;  %1027 = vmatprep.subr.mxu1 %v8984_v48  ;;  %v6990_v34 = vand.u32 4294901760, %v1135_v15  ;;  %v6995_v48 = vsub.f32 %v1136_v4, %v6980_v11  ;;  %v1127_v4 = vld [vmem:[%s8648_s4 + $0x10] sm:$0xff] }
  0x78   :  { %894 = vmatpush1.msra.mxu0 %v8986_v21  ;;  %1029 = vmatpush1.msra.mxu1 %v8987_v6 }
  0x79   :  { %898 = vmatprep.subr.mxu0 %v8988_v22  ;;  %1031 = vmatprep.subr.mxu1 %v8989_v60  ;;  %v7005_v22 = vsub.f32 %v1135_v15, %v6990_v34  ;;  %v7007_v60 = vand.u32 4294901760, %v1134_v17 }
  0x7a   :  { %902 = vmatpush1.msra.mxu0 %v8990_v24  ;;  %1033 = vmatpush1.msra.mxu1 %v8991_v28  ;;  %v8775_v24 = vand.u32 4294901760, %v6995_v48  ;;  %v1133_v28 = vld [vmem:[%s8648_s4 + $0x40] sm:$0xff] }
  0x7b   :  { %906 = vmatprep.subr.mxu0 %v8993_v27  ;;  %1035 = vmatprep.subr.mxu1 %v8938_v33  ;;  %v9003_v33 = vld [vmem:[#allocation36_spill] sm:$0xff]  ;;  %v8773_v27 = vand.u32 4294901760, %v7005_v22  ;;  %v7018_v54 = vsub.f32 %v1134_v17, %v7007_v60  ;;  %v1126_v17 = vld [vmem:[%s8648_s4 + $0x8] sm:$0xff] }
  0x7c   :  { %910 = vmatpush1.msra.mxu0 %v8995_v12  ;;  %1037 = vmatpush1.msra.mxu1 %v8996_v37  ;;  %v9004_v53 = vand.u32 4294901760, %v9003_v33  ;;  %v7020_v12 = vand.u32 4294901760, %v1133_v28  ;;  %v1330_v37 = vsub.f32 %v6995_v48, %v8775_v24  ;;  %v1131_v33 = vld [vmem:[%s8648_s4 + $0x30] sm:$0xff] }
  0x7d   :  { %914 = vmatprep.subr.mxu0 %v8998_v26  ;;  %1039 = vmatprep.subr.mxu1 %v8999_v23  ;;  %v1337_v26 = vsub.f32 %v7005_v22, %v8773_v27  ;;  %v8772_v23 = vand.u32 4294901760, %v7018_v54 }
  0x7e   :  { %918 = vmatpush1.msra.mxu0 %v9001_v43  ;;  %1041 = vmatpush1.msra.mxu1 %v8942_v2  ;;  %v9012_v2 = vld [vmem:[#allocation21_spill] sm:$0xff]  ;;  %v7036_v25 = vsub.f32 %v1133_v28, %v7020_v12  ;;  %v7038_v43 = vand.u32 4294901760, %v1132_v47 }
  0x7f   :  { %922 = vmatprep.subr.mxu0 %v9002_v31  ;;  %1043 = vmatprep.subr.mxu1 %v8943_v52  ;;  %v9009_v52 = vand.u32 4294901760, %v6643_v58  ;;  %v9017_v58 = vand.u32 4294901760, %v9016_v14  ;;  %v1331_v31 = vand.u32 4294901760, %v1330_v37 }
  0x80   :  { %926 = vmatpush1.msra.mxu0 %v9004_v53  ;;  %1045 = vmatpush1.msra.mxu1 %v8944_v39  ;;  %v9010_v39 = vld [vmem:[#allocation40_spill] sm:$0xff]  ;;  %v1338_v53 = vand.u32 4294901760, %v1337_v26  ;;  %v8771_v51 = vand.u32 4294901760, %v7036_v25 }
  0x81   :  { %930 = vmatprep.subr.mxu0 %v9005_v35  ;;  %1047 = vmatprep.subr.mxu1 %v8945_v20  ;;  %v9011_v29 = vand.u32 4294901760, %v9010_v39  ;;  %v9013_v20 = vand.u32 4294901760, %v6662_v1  ;;  %v1344_v35 = vsub.f32 %v7018_v54, %v8772_v23  ;;  %v1153_v26 = vld [vmem:[%s8648_s4 + $0xe0] sm:$0xff] }
  0x82   :  { %934 = vmatpush1.msra.mxu0 %v9007_v56  ;;  %1049 = vmatpush1.msra.mxu1 %v8946_v7  ;;  %v9015_v7 = vand.u32 4294901760, %v6674_v13  ;;  %v7051_v56 = vsub.f32 %v1132_v47, %v7038_v43 }
  0x83   :  { %964 = vmatprep.subr.mxu0 %v9008_v61  ;;  %1051 = vmatprep.subr.mxu1 %v8947_v57  ;;  %v9018_v57 = vld [vmem:[#allocation37_spill] sm:$0xff]  ;;  %v7054_v61 = vand.u32 4294901760, %v1131_v33  ;;  %v1345_v39 = vand.u32 4294901760, %v1344_v35 }
  0x84   :  { %968 = vmatpush2.msra.mxu0 %v9009_v52  ;;  %1053 = vmatpush1.msra.mxu1 %v8948_v19  ;;  %v9019_v19 = vld [vmem:[#allocation26_spill] sm:$0xff] }
  0x85   :  { %972 = vmatprep.subr.mxu0 %v9011_v29  ;;  %1055 = vmatprep.subr.mxu1 %v9012_v2  ;;  %v1130_v52 = vld [vmem:[%s8648_s4 + $0x28] sm:$0xff]  ;;  %v1351_v29 = vsub.f32 %v7036_v25, %v8771_v51  ;;  %v8770_v2 = vand.u32 4294901760, %v7051_v56 }
  0x86   :  { %976 = vmatpush2.msra.mxu0 %v9013_v20  ;;  %1057 = vmatpush1.msra.mxu1 %v9014_v40  ;;  %v7065_v20 = vand.u32 4294901760, %v1130_v52  ;;  %v7069_v40 = vsub.f32 %v1131_v33, %v7054_v61  ;;  %v7141_v33 = vand.u32 4294901760, %v1126_v17 }
  0x87   :  { %980 = vmatprep.subr.mxu0 %v9015_v7  ;;  %1059 = vmatprep.subr.mxu1 %v8951_v63  ;;  %v1137_v63 = vld [vmem:[%s8648_s4 + $0x60] sm:$0xff]  ;;  %v1352_v14 = vand.u32 4294901760, %v1351_v29 }
  0x88   :  { %984 = vmatpush2.msra.mxu0 %v9017_v58  ;;  %986 = vmatprep.mubr.f32.mxu0 %v9018_v57  ;;  %v6965_v0 = vand.u32 4294901760, %v1137_v63  ;;  %v1129_v7 = vld [vmem:[%s8648_s4 + $0x20] sm:$0xff]  ;;  %v1358_v58 = vsub.f32 %v7051_v56, %v8770_v2 }
  0x89   :  { %1061 = vmatpush1.msra.mxu1 %v9019_v19  ;;  %988 = vmatmul.mubr.f32.vlgmr.msra.gmra.mxu0 %v9020_v45  ;;  %v7082_v19 = vand.u32 4294901760, %v1129_v7 }
  0x8a   :  { %1063 = vmatprep.subr.mxu1 %v9021_v59  ;;  %994 = vmatprep.mubr.f32.mxu0 %v6720_v18  ;;  %v6977_v10 = vsub.f32 %v1137_v63, %v6965_v0  ;;  %v1128_v59 = vld [vmem:[%s8648_s4 + $0x18] sm:$0xff] }
  0x8b   :  { %1065 = vmatpush1.msra.mxu1 %v6481_v30  ;;  %1105 = vmatprep.mubr.f32.mxu1 %v9018_v57  ;;  %v1140_v30 = vld [vmem:[%s8648_s4 + $0x78] sm:$0xff]  ;;  %v7080_v57 = vsub.f32 %v1130_v52, %v7065_v20  ;;  %v7095_v63 = vand.u32 4294901760, %v1128_v59  ;;  %v7146_v52 = vand.u32 4294901760, %v1153_v26 }
  0x8c   :  { %1093 = vmatprep.subr.mxu1 %v6506_v62  ;;  %v6934_v62 = vand.u32 4294901760, %v1140_v30  ;;  %v8776_v16 = vand.u32 4294901760, %v6977_v10 }
  0x8d   :  { %1095 = vmatpush2.msra.mxu1 %v8959_v50  ;;  %996 = vmatmul.mubr.f32.gmra.mxu0 %v6726_v32  ;;  %v7111_v15 = vsub.f32 %v1128_v59, %v7095_v63  ;;  %9024 = vst [vmem:[#allocation11_spill] sm:$0xff] %v7146_v52  ;;  %v7160_v59 = vsub.f32 %v1126_v17, %v7141_v33 }
  0x8e   :  { %1097 = vmatprep.subr.mxu1 %v6542_v49  ;;  %v6940_v49 = vsub.f32 %v1140_v30, %v6934_v62  ;;  %v1323_v6 = vsub.f32 %v6977_v10, %v8776_v16  ;;  %v1359_v30 = vand.u32 4294901760, %v1358_v58  ;;  %v1144_v16 = vld [vmem:[%s8648_s4 + $0x98] sm:$0xff] }
  0x8f   :  { %1099 = vmatpush2.msra.mxu1 %v6556_v41  ;;  %v1139_v41 = vld [vmem:[%s8648_s4 + $0x70] sm:$0xff]  ;;  %9022 = vst [vmem:[#allocation29_spill] sm:$0xff] %v7111_v15  ;;  %v8759_v37 = vand.u32 4294901760, %v7111_v15  ;;  %9026 = vst [vmem:[#allocation15_spill] sm:$0xff] %v7160_v59 }
  0x90   :  { %1101 = vmatprep.subr.mxu1 %v6570_v44  ;;  %v1138_v44 = vld [vmem:[%s8648_s4 + $0x68] sm:$0xff]  ;;  %v8781_v1 = vand.u32 4294901760, %v6940_v49  ;;  %v1324_v46 = vand.u32 4294901760, %v1323_v6 }
  0x91   :  { %1103 = vmatpush2.msra.mxu1 %v6582_v36  ;;  %v6942_v36 = vand.u32 4294901760, %v1139_v41  ;;  %v1154_v6 = vld [vmem:[%s8648_s4 + $0xe8] sm:$0x3] }
  0x92   :  { %1107 = vmatmul.mubr.f32.vlgmr.msra.gmra.mxu1 %v9020_v45  ;;  %v1302_v50 = vsub.f32 %v6940_v49, %v8781_v1  ;;  %v8764_v45 = vand.u32 4294901760, %v7069_v40  ;;  %v1171_v35 = vsel %vm1169_vm2, %v1154_v6, 0  ;;  %vm4462_vm2 = vcmask 1042432  }
  0x93   :  { %1113 = vmatprep.mubr.f32.mxu1 %v6720_v18  ;;  %v6949_v13 = vsub.f32 %v1139_v41, %v6942_v36  ;;  %v6951_v18 = vand.u32 4294901760, %v1138_v44  ;;  %v8762_v41 = vand.u32 4294901760, %v7080_v57  ;;  %v7157_v58 = vand.u32 4294901760, %v1171_v35 }
  0x94   :  { %v1303_v5 = vand.u32 4294901760, %v1302_v50  ;;  %v1365_v50 = vsub.f32 %v7069_v40, %v8764_v45 }
  0x95   :  { %v8779_v38 = vand.u32 4294901760, %v6949_v13  ;;  %v6963_v3 = vsub.f32 %v1138_v44, %v6951_v18  ;;  %v7093_v44 = vsub.f32 %v1129_v7, %v7082_v19  ;;  %v1386_v7 = vsub.f32 %v7111_v15, %v8759_v37  ;;  %9025 = vst [vmem:[#allocation14_spill] sm:$0xff] %v7157_v58 }
  0x96   :  { %1115 = vmatmul.mubr.f32.gmra.mxu1 %v6726_v32  ;;  %v8812_v32 = vmov 0.0  }
  0x97   :  { %1298 = vmatprep.subr.mxu1 %v8812_v32  ;;  %1173 = vmatprep.subr.mxu0 %v8812_v32  ;;  %v1309_v9 = vsub.f32 %v6949_v13, %v8779_v38  ;;  %v8778_v8 = vand.u32 4294901760, %v6963_v3  ;;  %v1143_v38 = vld [vmem:[%s8648_s4 + $0x90] sm:$0xff] }
  0x98   :  { %1175 = vmatpush1.msra.mxu0 %v6934_v62  ;;  %1304 = vmatpush1.msra.mxu1 %v1303_v5  ;;  %v1372_v5 = vsub.f32 %v7080_v57, %v8762_v41 }
  0x99   :  { %1176 = vmatprep.subr.mxu0 %v8812_v32  ;;  %v1310_v55 = vand.u32 4294901760, %v1309_v9  ;;  %v1316_v42 = vsub.f32 %v6963_v3, %v8778_v8  ;;  %1305 = vmatprep.subr.mxu1 %v8812_v32  ;;  %v8760_v9 = vand.u32 4294901760, %v7093_v44  ;;  %v7305_v8 = vand.u32 4294901760, %v1144_v16 }
  0x9a   :  { %1178 = vmatpush1.msra.mxu0 %v6942_v36  ;;  %v1373_v28 = vand.u32 4294901760, %v1372_v5  ;;  %v1150_v5 = vld [vmem:[%s8648_s4 + $0xc8] sm:$0xff] }
  0x9b   :  { %1179 = vmatprep.subr.mxu0 %v8812_v32  ;;  %1311 = vmatpush1.msra.mxu1 %v1310_v55  ;;  %v1317_v21 = vand.u32 4294901760, %v1316_v42  ;;  %v7113_v55 = vand.u32 4294901760, %v1127_v4  ;;  %v1366_v42 = vand.u32 4294901760, %v1365_v50  ;;  %v7167_v50 = vsub.f32 %v1153_v26, %v7146_v52  ;;  %9045 = vst [vmem:[#allocation12_spill] sm:$0xff] %v7305_v8 }
  0x9c   :  { %1181 = vmatpush1.msra.mxu0 %v6951_v18  ;;  %1312 = vmatprep.subr.mxu1 %v8812_v32  ;;  %v7197_v37 = vand.u32 4294901760, %v1150_v5  ;;  %v7320_v1 = vsub.f32 %v1144_v16, %v7305_v8 }
  0x9d   :  { %1182 = vmatprep.subr.mxu0 %v8812_v32  ;;  %1318 = vmatpush1.msra.mxu1 %v1317_v21  ;;  %v1125_v21 = vld [vmem:[%s8648_s4] sm:$0xff]  ;;  %v7132_v47 = vsub.f32 %v1127_v4, %v7113_v55  ;;  %9028 = vst [vmem:[#allocation17_spill] sm:$0xff] %v7167_v50  ;;  %v8768_v26 = vand.u32 4294901760, %v7167_v50 }
  0x9e   :  { %1184 = vmatpush1.msra.mxu0 %v6965_v0  ;;  %1319 = vmatprep.subr.mxu1 %v8812_v32  ;;  %9034 = vst [vmem:[#allocation33_spill] sm:$0xff] %v7197_v37  ;;  %9047 = vst [vmem:[#allocation13_spill] sm:$0xff] %v7320_v1 }
  0x9f   :  { %1185 = vmatprep.subr.mxu0 %v8812_v32  ;;  %1325 = vmatpush1.msra.mxu1 %v1324_v46  ;;  %v1379_v46 = vsub.f32 %v7093_v44, %v8760_v9  ;;  %9023 = vst [vmem:[#allocation30_spill] sm:$0xff] %v7132_v47 }
  0xa0   :  { %1187 = vmatpush1.msra.mxu0 %v6980_v11  ;;  %1326 = vmatprep.subr.mxu1 %v8812_v32 }
  0xa1   :  { %1188 = vmatprep.subr.mxu0 %v8812_v32  ;;  %1332 = vmatpush1.msra.mxu1 %v1331_v31  ;;  %v1152_v31 = vld [vmem:[%s8648_s4 + $0xd8] sm:$0xff]  ;;  %v1380_v29 = vand.u32 4294901760, %v1379_v46 }
  0xa2   :  { %1190 = vmatpush1.msra.mxu0 %v6990_v34  ;;  %1333 = vmatprep.subr.mxu1 %v8812_v32  ;;  %v7169_v4 = vand.u32 4294901760, %v1152_v31 }
  0xa3   :  { %1191 = vmatprep.subr.mxu0 %v8812_v32  ;;  %1339 = vmatpush1.msra.mxu1 %v1338_v53  ;;  %v7143_v53 = vand.u32 4294901760, %v1125_v21 }
  0xa4   :  { %1193 = vmatpush1.msra.mxu0 %v7007_v60  ;;  %1340 = vmatprep.subr.mxu1 %v8812_v32  ;;  %9029 = vst [vmem:[#allocation18_spill] sm:$0xff] %v7169_v4 }
  0xa5   :  { %1194 = vmatprep.subr.mxu0 %v8812_v32  ;;  %1346 = vmatpush1.msra.mxu1 %v1345_v39  ;;  %v1151_v39 = vld [vmem:[%s8648_s4 + $0xd0] sm:$0xff] }
  0xa6   :  { %1196 = vmatpush1.msra.mxu0 %v7020_v12  ;;  %1347 = vmatprep.subr.mxu1 %v8812_v32  ;;  %v7182_v6 = vand.u32 4294901760, %v1151_v39 }
  0xa7   :  { %1197 = vmatprep.subr.mxu0 %v8812_v32  ;;  %1353 = vmatpush1.msra.mxu1 %v1352_v14  ;;  %v8758_v14 = vand.u32 4294901760, %v7132_v47 }
  0xa8   :  { %1199 = vmatpush1.msra.mxu0 %v7038_v43  ;;  %1354 = vmatprep.subr.mxu1 %v8812_v32  ;;  %9031 = vst [vmem:[#allocation20_spill] sm:$0xff] %v7182_v6 }
  0xa9   :  { %1200 = vmatprep.subr.mxu0 %v8812_v32  ;;  %1360 = vmatpush1.msra.mxu1 %v1359_v30  ;;  %v7163_v30 = vsub.f32 %v1125_v21, %v7143_v53  ;;  %v1393_v17 = vsub.f32 %v7132_v47, %v8758_v14  ;;  %v7179_v21 = vsub.f32 %v1171_v35, %v7157_v58 }
  0xaa   :  { %1202 = vmatpush1.msra.mxu0 %v7054_v61  ;;  %1361 = vmatprep.subr.mxu1 %v8812_v32 }
  0xab   :  { %1203 = vmatprep.subr.mxu0 %v8812_v32  ;;  %1367 = vmatpush1.msra.mxu1 %v1366_v42  ;;  %9027 = vst [vmem:[#allocation16_spill] sm:$0xff] %v7163_v30  ;;  %v1387_v42 = vand.u32 4294901760, %v1386_v7  ;;  %9030 = vst [vmem:[#allocation19_spill] sm:$0xff] %v7179_v21  ;;  %v8763_v46 = vand.u32 4294901760, %v7163_v30  ;;  %v7189_v7 = vsub.f32 %v1152_v31, %v7169_v4  ;;  %v1394_v35 = vand.u32 4294901760, %v1393_v17 }
  0xac   :  { %1205 = vmatpush1.msra.mxu0 %v7065_v20  ;;  %1368 = vmatprep.subr.mxu1 %v8812_v32  ;;  %v8765_v14 = vand.u32 4294901760, %v7179_v21 }
  0xad   :  { %1206 = vmatprep.subr.mxu0 %v8812_v32  ;;  %1374 = vmatpush1.msra.mxu1 %v1373_v28  ;;  %v8761_v28 = vand.u32 4294901760, %v7160_v59  ;;  %9032 = vst [vmem:[#allocation24_spill] sm:$0xff] %v7189_v7  ;;  %v1407_v31 = vsub.f32 %v7163_v30, %v8763_v46  ;;  %v8766_v17 = vand.u32 4294901760, %v7189_v7  ;;  %v1425_v46 = vsub.f32 %v7167_v50, %v8768_v26 }
  0xae   :  { %1208 = vmatpush1.msra.mxu0 %v7082_v19  ;;  %1375 = vmatprep.subr.mxu1 %v8812_v32 }
  0xaf   :  { %1209 = vmatprep.subr.mxu0 %v8812_v32  ;;  %1381 = vmatpush1.msra.mxu1 %v1380_v29  ;;  %v7195_v29 = vsub.f32 %v1151_v39, %v7182_v6  ;;  %v1400_v9 = vsub.f32 %v7160_v59, %v8761_v28  ;;  %v1418_v39 = vsub.f32 %v7179_v21, %v8765_v14  ;;  %v1408_v41 = vand.u32 4294901760, %v1407_v31 }
  0xb0   :  { %1211 = vmatpush1.msra.mxu0 %v7095_v63  ;;  %1382 = vmatprep.subr.mxu1 %v8812_v32 }
  0xb1   :  { %1212 = vmatprep.subr.mxu0 %v8812_v32  ;;  %9033 = vst [vmem:[#allocation5_spill] sm:$0xff] %v7195_v29  ;;  %1388 = vmatpush1.msra.mxu1 %v1387_v42  ;;  %v7213_v42 = vsub.f32 %v1150_v5, %v7197_v37  ;;  %v1401_v28 = vand.u32 4294901760, %v1400_v9  ;;  %v8767_v45 = vand.u32 4294901760, %v7195_v29  ;;  %v1419_v14 = vand.u32 4294901760, %v1418_v39 }
  0xb2   :  { %1214 = vmatpush1.msra.mxu0 %v7113_v55  ;;  %1389 = vmatprep.subr.mxu1 %v8812_v32  ;;  %v1432_v5 = vsub.f32 %v7189_v7, %v8766_v17 }
  0xb3   :  { %1215 = vmatprep.subr.mxu0 %v8812_v32  ;;  %9035 = vst [vmem:[#allocation23_spill] sm:$0xff] %v7213_v42  ;;  %1395 = vmatpush1.msra.mxu1 %v1394_v35  ;;  %v8769_v9 = vand.u32 4294901760, %v7213_v42  ;;  %v1426_v35 = vand.u32 4294901760, %v1425_v46  ;;  %v1439_v31 = vsub.f32 %v7195_v29, %v8767_v45  ;;  %v1148_v46 = vld [vmem:[%s8648_s4 + $0xb8] sm:$0xff] }
  0xb4   :  { %1217 = vmatpush1.msra.mxu0 %v7141_v33  ;;  %1396 = vmatprep.subr.mxu1 %v8812_v32  ;;  %v1433_v17 = vand.u32 4294901760, %v1432_v5  ;;  %v7251_v26 = vand.u32 4294901760, %v1148_v46  ;;  %v1147_v5 = vld [vmem:[%s8648_s4 + $0xb0] sm:$0xff] }
  0xb5   :  { %1218 = vmatprep.subr.mxu0 %v8812_v32  ;;  %1402 = vmatpush1.msra.mxu1 %v1401_v28  ;;  %v1149_v28 = vld [vmem:[%s8648_s4 + $0xc0] sm:$0xff] }
  0xb6   :  { %1220 = vmatpush1.msra.mxu0 %v7143_v53  ;;  %1403 = vmatprep.subr.mxu1 %v8812_v32  ;;  %v7237_v39 = vand.u32 4294901760, %v1149_v28  ;;  %9038 = vst [vmem:[#allocation7_spill] sm:$0xff] %v7251_v26  ;;  %v7261_v2 = vsub.f32 %v1148_v46, %v7251_v26 }
  0xb7   :  { %1225 = vmatprep.subr.mxu0 %v8812_v32  ;;  %1409 = vmatpush1.msra.mxu1 %v1408_v41  ;;  %v1446_v41 = vsub.f32 %v7213_v42, %v8769_v9 }
  0xb8   :  { %1227 = vmatpush2.msra.mxu0 %v7157_v58  ;;  %1414 = vmatprep.subr.mxu1 %v8812_v32  ;;  %9036 = vst [vmem:[#allocation6_spill] sm:$0xff] %v7237_v39  ;;  %v7249_v45 = vsub.f32 %v1149_v28, %v7237_v39  ;;  %9039 = vst [vmem:[#allocation27_spill] sm:$0xff] %v7261_v2  ;;  %v7263_v28 = vand.u32 4294901760, %v1147_v5  ;;  %v8777_v46 = vand.u32 4294901760, %v7261_v2 }
  0xb9   :  { %1228 = vmatprep.subr.mxu0 %v8812_v32  ;;  %1420 = vmatpush2.msra.mxu1 %v1419_v14  ;;  %v1440_v14 = vand.u32 4294901760, %v1439_v31  ;;  %v1146_v31 = vld [vmem:[%s8648_s4 + $0xa8] sm:$0xff] }
  0xba   :  { %1230 = vmatpush2.msra.mxu0 %v7146_v52  ;;  %1421 = vmatprep.subr.mxu1 %v8812_v32  ;;  %9037 = vst [vmem:[#allocation25_spill] sm:$0xff] %v7249_v45  ;;  %v8774_v9 = vand.u32 4294901760, %v7249_v45  ;;  %9040 = vst [vmem:[#allocation8_spill] sm:$0xff] %v7263_v28  ;;  %v7276_v23 = vsub.f32 %v1147_v5, %v7263_v28  ;;  %v7278_v27 = vand.u32 4294901760, %v1146_v31 }
  0xbb   :  { %1231 = vmatprep.subr.mxu0 %v8812_v32  ;;  %1427 = vmatpush2.msra.mxu1 %v1426_v35  ;;  %v1447_v35 = vand.u32 4294901760, %v1446_v41 }
  0xbc   :  { %1233 = vmatpush2.msra.mxu0 %v7169_v4  ;;  %1428 = vmatprep.subr.mxu1 %v8812_v32  ;;  %v1453_v51 = vsub.f32 %v7249_v45, %v8774_v9  ;;  %9041 = vst [vmem:[#allocation9_spill] sm:$0xff] %v7276_v23  ;;  %9042 = vst [vmem:[#allocation10_spill] sm:$0xff] %v7278_v27  ;;  %v1460_v9 = vsub.f32 %v7261_v2, %v8777_v46  ;;  %v8780_v5 = vand.u32 4294901760, %v7276_v23  ;;  %v1141_v2 = vld [vmem:[%s8648_s4 + $0x80] sm:$0xff] }
  0xbd   :  { %1234 = vmatprep.subr.mxu0 %v8812_v32  ;;  %1434 = vmatpush2.msra.mxu1 %v1433_v17  ;;  %v1145_v17 = vld [vmem:[%s8648_s4 + $0xa0] sm:$0xff]  ;;  %v7291_v24 = vsub.f32 %v1146_v31, %v7278_v27 }
  0xbe   :  { %1236 = vmatpush2.msra.mxu0 %v7182_v6  ;;  %1435 = vmatprep.subr.mxu1 %v8812_v32  ;;  %v1454_v41 = vand.u32 4294901760, %v1453_v51  ;;  %v1461_v51 = vand.u32 4294901760, %v1460_v9  ;;  %v1467_v46 = vsub.f32 %v7276_v23, %v8780_v5  ;;  %v1142_v23 = vld [vmem:[%s8648_s4 + $0x88] sm:$0xff] }
  0xbf   :  { %1237 = vmatprep.subr.mxu0 %v8812_v32  ;;  %1441 = vmatpush2.msra.mxu1 %v1440_v14  ;;  %9043 = vst [vmem:[#allocation31_spill] sm:$0xff] %v7291_v24  ;;  %v7294_v14 = vand.u32 4294901760, %v1145_v17  ;;  %v8784_v31 = vand.u32 4294901760, %v7291_v24 }
  0xc0   :  { %1239 = vmatpush2.msra.mxu0 %v7197_v37  ;;  %1442 = vmatprep.subr.mxu1 %v8812_v32  ;;  %v1468_v9 = vand.u32 4294901760, %v1467_v46 }
  0xc1   :  { %1240 = vmatprep.subr.mxu0 %v8812_v32  ;;  %1448 = vmatpush2.msra.mxu1 %v1447_v35  ;;  %9044 = vst [vmem:[#allocation32_spill] sm:$0xff] %v7294_v14  ;;  %v7309_v35 = vsub.f32 %v1145_v17, %v7294_v14  ;;  %v1474_v5 = vsub.f32 %v7291_v24, %v8784_v31  ;;  %v8794_v31 = vand.u32 4294901760, %v7320_v1  ;;  %v7335_v24 = vand.u32 4294901760, %v1142_v23 }
  0xc2   :  { %1242 = vmatpush2.msra.mxu0 %v7237_v39  ;;  %1449 = vmatprep.subr.mxu1 %v8812_v32 }
  0xc3   :  { %1243 = vmatprep.subr.mxu0 %v8812_v32  ;;  %1455 = vmatpush2.msra.mxu1 %v1454_v41  ;;  %9046 = vst [vmem:[#allocation34_spill] sm:$0xff] %v7309_v35  ;;  %v7322_v41 = vand.u32 4294901760, %v1143_v38  ;;  %v8791_v17 = vand.u32 4294901760, %v7309_v35  ;;  %v1475_v46 = vand.u32 4294901760, %v1474_v5  ;;  %9050 = vst [vmem:[#allocation39_spill] sm:$0xff] %v7335_v24 }
  0xc4   :  { %1245 = vmatpush2.msra.mxu0 %v7251_v26  ;;  %1456 = vmatprep.subr.mxu1 %v8812_v32 }
  0xc5   :  { %1246 = vmatprep.subr.mxu0 %v8812_v32  ;;  %9048 = vst [vmem:[#allocation35_spill] sm:$0xff] %v7322_v41  ;;  %1462 = vmatpush2.msra.mxu1 %v1461_v51  ;;  %v7333_v16 = vsub.f32 %v1143_v38, %v7322_v41  ;;  %v1481_v51 = vsub.f32 %v7309_v35, %v8791_v17 }
  0xc6   :  { %1248 = vmatpush2.msra.mxu0 %v7263_v28  ;;  %1463 = vmatprep.subr.mxu1 %v8812_v32  ;;  %v1488_v38 = vsub.f32 %v7320_v1, %v8794_v31 }
  0xc7   :  { %1249 = vmatprep.subr.mxu0 %v8812_v32  ;;  %9049 = vst [vmem:[#allocation36_spill] sm:$0xff] %v7333_v16  ;;  %1469 = vmatpush2.msra.mxu1 %v1468_v9  ;;  %v8798_v5 = vand.u32 4294901760, %v7333_v16  ;;  %v7351_v9 = vsub.f32 %v1142_v23, %v7335_v24  ;;  %v1482_v17 = vand.u32 4294901760, %v1481_v51 }
  0xc8   :  { %1251 = vmatpush2.msra.mxu0 %v7278_v27  ;;  %1470 = vmatprep.subr.mxu1 %v8812_v32  ;;  %v1489_v35 = vand.u32 4294901760, %v1488_v38 }
  0xc9   :  { %1252 = vmatprep.subr.mxu0 %v8812_v32  ;;  %9051 = vst [vmem:[#allocation40_spill] sm:$0xff] %v7351_v9  ;;  %1476 = vmatpush2.msra.mxu1 %v1475_v46  ;;  %v1495_v31 = vsub.f32 %v7333_v16, %v8798_v5  ;;  %v8797_v1 = vand.u32 4294901760, %v7351_v9 }
  0xca   :  { %1254 = vmatpush2.msra.mxu0 %v7294_v14  ;;  %v7353_v14 = vand.u32 4294901760, %v1141_v2  ;;  %1477 = vmatprep.subr.mxu1 %v8812_v32 }
  0xcb   :  { %1255 = vmatprep.subr.mxu0 %v8812_v32  ;;  %1483 = vmatpush2.msra.mxu1 %v1482_v17  ;;  %v1496_v46 = vand.u32 4294901760, %v1495_v31  ;;  %v1502_v51 = vsub.f32 %v7351_v9, %v8797_v1  ;;  %v8830_v9 = vlaneseq }
  0xcc   :  { %9052 = vst [vmem:[#allocation21_spill] sm:$0xff] %v7353_v14  ;;  %1257 = vmatpush2.msra.mxu0 %v7305_v8  ;;  %v7363_v23 = vsub.f32 %v1141_v2, %v7353_v14  ;;  %1484 = vmatprep.subr.mxu1 %v8812_v32 }
  0xcd   :  { %1258 = vmatprep.subr.mxu0 %v8812_v32  ;;  %1490 = vmatpush2.msra.mxu1 %v1489_v35  ;;  %v1503_v2 = vand.u32 4294901760, %v1502_v51 }
  0xce   :  { %9053 = vst [vmem:[#allocation22_spill] sm:$0xff] %v7363_v23  ;;  %1260 = vmatpush2.msra.mxu0 %v7322_v41  ;;  %v8801_v38 = vand.u32 4294901760, %v7363_v23  ;;  %1491 = vmatprep.subr.mxu1 %v8812_v32 }
  0xcf   :  { %1261 = vmatprep.subr.mxu0 %v8812_v32  ;;  %1497 = vmatpush2.msra.mxu1 %v1496_v46  ;;  %v90_v46 = vshrl.u32 %v8830_v9, 7 }
  0xd0   :  { %1263 = vmatpush2.msra.mxu0 %v7335_v24  ;;  %v1509_v17 = vsub.f32 %v7363_v23, %v8801_v38  ;;  %1498 = vmatprep.subr.mxu1 %v8812_v32 }
  0xd1   :  { %1264 = vmatprep.subr.mxu0 %v8812_v32  ;;  %1504 = vmatpush2.msra.mxu1 %v1503_v2  ;;  %v91_v24 = vsub.s32 0, %v90_v46  ;;  %v87_v2 = vld [vmem:[%s8647_s3] sm:$0x3]  ;;  %v95_v41 = vsub.s32 1, %v90_v46 }
  0xd2   :  { %1266 = vmatpush2.msra.mxu0 %v7353_v14  ;;  %v1510_v31 = vand.u32 4294901760, %v1509_v17  ;;  %1505 = vmatprep.subr.mxu1 %v8812_v32 }
  0xd3   :  { %1527 = vmatprep.subr.mxu0 %v8812_v32  ;;  %v96_v27 = vrot.slane %v87_v2, %v95_v41 }
  0xd4   :  { %1511 = vmatpush2.msra.mxu1 %v1510_v31 }
  0xd5   :  { %1670 = vmatprep.subr.mxu1 %v8812_v32  ;;  %v92_v32 = vrot.slane %v87_v2, %v91_v24 }
  0xf7   :  { %v227_v35 = vpop.f32.mrf.mxu0 }
  0xf8   :  { %v228_v42 = vadd.f32 %v227_v35, %v92_v32 }
  0xf9   :  { %v229_v51 = vpop.f32.mrf.mxu0 }
  0xfa   :  { %v230_v26 = vadd.f32 %v229_v51, %v96_v27 }
  0xfe   :  { %v506_v5 = vpop.f32.mrf.mxu1 }
  0xff   :  { %v507_v39 = vadd.f32 %v506_v5, %v228_v42 }
 0x100   :  { %v508_v23 = vpop.f32.mrf.mxu1 }
 0x101   :  { %v509_v6 = vadd.f32 %v508_v23, %v230_v26 }
 0x119   :  { %v243_v1 = vpop.f32.mrf.mxu0 }
 0x11a   :  { %v244_v7 = vadd.f32 %v243_v1, %v92_v32 }
 0x11b   :  { %v245_v38 = vpop.f32.mrf.mxu0 }
 0x11c   :  { %v246_v50 = vadd.f32 %v245_v38, %v96_v27 }
 0x11e   :  { %v665_v16 = vpop.f32.mrf.mxu0 }
 0x11f   :  { %v666_v30 = vadd.f32 %v665_v16, %v507_v39 }
 0x120   :  { %v667_v17 = vpop.f32.mrf.mxu0 }
 0x121   :  { %v668_v59 = vadd.f32 %v667_v17, %v509_v6  ;;  %v9057_v17 = vmov 0.0  }
 0x122   :  { %v514_v14 = vpop.f32.mrf.mxu1 }
 0x123   :  { %v515_v4 = vadd.f32 %v514_v14, %v244_v7 }
 0x124   :  { %v516_v31 = vpop.f32.mrf.mxu1 }
 0x125   :  { %v675_v8 = vpop.f32.mrf.mxu0  ;;  %v517_v52 = vadd.f32 %v516_v31, %v246_v50 }
 0x126   :  { %v676_v58 = vadd.f32 %v675_v8, %v515_v4 }
 0x127   :  { %v677_v28 = vpop.f32.mrf.mxu0 }
 0x128   :  { %v678_v15 = vadd.f32 %v677_v28, %v517_v52 }
 0x129   :  { %v790_v45 = vpop.f32.mrf.mxu1 }
 0x12a   :  { %v791_v46 = vadd.f32 %v790_v45, %v666_v30 }
 0x12b   :  { %v792_v29 = vpop.f32.mrf.mxu1 }
 0x12c   :  { %v793_v41 = vadd.f32 %v792_v29, %v668_v59 }
 0x12f   :  { %v802_v37 = vpop.f32.mrf.mxu1 }
 0x130   :  { %v803_v51 = vadd.f32 %v802_v37, %v676_v58 }
 0x131   :  { %v804_v24 = vpop.f32.mrf.mxu1 }
 0x132   :  { %v805_v5 = vadd.f32 %v804_v24, %v678_v15 }
 0x149   :  { %v989_v9 = vpop.f32.mrf.mxu0 }
 0x14a   :  { %v990_v35 = vadd.f32 %v989_v9, %v791_v46 }
 0x14b   :  { %v991_v21 = vpop.f32.mrf.mxu0 }
 0x14c   :  { %v992_v1 = vadd.f32 %v991_v21, %v793_v41 }
 0x14d   :  { %v997_v47 = vpop.f32.mrf.mxu0 }
 0x14e   :  { %v998_v38 = vadd.f32 %v997_v47, %v803_v51 }
 0x14f   :  { %v999_v42 = vpop.f32.mrf.mxu0 }
 0x150   :  { %v1000_v50 = vadd.f32 %v999_v42, %v805_v5  ;;  %v9059_v5 = vld [vmem:[#allocation14_spill] sm:$0xff] }
 0x152   :  { %v1108_v2 = vpop.f32.mrf.mxu1 }
 0x153   :  { %v1109_v32 = vadd.f32 %v1108_v2, %v990_v35 }
 0x154   :  { %v1110_v27 = vpop.f32.mrf.mxu1 }
 0x155   :  { %v1121_v26 = vmax.f32 %v1109_v32, 0.0  ;;  %v1111_v39 = vadd.f32 %v1110_v27, %v992_v1  ;;  %v9058_v27 = vld [vmem:[#allocation29_spill] sm:$0xff] }
 0x156   :  { %v1116_v6 = vpop.f32.mrf.mxu1 }
 0x157   :  { %v7387_v45 = vand.u32 4294901760, %v1121_v26  ;;  %v1122_v30 = vmax.f32 %v1111_v39, 0.0  ;;  %v1117_v8 = vadd.f32 %v1116_v6, %v998_v38  ;;  %v9060_v38 = vld [vmem:[#allocation30_spill] sm:$0xff]  ;;  %v9062_v39 = vld [vmem:[#allocation15_spill] sm:$0xff] }
 0x158   :  { %v1118_v59 = vpop.f32.mrf.mxu1  ;;  %v9063_v6 = vld [vmem:[#allocation18_spill] sm:$0xff] }
 0x159   :  { %9054 = vst [vmem:[#allocation41_spill] sm:$0xff] %v7387_v45  ;;  %v7390_v4 = vsub.f32 %v1121_v26, %v7387_v45  ;;  %v1164_v37 = vsel %vm1162_vm3, %v1122_v30, 0  ;;  %v1123_v52 = vmax.f32 %v1117_v8, 0.0  ;;  %v1119_v58 = vadd.f32 %v1118_v59, %v1000_v50  ;;  %v9061_v26 = vld [vmem:[#allocation11_spill] sm:$0xff]  ;;  %v9064_v50 = vld [vmem:[#allocation16_spill] sm:$0xff]  ;;  %v9067_v59 = vld [vmem:[#allocation33_spill] sm:$0xff] }
 0x15a   :  { %v7393_v21 = vand.u32 4294901760, %v1164_v37  ;;  %v9065_v30 = vld [vmem:[#allocation20_spill] sm:$0xff]  ;;  %v9066_v8 = vld [vmem:[#allocation19_spill] sm:$0xff] }
 0x15b   :  { %v8857_v15 = vand.u32 4294901760, %v7390_v4  ;;  %v7396_v47 = vand.u32 4294901760, %v1123_v52  ;;  %v1124_v7 = vmax.f32 %v1119_v58, 0.0  ;;  %v9070_v58 = vld [vmem:[#allocation24_spill] sm:$0xff] }
 0x15c   :  { %v1268_v29 = vsub.f32 %v1164_v37, %v7393_v21  ;;  %1513 = vmatprep.mubr.f32.mxu1 %v7393_v21  ;;  %v9068_v37 = vld [vmem:[#allocation17_spill] sm:$0xff] }
 0x15d   :  { %9055 = vst [vmem:[#allocation37_spill] sm:$0xff] %v7396_v47  ;;  %v7401_v28 = vsub.f32 %v1123_v52, %v7396_v47  ;;  %v1167_v14 = vsel %vm1162_vm3, %v1124_v7, 0  ;;  %1515 = vmatmul.mubr.f32.vlgmr.msra.gmra.mxu1 %v7387_v45  ;;  %v1276_v23 = vsub.f32 %v7390_v4, %v8857_v15  ;;  %v9069_v52 = vld [vmem:[#allocation6_spill] sm:$0xff]  ;;  %v9071_v7 = vld [vmem:[#allocation7_spill] sm:$0xff]  ;;  %v9085_v15 = vld [vmem:[#allocation21_spill] sm:$0xff] }
 0x15e   :  { %v7405_v16 = vand.u32 4294901760, %v1167_v14  ;;  %1672 = vmatpush1.msra.mxu1 %v6934_v62  ;;  %v1269_v9 = vand.u32 4294901760, %v1268_v29 }
 0x15f   :  { %1673 = vmatprep.subr.mxu1 %v9057_v17  ;;  %v8855_v24 = vand.u32 4294901760, %v7401_v28  ;;  %v1277_v2 = vand.u32 4294901760, %v1276_v23  ;;  %v9075_v23 = vld [vmem:[#allocation10_spill] sm:$0xff] }
 0x160   :  { %9056 = vst [vmem:[#allocation26_spill] sm:$0xff] %v7405_v16  ;;  %v7413_v31 = vsub.f32 %v1167_v14, %v7405_v16  ;;  %1675 = vmatpush1.msra.mxu1 %v6942_v36  ;;  %1520 = vmatprep.mubr.f32.mxu1 %v7405_v16  ;;  %v1270_v46 = vsub.f32 %v1268_v29, %v1269_v9  ;;  %v9073_v14 = vld [vmem:[#allocation8_spill] sm:$0xff]  ;;  %v9087_v16 = vld [vmem:[#allocation13_spill] sm:$0xff] }
 0x161   :  { %1676 = vmatprep.subr.mxu1 %v9057_v17  ;;  %1522 = vmatmul.mubr.f32.gmra.mxu1 %v7396_v47  ;;  %v1291_v1 = vsub.f32 %v7401_v28, %v8855_v24  ;;  %v9083_v24 = vld [vmem:[#allocation39_spill] sm:$0xff]  ;;  %v9086_v47 = vand.u32 4294901760, %v7390_v4 }
 0x162   :  { %1678 = vmatpush1.msra.mxu1 %v6951_v18  ;;  %1767 = vmatprep.mubr.f32.mxu1 %v1269_v9  ;;  %v1271_v41 = vand.u32 4294901760, %v1270_v46  ;;  %v8856_v35 = vand.u32 4294901760, %v7413_v31  ;;  %v9074_v9 = vld [vmem:[#allocation23_spill] sm:$0xff]  ;;  %v9076_v46 = vld [vmem:[#allocation25_spill] sm:$0xff]  ;;  %v9088_v45 = vand.u32 4294901760, %v7413_v31 }
 0x163   :  { %1679 = vmatprep.subr.mxu1 %v9057_v17  ;;  %v1292_v42 = vand.u32 4294901760, %v1291_v1  ;;  %v9080_v1 = vld [vmem:[#allocation9_spill] sm:$0xff] }
 0x164   :  { %1681 = vmatpush1.msra.mxu1 %v6965_v0  ;;  %1272 = vmatprep.mubr.f32.mxu0 %v1271_v41  ;;  %v1285_v51 = vsub.f32 %v7413_v31, %v8856_v35  ;;  %v9077_v41 = vld [vmem:[#allocation32_spill] sm:$0xff]  ;;  %v9084_v35 = vld [vmem:[#allocation34_spill] sm:$0xff] }
 0x165   :  { %1682 = vmatprep.subr.mxu1 %v9057_v17  ;;  %1278 = vmatmul.mubr.f32.vlgmr.msra.gmra.mxu0 %v1277_v2  ;;  %v9078_v2 = vld [vmem:[#allocation27_spill] sm:$0xff] }
 0x166   :  { %1530 = vmatpush1.msra.mxu0 %v6940_v49  ;;  %1684 = vmatpush1.msra.mxu1 %v6980_v11  ;;  %v1286_v32 = vand.u32 4294901760, %v1285_v51  ;;  %v9079_v51 = vld [vmem:[#allocation12_spill] sm:$0xff] }
 0x167   :  { %1531 = vmatprep.subr.mxu0 %v9057_v17  ;;  %1685 = vmatprep.subr.mxu1 %v9057_v17 }
 0x168   :  { %1534 = vmatpush1.msra.mxu0 %v6949_v13  ;;  %1687 = vmatpush1.msra.mxu1 %v6990_v34 }
 0x169   :  { %1287 = vmatprep.mubr.f32.mxu0 %v1286_v32  ;;  %1535 = vmatprep.subr.mxu0 %v9057_v17  ;;  %v9081_v32 = vld [vmem:[#allocation35_spill] sm:$0xff] }
 0x16a   :  { %1688 = vmatprep.subr.mxu1 %v9057_v17  ;;  %1293 = vmatmul.mubr.f32.gmra.mxu0 %v1292_v42  ;;  %v9082_v42 = vld [vmem:[#allocation31_spill] sm:$0xff] }
 0x16b   :  { %1538 = vmatpush1.msra.mxu0 %v6963_v3  ;;  %1690 = vmatpush1.msra.mxu1 %v7007_v60 }
 0x16c   :  { %1539 = vmatprep.subr.mxu0 %v9057_v17  ;;  %1653 = vmatprep.mubr.f32.mxu0 %v1268_v29  ;;  %v9072_v29 = vld [vmem:[#allocation5_spill] sm:$0xff] }
 0x16d   :  { %1691 = vmatprep.subr.mxu1 %v9057_v17  ;;  %1542 = vmatpush1.msra.mxu0 %v6977_v10 }
 0x16e   :  { %1693 = vmatpush1.msra.mxu1 %v7020_v12  ;;  %1543 = vmatprep.subr.mxu0 %v9057_v17 }
 0x16f   :  { %1694 = vmatprep.subr.mxu1 %v9057_v17  ;;  %1546 = vmatpush1.msra.mxu0 %v6995_v48 }
 0x170   :  { %1696 = vmatpush1.msra.mxu1 %v7038_v43  ;;  %1547 = vmatprep.subr.mxu0 %v9057_v17 }
 0x171   :  { %1697 = vmatprep.subr.mxu1 %v9057_v17  ;;  %1550 = vmatpush1.msra.mxu0 %v7005_v22 }
 0x172   :  { %1699 = vmatpush1.msra.mxu1 %v7054_v61  ;;  %1551 = vmatprep.subr.mxu0 %v9057_v17 }
 0x173   :  { %1700 = vmatprep.subr.mxu1 %v9057_v17  ;;  %1554 = vmatpush1.msra.mxu0 %v7018_v54 }
 0x174   :  { %1702 = vmatpush1.msra.mxu1 %v7065_v20  ;;  %1555 = vmatprep.subr.mxu0 %v9057_v17 }
 0x175   :  { %1703 = vmatprep.subr.mxu1 %v9057_v17  ;;  %1558 = vmatpush1.msra.mxu0 %v7036_v25 }
 0x176   :  { %1705 = vmatpush1.msra.mxu1 %v7082_v19  ;;  %1559 = vmatprep.subr.mxu0 %v9057_v17 }
 0x177   :  { %1706 = vmatprep.subr.mxu1 %v9057_v17  ;;  %1562 = vmatpush1.msra.mxu0 %v7051_v56 }
 0x178   :  { %1708 = vmatpush1.msra.mxu1 %v7095_v63  ;;  %1563 = vmatprep.subr.mxu0 %v9057_v17 }
 0x179   :  { %1709 = vmatprep.subr.mxu1 %v9057_v17  ;;  %1566 = vmatpush1.msra.mxu0 %v7069_v40 }
 0x17a   :  { %1711 = vmatpush1.msra.mxu1 %v7113_v55  ;;  %1567 = vmatprep.subr.mxu0 %v9057_v17 }
 0x17b   :  { %1712 = vmatprep.subr.mxu1 %v9057_v17  ;;  %1570 = vmatpush1.msra.mxu0 %v7080_v57 }
 0x17c   :  { %1714 = vmatpush1.msra.mxu1 %v7141_v33  ;;  %1571 = vmatprep.subr.mxu0 %v9057_v17 }
 0x17d   :  { %1715 = vmatprep.subr.mxu1 %v9057_v17  ;;  %1574 = vmatpush1.msra.mxu0 %v7093_v44 }
 0x17e   :  { %1717 = vmatpush1.msra.mxu1 %v7143_v53  ;;  %1575 = vmatprep.subr.mxu0 %v9057_v17 }
 0x17f   :  { %1722 = vmatprep.subr.mxu1 %v9057_v17  ;;  %1578 = vmatpush1.msra.mxu0 %v9058_v27 }
 0x180   :  { %1724 = vmatpush2.msra.mxu1 %v9059_v5  ;;  %1579 = vmatprep.subr.mxu0 %v9057_v17 }
 0x181   :  { %1725 = vmatprep.subr.mxu1 %v9057_v17  ;;  %1582 = vmatpush1.msra.mxu0 %v9060_v38 }
 0x182   :  { %1727 = vmatpush2.msra.mxu1 %v9061_v26  ;;  %1583 = vmatprep.subr.mxu0 %v9057_v17 }
 0x183   :  { %1728 = vmatprep.subr.mxu1 %v9057_v17  ;;  %1586 = vmatpush1.msra.mxu0 %v9062_v39 }
 0x184   :  { %1730 = vmatpush2.msra.mxu1 %v9063_v6  ;;  %1587 = vmatprep.subr.mxu0 %v9057_v17 }
 0x185   :  { %1731 = vmatprep.subr.mxu1 %v9057_v17  ;;  %1590 = vmatpush1.msra.mxu0 %v9064_v50 }
 0x186   :  { %1733 = vmatpush2.msra.mxu1 %v9065_v30  ;;  %1595 = vmatprep.subr.mxu0 %v9057_v17 }
 0x187   :  { %1734 = vmatprep.subr.mxu1 %v9057_v17  ;;  %1598 = vmatpush2.msra.mxu0 %v9066_v8 }
 0x188   :  { %1736 = vmatpush2.msra.mxu1 %v9067_v59  ;;  %1599 = vmatprep.subr.mxu0 %v9057_v17 }
 0x189   :  { %1737 = vmatprep.subr.mxu1 %v9057_v17  ;;  %1602 = vmatpush2.msra.mxu0 %v9068_v37 }
 0x18a   :  { %1739 = vmatpush2.msra.mxu1 %v9069_v52  ;;  %1603 = vmatprep.subr.mxu0 %v9057_v17 }
 0x18b   :  { %1740 = vmatprep.subr.mxu1 %v9057_v17  ;;  %1606 = vmatpush2.msra.mxu0 %v9070_v58 }
 0x18c   :  { %1742 = vmatpush2.msra.mxu1 %v9071_v7  ;;  %1607 = vmatprep.subr.mxu0 %v9057_v17 }
 0x18d   :  { %1743 = vmatprep.subr.mxu1 %v9057_v17  ;;  %1610 = vmatpush2.msra.mxu0 %v9072_v29 }
 0x18e   :  { %1745 = vmatpush2.msra.mxu1 %v9073_v14  ;;  %1611 = vmatprep.subr.mxu0 %v9057_v17 }
 0x18f   :  { %1746 = vmatprep.subr.mxu1 %v9057_v17  ;;  %1614 = vmatpush2.msra.mxu0 %v9074_v9 }
 0x190   :  { %1748 = vmatpush2.msra.mxu1 %v9075_v23  ;;  %1615 = vmatprep.subr.mxu0 %v9057_v17 }
 0x191   :  { %1749 = vmatprep.subr.mxu1 %v9057_v17  ;;  %1618 = vmatpush2.msra.mxu0 %v9076_v46 }
 0x192   :  { %1751 = vmatpush2.msra.mxu1 %v9077_v41  ;;  %1619 = vmatprep.subr.mxu0 %v9057_v17 }
 0x193   :  { %1752 = vmatprep.subr.mxu1 %v9057_v17  ;;  %1622 = vmatpush2.msra.mxu0 %v9078_v2 }
 0x194   :  { %1754 = vmatpush2.msra.mxu1 %v9079_v51  ;;  %1623 = vmatprep.subr.mxu0 %v9057_v17 }
 0x195   :  { %1755 = vmatprep.subr.mxu1 %v9057_v17  ;;  %1626 = vmatpush2.msra.mxu0 %v9080_v1 }
 0x196   :  { %1757 = vmatpush2.msra.mxu1 %v9081_v32  ;;  %1627 = vmatprep.subr.mxu0 %v9057_v17 }
 0x197   :  { %1758 = vmatprep.subr.mxu1 %v9057_v17  ;;  %1630 = vmatpush2.msra.mxu0 %v9082_v42 }
 0x198   :  { %1760 = vmatpush2.msra.mxu1 %v9083_v24  ;;  %1631 = vmatprep.subr.mxu0 %v9057_v17 }
 0x199   :  { %1761 = vmatprep.subr.mxu1 %v9057_v17  ;;  %1634 = vmatpush2.msra.mxu0 %v9084_v35  ;;  %v9089_v35 = vld [vmem:[#allocation36_spill] sm:$0xff] }
 0x19a   :  { %1763 = vmatpush2.msra.mxu1 %v9085_v15  ;;  %1635 = vmatprep.subr.mxu0 %v9057_v17 }
 0x19b   :  { %1771 = vmatmul.mubr.f32.vlgmr.msra.gmra.mxu1 %v9086_v47  ;;  %1956 = vmatprep.subr.mxu1 %v9057_v17  ;;  %v9090_v47 = vand.u32 4294901760, %v7401_v28 }
 0x19c   :  { %1638 = vmatpush2.msra.mxu0 %v9087_v16  ;;  %1778 = vmatprep.mubr.f32.mxu1 %v9088_v45  ;;  %v9091_v16 = vld [vmem:[#allocation40_spill] sm:$0xff]  ;;  %v5952_v45 = vld [vmem:[%s8644_s0 + $0x10] sm:$0xff] }
 0x19d   :  { %1958 = vmatpush1.msra.mxu1 %v6934_v62  ;;  %1639 = vmatprep.subr.mxu0 %v9057_v17  ;;  %v9092_v62 = vld [vmem:[#allocation22_spill] sm:$0xff] }
 0x19e   :  { %1959 = vmatprep.subr.mxu1 %v9057_v17  ;;  %1642 = vmatpush2.msra.mxu0 %v9089_v35 }
 0x19f   :  { %1961 = vmatpush1.msra.mxu1 %v6942_v36  ;;  %1643 = vmatprep.subr.mxu0 %v9057_v17  ;;  %v9093_v36 = vand.u32 4294901760, %v6940_v49  ;;  %v9095_v49 = vand.u32 4294901760, %v6963_v3  ;;  %v9097_v3 = vand.u32 4294901760, %v6995_v48  ;;  %v9102_v48 = vand.u32 4294901760, %v7069_v40 }
 0x1a0   :  { %1782 = vmatmul.mubr.f32.gmra.mxu1 %v9090_v47  ;;  %1962 = vmatprep.subr.mxu1 %v9057_v17  ;;  %v9112_v40 = vand.u32 4294901760, %v9072_v29  ;;  %v9126_v29 = vld [vmem:[#allocation26_spill] sm:$0xff] }
 0x1a1   :  { %1646 = vmatpush2.msra.mxu0 %v9091_v16  ;;  %1964 = vmatpush1.msra.mxu1 %v6951_v18  ;;  %v9094_v18 = vand.u32 4294901760, %v6949_v13  ;;  %v9096_v13 = vand.u32 4294901760, %v6977_v10  ;;  %v9099_v10 = vand.u32 4294901760, %v7018_v54  ;;  %v9105_v54 = vand.u32 4294901760, %v9058_v27  ;;  %v5953_v27 = vld [vmem:[%s8644_s0] sm:$0xff] }
 0x1a2   :  { %2051 = vmatprep.mubr.f32.mxu1 %v7393_v21  ;;  %1647 = vmatprep.subr.mxu0 %v9057_v17 }
 0x1a3   :  { %1965 = vmatprep.subr.mxu1 %v9057_v17  ;;  %1650 = vmatpush2.msra.mxu0 %v9092_v62 }
 0x1a4   :  { %1967 = vmatpush1.msra.mxu1 %v6965_v0  ;;  %1656 = vmatmul.mubr.f32.vlgmr.msra.gmra.mxu0 %v7390_v4  ;;  %v9098_v0 = vand.u32 4294901760, %v7005_v22  ;;  %v9103_v22 = vand.u32 4294901760, %v7080_v57  ;;  %v9113_v57 = vlaneseq }
 0x1a5   :  { %1787 = vmatprep.subr.mxu0 %v9057_v17  ;;  %1968 = vmatprep.subr.mxu1 %v9057_v17 }
 0x1a6   :  { %1662 = vmatprep.mubr.f32.mxu0 %v7413_v31  ;;  %1791 = vmatpush1.msra.mxu0 %v9093_v36  ;;  %v9118_v31 = vand.u32 4294901760, %v9082_v42 }
 0x1a7   :  { %1970 = vmatpush1.msra.mxu1 %v6980_v11  ;;  %1792 = vmatprep.subr.mxu0 %v9057_v17  ;;  %v9100_v11 = vand.u32 4294901760, %v7036_v25  ;;  %v9107_v25 = vand.u32 4294901760, %v9062_v39 }
 0x1a8   :  { %1971 = vmatprep.subr.mxu1 %v9057_v17  ;;  %1796 = vmatpush1.msra.mxu0 %v9094_v18 }
 0x1a9   :  { %1973 = vmatpush1.msra.mxu1 %v6990_v34  ;;  %1665 = vmatmul.mubr.f32.gmra.mxu0 %v7401_v28  ;;  %v9101_v34 = vand.u32 4294901760, %v7051_v56  ;;  %v9109_v56 = vand.u32 4294901760, %v9066_v8 }
 0x1aa   :  { %1797 = vmatprep.subr.mxu0 %v9057_v17  ;;  %1974 = vmatprep.subr.mxu1 %v9057_v17 }
 0x1ab   :  { %1801 = vmatpush1.msra.mxu0 %v9095_v49  ;;  %1942 = vmatprep.mubr.f32.mxu0 %v7393_v21  ;;  %v5979_v21 = vmov -inf  }
 0x1ac   :  { %1976 = vmatpush1.msra.mxu1 %v7007_v60  ;;  %1802 = vmatprep.subr.mxu0 %v9057_v17  ;;  %v9104_v60 = vand.u32 4294901760, %v7093_v44  ;;  %v9114_v44 = vand.u32 4294901760, %v9074_v9  ;;  %v2080_v28 = vsel %vm99_vm1, 0.0, %v5979_v21  ;;  %v9127_v9 = vand.u32 4294901760, %v9089_v35 }
 0x1ad   :  { %1977 = vmatprep.subr.mxu1 %v9057_v17  ;;  %1806 = vmatpush1.msra.mxu0 %v9096_v13 }
 0x1ae   :  { %1979 = vmatpush1.msra.mxu1 %v7020_v12  ;;  %1807 = vmatprep.subr.mxu0 %v9057_v17  ;;  %v9106_v12 = vand.u32 4294901760, %v9060_v38  ;;  %v2134_v38 = vld [vmem:[%s8650_s6 + $0x8] sm:$0xff] }
 0x1af   :  { %1980 = vmatprep.subr.mxu1 %v9057_v17  ;;  %1811 = vmatpush1.msra.mxu0 %v9097_v3 }
 0x1b0   :  { %1982 = vmatpush1.msra.mxu1 %v7038_v43  ;;  %1812 = vmatprep.subr.mxu0 %v9057_v17  ;;  %v9108_v43 = vand.u32 4294901760, %v9064_v50 }
 0x1b1   :  { %1983 = vmatprep.subr.mxu1 %v9057_v17  ;;  %1816 = vmatpush1.msra.mxu0 %v9098_v0 }
 0x1b2   :  { %1985 = vmatpush1.msra.mxu1 %v7054_v61  ;;  %1817 = vmatprep.subr.mxu0 %v9057_v17  ;;  %v9110_v61 = vand.u32 4294901760, %v9068_v37  ;;  %v9124_v37 = vld [vmem:[#allocation13_spill] sm:$0xff] }
 0x1b3   :  { %1986 = vmatprep.subr.mxu1 %v9057_v17  ;;  %1821 = vmatpush1.msra.mxu0 %v9099_v10 }
 0x1b4   :  { %1988 = vmatpush1.msra.mxu1 %v7065_v20  ;;  %1822 = vmatprep.subr.mxu0 %v9057_v17  ;;  %v9111_v20 = vand.u32 4294901760, %v9070_v58 }
 0x1b5   :  { %1989 = vmatprep.subr.mxu1 %v9057_v17  ;;  %1826 = vmatpush1.msra.mxu0 %v9100_v11 }
 0x1b6   :  { %1991 = vmatpush1.msra.mxu1 %v7082_v19  ;;  %1827 = vmatprep.subr.mxu0 %v9057_v17  ;;  %v7662_v19 = vand.u32 127, %v9113_v57 }
 0x1b7   :  { %1992 = vmatprep.subr.mxu1 %v9057_v17  ;;  %1831 = vmatpush1.msra.mxu0 %v9101_v34 }
 0x1b8   :  { %1994 = vmatpush1.msra.mxu1 %v7095_v63  ;;  %1832 = vmatprep.subr.mxu0 %v9057_v17  ;;  %v9115_v63 = vand.u32 4294901760, %v9076_v46  ;;  %vm2072_vm4 = vcmp.lt.s32.totalorder %v7662_v19, 50  ;;  %vm2088_vm5 = vcmp.ge.s32.totalorder %v7662_v19, 50  ;;  %vm2090_vm6 = vcmp.lt.s32.totalorder %v7662_v19, 100 }
 0x1b9   :  { %1995 = vmatprep.subr.mxu1 %v9057_v17  ;;  %1836 = vmatpush1.msra.mxu0 %v9102_v48  ;;  %v2078_v4 = vsel %vm2072_vm4, %v5952_v45, 0.0  ;;  %vm7704_vm8 = vmand %vm2088_vm5, %vm2090_vm6  ;;  %vm2106_vm9 = vcmp.ge.s32.totalorder %v7662_v19, 100  ;;  %v2133_v48 = vld [vmem:[%s8650_s6] sm:$0xff]  ;;  %vm5983_vm5 = vmmov 0   ;;  %vm5035_vm6 = vcmp.eq.s32.totalorder %v7662_v19, 0 }
 0x1ba   :  { %1997 = vmatpush1.msra.mxu1 %v7113_v55  ;;  %1837 = vmatprep.subr.mxu0 %v9057_v17  ;;  %v2069_v55 = vadd.s32 128, %v7662_v19  ;;  %v2096_v8 = vsel %vm7704_vm8, %v5952_v45, 0.0  ;;  %v2114_v58 = vsel %vm2106_vm9, %v5952_v45, 0.0  ;;  %v5542_v19 = vld [vmem:[%s8656_s12] ss:$0 sm:$0xff] }
 0x1bb   :  { %1998 = vmatprep.subr.mxu1 %v9057_v17  ;;  %1841 = vmatpush1.msra.mxu0 %v9103_v22 }
 0x1bc   :  { %2000 = vmatpush1.msra.mxu1 %v7141_v33  ;;  %1842 = vmatprep.subr.mxu0 %v9057_v17  ;;  %v9116_v33 = vand.u32 4294901760, %v9078_v2  ;;  %vm2109_vm7 = vcmp.lt.s32.totalorder %v2069_v55, 150  ;;  %v9128_v2 = vld [vmem:[#allocation37_spill] sm:$0xff] }
 0x1bd   :  { %2001 = vmatprep.subr.mxu1 %v9057_v17  ;;  %1846 = vmatpush1.msra.mxu0 %v9104_v60  ;;  %v2137_v60 = vsel %vm2135_vm10, %v2133_v48, 0 }
 0x1be   :  { %2003 = vmatpush1.msra.mxu1 %v7143_v53  ;;  %1847 = vmatprep.subr.mxu0 %v9057_v17  ;;  %v9117_v53 = vand.u32 4294901760, %v9080_v1  ;;  %v2112_v1 = vsel %vm2106_vm9, %v5953_v27, 0.0 }
 0x1bf   :  { %2008 = vmatprep.subr.mxu1 %v9057_v17  ;;  %1851 = vmatpush1.msra.mxu0 %v9105_v54 }
 0x1c0   :  { %2010 = vmatpush2.msra.mxu1 %v9059_v5  ;;  %1852 = vmatprep.subr.mxu0 %v9057_v17  ;;  %v2076_v5 = vsel %vm2072_vm4, %v5953_v27, 0.0 }
 0x1c1   :  { %2011 = vmatprep.subr.mxu1 %v9057_v17  ;;  %1856 = vmatpush1.msra.mxu0 %v9106_v12  ;;  %v7758_v12 = vand.u32 4294901760, %v2137_v60 }
 0x1c2   :  { %2013 = vmatpush2.msra.mxu1 %v9061_v26  ;;  %1857 = vmatprep.subr.mxu0 %v9057_v17  ;;  %v5954_v26 = vld [vmem:[%s8644_s0 + $0x18] sm:$0xff] }
 0x1c3   :  { %2014 = vmatprep.subr.mxu1 %v9057_v17  ;;  %1861 = vmatpush1.msra.mxu0 %v9107_v25  ;;  %v2115_v39 = vsel %vm2109_vm7, %v5954_v26, 0.0  ;;  %v7761_v25 = vsub.f32 %v2137_v60, %v7758_v12 }
 0x1c4   :  { %2016 = vmatpush2.msra.mxu1 %v9063_v6  ;;  %1862 = vmatprep.subr.mxu0 %v9057_v17  ;;  %v9121_v6 = vld [vmem:[#allocation34_spill] sm:$0xff] }
 0x1c5   :  { %2017 = vmatprep.subr.mxu1 %v9057_v17  ;;  %1866 = vmatpush1.msra.mxu0 %v9108_v43  ;;  %v9122_v50 = vand.u32 4294901760, %v9121_v6  ;;  %v2211_v43 = vand.u32 4294901760, %v7761_v25  ;;  %v2140_v6 = vsel %vm2135_vm10, %v2134_v38, 0 }
 0x1c6   :  { %2019 = vmatpush2.msra.mxu1 %v9065_v30  ;;  %1871 = vmatprep.subr.mxu0 %v9057_v17  ;;  %v2085_v30 = vmax.f32 %v2078_v4, %v2080_v28 }
 0x1c7   :  { %2020 = vmatprep.subr.mxu1 %v9057_v17  ;;  %1875 = vmatpush2.msra.mxu0 %v9109_v56  ;;  %v2212_v56 = vsub.f32 %v7761_v25, %v2211_v43 }
 0x1c8   :  { %2022 = vmatpush2.msra.mxu1 %v9067_v59  ;;  %1876 = vmatprep.subr.mxu0 %v9057_v17  ;;  %v9123_v59 = vld [vmem:[#allocation41_spill] sm:$0xff] }
 0x1c9   :  { %2023 = vmatprep.subr.mxu1 %v9057_v17  ;;  %1880 = vmatpush2.msra.mxu0 %v9110_v61  ;;  %v2213_v61 = vand.u32 4294901760, %v2212_v56 }
 0x1ca   :  { %2025 = vmatpush2.msra.mxu1 %v9069_v52  ;;  %1881 = vmatprep.subr.mxu0 %v9057_v17  ;;  %v9125_v52 = vand.u32 4294901760, %v9124_v37 }
 0x1cb   :  { %2026 = vmatprep.subr.mxu1 %v9057_v17  ;;  %1885 = vmatpush2.msra.mxu0 %v9111_v20 }
 0x1cc   :  { %2028 = vmatpush2.msra.mxu1 %v9071_v7  ;;  %1886 = vmatprep.subr.mxu0 %v9057_v17  ;;  %v2120_v7 = vsel %vm99_vm1, %v2115_v39, -inf }
 0x1cd   :  { %2029 = vmatprep.subr.mxu1 %v9057_v17  ;;  %1890 = vmatpush2.msra.mxu0 %v9112_v40  ;;  %v2121_v46 = vmax.f32 %v2114_v58, %v2120_v7 }
 0x1ce   :  { %2031 = vmatpush2.msra.mxu1 %v9073_v14  ;;  %1891 = vmatprep.subr.mxu0 %v9057_v17 }
 0x1cf   :  { %2032 = vmatprep.subr.mxu1 %v9057_v17  ;;  %1895 = vmatpush2.msra.mxu0 %v9114_v44 }
 0x1d0   :  { %2034 = vmatpush2.msra.mxu1 %v9075_v23  ;;  %1896 = vmatprep.subr.mxu0 %v9057_v17  ;;  %v2103_v23 = vmax.f32 %v2096_v8, %v2080_v28 }
 0x1d1   :  { %2035 = vmatprep.subr.mxu1 %v9057_v17  ;;  %1900 = vmatpush2.msra.mxu0 %v9115_v63 }
 0x1d2   :  { %2037 = vmatpush2.msra.mxu1 %v9077_v41  ;;  %1901 = vmatprep.subr.mxu0 %v9057_v17  ;;  %v2094_v41 = vsel %vm7704_vm8, %v5953_v27, 0.0 }
 0x1d3   :  { %2038 = vmatprep.subr.mxu1 %v9057_v17  ;;  %1905 = vmatpush2.msra.mxu0 %v9116_v33  ;;  %v2099_v42 = vmax.f32 %v2094_v41, %v2080_v28 }
 0x1d4   :  { %2040 = vmatpush2.msra.mxu1 %v9079_v51  ;;  %1906 = vmatprep.subr.mxu0 %v9057_v17  ;;  %v9129_v51 = vand.u32 4294901760, %v9091_v16 }
 0x1d5   :  { %2041 = vmatprep.subr.mxu1 %v9057_v17  ;;  %1910 = vmatpush2.msra.mxu0 %v9117_v53 }
 0x1d6   :  { %2043 = vmatpush2.msra.mxu1 %v9081_v32  ;;  %1911 = vmatprep.subr.mxu0 %v9057_v17  ;;  %v9130_v32 = vand.u32 4294901760, %v9092_v62  ;;  %v5536_v62 = vld [vmem:[%s8649_s5] ss:$0 sm:$0xff] }
 0x1d7   :  { %2044 = vmatprep.subr.mxu1 %v9057_v17  ;;  %1915 = vmatpush2.msra.mxu0 %v9118_v31 }
 0x1d8   :  { %2046 = vmatpush2.msra.mxu1 %v9083_v24  ;;  %1916 = vmatprep.subr.mxu0 %v9057_v17  ;;  %v2081_v24 = vmax.f32 %v2076_v5, %v2080_v28 }
 0x1d9   :  { %2047 = vmatprep.subr.mxu1 %v9057_v17  ;;  %1920 = vmatpush2.msra.mxu0 %v9122_v50 }
 0x1da   :  { %2049 = vmatpush2.msra.mxu1 %v9085_v15  ;;  %1921 = vmatprep.subr.mxu0 %v9057_v17  ;;  %v5955_v15 = vld [vmem:[%s8644_s0 + $0x8] sm:$0xff]  ;;  %s5528_s0 = sshll.u32 %s5984_s18, 4  ;;  %s5529_s0 = int_to_ptr.vmem [resolvable:$true] %s5528_s0 }
 0x1db   :  { %2053 = vmatmul.mubr.f32.vlgmr.msra.gmra.mxu1 %v9123_v59  ;;  %1925 = vmatpush2.msra.mxu0 %v9125_v52  ;;  %v2113_v14 = vsel %vm2109_vm7, %v5955_v15, 0.0  ;;  %vm5509_vm7 = vcmask 66560   ;;  %s5956_s12 = scalar_lea.vmem %s5529_s0, 32  ;;  %p5961_p1 = scmp.lt.s32.totalorder %s5529_s0, %s5529_s0 }
 0x1dc   :  { %2058 = vmatprep.mubr.f32.mxu1 %v9126_v29  ;;  %1926 = vmatprep.subr.mxu0 %v9057_v17  ;;  %v2116_v35 = vsel %vm99_vm1, %v2113_v14, -inf  ;;  %vm3712_vm1 = vcmask 7168   ;;  %p5957_p0 = scmp.ne.s32.totalorder %s5529_s0, %s5956_s12  ;;  %p5962_p2 = scmp.lt.s32.totalorder %s5956_s12, %s5956_s12 }
 0x1dd   :  { %1930 = vmatpush2.msra.mxu0 %v9127_v9  ;;  %2086 = vmax.xlane.f32.xlu0 %v2085_v30  ;;  %v2117_v47 = vmax.f32 %v2112_v1, %v2116_v35 }
 0x1de   :  { %1931 = vmatprep.subr.mxu0 %v9057_v17  ;;  %2082 = vmax.xlane.f32.xlu1 %v2081_v24  ;;  %p5963_p3 = por %p5962_p2, %p5961_p1 }
 0x1df   :  { %2060 = vmatmul.mubr.f32.gmra.mxu1 %v9128_v2  ;;  %1935 = vmatpush2.msra.mxu0 %v9129_v51 }
 0x1e0   :  { %1936 = vmatprep.subr.mxu0 %v9057_v17  ;;  %5692 = vmatprep.mubr.f32.mxu1 %v7758_v12  ;;  %p5964_p4 = pnand %p5963_p3, %p5957_p0 }
 0x1e1   :  { %1940 = vmatpush2.msra.mxu0 %v9130_v32  ;;  %2104 = vmax.xlane.f32.xlu0 %v2103_v23 }
 0x1e2   :  { %1944 = vmatmul.mubr.f32.vlgmr.msra.gmra.mxu0 %v9123_v59  ;;  %2122 = vmax.xlane.f32.xlu1 %v2121_v46  ;;  %v7772_v59 = vand.u32 4294901760, %v2140_v6 }
 0x1e3   :  { %1949 = vmatprep.mubr.f32.mxu0 %v9126_v29 }
 0x1e4   :  { %v7775_v29 = vsub.f32 %v2140_v6, %v7772_v59 }
 0x1e5   :  { %2100 = vmax.xlane.f32.xlu0 %v2099_v42  ;;  %v5537_v42 = vld [vmem:[%s8650_s6 + $0x10] sm:$0xff] }
 0x1e6   :  { %1951 = vmatmul.mubr.f32.gmra.mxu0 %v9128_v2  ;;  %2118 = vmax.xlane.f32.xlu1 %v2117_v47  ;;  %v2221_v1 = vand.u32 4294901760, %v7775_v29 }
 0x1e7   :  { %5685 = vmatprep.mubr.f32.mxu0 %v2213_v61 }
 0x21d   :  { %v1516_v16 = vpop.f32.mrf.mxu1 }
 0x21f   :  { %v1518_v36 = vpop.f32.mrf.mxu1 }
 0x220   :  { %v5538_v36 = vld [vmem:[%s8650_s6 + $0x18] sm:$0xff] }
 0x221   :  { %v1523_v18 = vpop.f32.mrf.mxu1 }
 0x223   :  { %v1525_v49 = vpop.f32.mrf.mxu1 }
 0x225   :  { %v1279_v13 = vpop.f32.mrf.mxu0 }
 0x226   :  { %v1280_v3 = vadd.f32 %v5536_v62, %v1279_v13  ;;  %v2648_v13 = vsel %vm2135_vm10, %v5537_v42, 0 }
 0x227   :  { %v1281_v0 = vpop.f32.mrf.mxu0 }
 0x228   :  { %v1517_v10 = vadd.f32 %v1516_v16, %v1280_v3 }
 0x22a   :  { %v1294_v11 = vpop.f32.mrf.mxu0 }
 0x22b   :  { %v1295_v34 = vadd.f32 %v5536_v62, %v1294_v11  ;;  %v2222_v62 = vsub.f32 %v7775_v29, %v2221_v1  ;;  %v7800_v11 = vand.u32 4294901760, %v2648_v13 }
 0x22c   :  { %v1296_v22 = vpop.f32.mrf.mxu0 }
 0x22d   :  { %v1524_v54 = vadd.f32 %v1523_v18, %v1295_v34  ;;  %v2223_v22 = vand.u32 4294901760, %v2222_v62  ;;  %v7818_v56 = vsub.f32 %v2648_v13, %v7800_v11 }
 0x25b   :  { %v1772_v20 = vpop.f32.mrf.mxu1 }
 0x25d   :  { %v1774_v40 = vpop.f32.mrf.mxu1 }
 0x260   :  { %v1783_v57 = vpop.f32.mrf.mxu1 }
 0x262   :  { %v1785_v44 = vpop.f32.mrf.mxu1 }
 0x263   :  { %v2722_v44 = vand.u32 4294901760, %v7818_v56 }
 0x264   :  { %v1657_v63 = vpop.f32.mrf.mxu0 }
 0x265   :  { %v1658_v55 = vadd.f32 %v1657_v63, %v1517_v10  ;;  %v2651_v10 = vsel %vm2135_vm10, %v5538_v36, 0 }
 0x266   :  { %v1659_v33 = vpop.f32.mrf.mxu0  ;;  %v2087_v27 = vpop.xlane.xlu0 %2086  ;;  %v7810_v60 = vand.u32 4294901760, %v2651_v10 }
 0x267   :  { %v1773_v53 = vadd.f32 %v1772_v20, %v1658_v55  ;;  %v2083_v5 = vpop.xlane.xlu1 %2082  ;;  %v2723_v33 = vsub.f32 %v7818_v56, %v2722_v44 }
 0x268   :  { %v7828_v40 = vsub.f32 %v2651_v10, %v7810_v60 }
 0x269   :  { %v1666_v45 = vpop.f32.mrf.mxu0 }
 0x26a   :  { %v1667_v4 = vadd.f32 %v1666_v45, %v1524_v54  ;;  %v2105_v30 = vpop.xlane.xlu0 %2104  ;;  %v2732_v55 = vand.u32 4294901760, %v7828_v40 }
 0x26b   :  { %v1668_v21 = vpop.f32.mrf.mxu0  ;;  %v2123_v8 = vpop.xlane.xlu1 %2122 }
 0x26c   :  { %v1784_v28 = vadd.f32 %v1783_v57, %v1667_v4  ;;  %v2733_v45 = vsub.f32 %v7828_v40, %v2732_v55  ;;  %v5540_v4 = vld [vmem:[%s8650_s6 + $0x28] sm:$0xff] }
 0x26e   :  { %v2101_v9 = vpop.xlane.xlu0 %2100 }
 0x26f   :  { %v2119_v46 = vpop.xlane.xlu1 %2118 }
 0x29b   :  { %v2054_v31 = vpop.f32.mrf.mxu1 }
 0x29d   :  { %v2056_v26 = vpop.f32.mrf.mxu1 }
 0x29f   :  { %v2061_v39 = vpop.f32.mrf.mxu1 }
 0x2a1   :  { %v2063_v50 = vpop.f32.mrf.mxu1 }
 0x2a2   :  { %v1945_v24 = vpop.f32.mrf.mxu0 }
 0x2a3   :  { %v1946_v37 = vadd.f32 %v1945_v24, %v1773_v53  ;;  %v5539_v53 = vld [vmem:[%s8650_s6 + $0x20] sm:$0xff]  ;;  %v3703_v24 = vld [vmem:[%s8651_s7 + $0x78] sm:$0xff] }
 0x2a4   :  { %v1947_v52 = vpop.f32.mrf.mxu0  ;;  %v3159_v21 = vsel %vm2135_vm10, %v5539_v53, 0 }
 0x2a5   :  { %v2055_v58 = vadd.f32 %v2054_v31, %v1946_v37  ;;  %v3162_v31 = vsel %vm2135_vm10, %v5540_v4, 0  ;;  %v7971_v37 = vand.u32 4294901760, %v3703_v24 }
 0x2a6   :  { %v1952_v7 = vpop.f32.mrf.mxu0  ;;  %v7879_v38 = vand.u32 4294901760, %v3162_v31 }
 0x2a7   :  { %v2065_v15 = vmax.f32 %v2055_v58, 0.0  ;;  %v1953_v14 = vadd.f32 %v1952_v7, %v1784_v28  ;;  %v2724_v28 = vand.u32 4294901760, %v2723_v33  ;;  %v3700_v7 = vld [vmem:[%s8651_s7 + $0x60] sm:$0xff] }
 0x2a8   :  { %v1954_v23 = vpop.f32.mrf.mxu0 }
 0x2a9   :  { %v2062_v41 = vadd.f32 %v2061_v39, %v1953_v14  ;;  %v2125_v2 = vsel %vm2124_vm11, %v2065_v15, %v2083_v5  ;;  %v7873_v5 = vand.u32 4294901760, %v3159_v21  ;;  %v3698_v15 = vld [vmem:[%s8651_s7 + $0x50] sm:$0xff]  ;;  %v7986_v14 = vand.u32 4294901760, %v3700_v7 }
 0x2aa   :  { %v2128_v51 = vsel %vm2127_vm12, %v2125_v2, %v2101_v9  ;;  %v7990_v23 = vand.u32 4294901760, %v3698_v15  ;;  %v7999_v2 = vsub.f32 %v3703_v24, %v7971_v37 }
 0x2ab   :  { %v2066_v35 = vmax.f32 %v2062_v41, 0.0  ;;  %v2131_v32 = vsel %vm2130_vm13, %v2128_v51, %v2119_v46  ;;  %v3697_v46 = vld [vmem:[%s8651_s7 + $0x48] sm:$0xff]  ;;  %v3696_v41 = vld [vmem:[%s8651_s7 + $0x40] sm:$0xff] }
 0x2ac   :  { %v7783_v47 = vand.u32 4294901760, %v2131_v32 }
 0x2ad   :  { %v2126_v16 = vsel %vm2124_vm11, %v2066_v35, %v2087_v27  ;;  %v2734_v27 = vand.u32 4294901760, %v2733_v45  ;;  %v8008_v35 = vand.u32 4294901760, %v3697_v46 }
 0x2ae   :  { %v2129_v18 = vsel %vm2127_vm12, %v2126_v16, %v2105_v30  ;;  %v7790_v49 = vsub.f32 %v2131_v32, %v7783_v47  ;;  %v8011_v32 = vsub.f32 %v3700_v7, %v7986_v14  ;;  %v8880_v16 = vand.u32 4294901760, %v7999_v2 }
 0x2af   :  { %v2132_v3 = vsel %vm2130_vm13, %v2129_v18, %v2123_v8  ;;  %v3702_v8 = vld [vmem:[%s8651_s7 + $0x70] sm:$0xff]  ;;  %v8029_v13 = vsub.f32 %v3697_v46, %v8008_v35 }
 0x2b0   :  { %v7797_v0 = vand.u32 4294901760, %v2132_v3  ;;  %v7806_v48 = vand.u32 4294901760, %v7790_v49  ;;  %v7973_v52 = vand.u32 4294901760, %v3702_v8  ;;  %v8877_v62 = vand.u32 4294901760, %v8011_v32 }
 0x2b2   :  { %v7803_v34 = vsub.f32 %v2132_v3, %v7797_v0  ;;  %5681 = vmatprep.subr.mxu0 %v7797_v0  ;;  %v2268_v20 = vsub.f32 %v7790_v49, %v7806_v48  ;;  %v8002_v51 = vsub.f32 %v3702_v8, %v7973_v52  ;;  %v3837_v3 = vsub.f32 %v7999_v2, %v8880_v16 }
 0x2b3   :  { %5682 = vmatpush3.msra.mxu0 %v7797_v0 }
 0x2b4   :  { %v7813_v54 = vand.u32 4294901760, %v7803_v34  ;;  %5683 = vmatprep.subr.mxu0 %v7783_v47  ;;  %v7837_v63 = vand.u32 4294901760, %v2268_v20  ;;  %v8879_v36 = vand.u32 4294901760, %v8002_v51 }
 0x2b5   :  { %5684 = vmatpush3.msra.mxu0 %v7783_v47 }
 0x2b6   :  { %5695 = vmatprep.subr.mxu0 %v7803_v34  ;;  %5686 = vmatmul.mubr.f32.vlgmr.msra.gmra.mxu0 %v2223_v22  ;;  %v2261_v61 = vsub.f32 %v7803_v34, %v7813_v54  ;;  %v3838_v22 = vand.u32 4294901760, %v3837_v3 }
 0x2b7   :  { %5696 = vmatpush3.msra.mxu0 %v7803_v34  ;;  %5699 = vmatprep.mubr.f32.mxu0 %v7761_v25  ;;  %v7885_v25 = vsub.f32 %v3159_v21, %v7873_v5 }
 0x2b8   :  { %5697 = vmatprep.subr.mxu0 %v7790_v49  ;;  %v7831_v57 = vand.u32 4294901760, %v2261_v61 }
 0x2b9   :  { %5698 = vmatpush3.msra.mxu0 %v7790_v49  ;;  %v3233_v26 = vand.u32 4294901760, %v7885_v25 }
 0x2ba   :  { %5688 = vmatprep.subr.mxu1 %v7831_v57  ;;  %5709 = vmatprep.subr.mxu0 %v7813_v54 }
 0x2bb   :  { %5689 = vmatpush3.msra.mxu1 %v7831_v57  ;;  %5700 = vmatmul.mubr.f32.vlgmr.msra.gmra.mxu0 %v7775_v29  ;;  %v3234_v39 = vsub.f32 %v7885_v25, %v3233_v26  ;;  %v3699_v29 = vld [vmem:[%s8651_s7 + $0x58] sm:$0xff] }
 0x2bc   :  { %5710 = vmatpush3.msra.mxu0 %v7813_v54  ;;  %5690 = vmatprep.subr.mxu1 %v7837_v63  ;;  %v7988_v9 = vand.u32 4294901760, %v3699_v29 }
 0x2bd   :  { %5711 = vmatprep.subr.mxu0 %v7806_v48  ;;  %5691 = vmatpush3.msra.mxu1 %v7837_v63  ;;  %v3235_v50 = vand.u32 4294901760, %v3234_v39 }
 0x2be   :  { %5712 = vmatpush3.msra.mxu0 %v7806_v48  ;;  %5693 = vmatmul.mubr.f32.vlgmr.msra.gmra.mxu1 %v7772_v59  ;;  %v8014_v42 = vsub.f32 %v3699_v29, %v7988_v9 }
 0x2bf   :  { %5702 = vmatprep.subr.mxu1 %v7797_v0  ;;  %5713 = vmatprep.mubr.f32.mxu0 %v7758_v12 }
 0x2c0   :  { %5723 = vmatprep.subr.mxu0 %v7797_v0  ;;  %5703 = vmatpush3.msra.mxu1 %v7797_v0 }
 0x2c1   :  { %5714 = vmatmul.mubr.f32.vlgmr.msra.gmra.mxu0 %v7772_v59  ;;  %5704 = vmatprep.subr.mxu1 %v7783_v47 }
 0x2c2   :  { %5724 = vmatpush3.msra.mxu0 %v7797_v0  ;;  %5705 = vmatpush3.msra.mxu1 %v7783_v47 }
 0x2c3   :  { %5725 = vmatprep.subr.mxu0 %v7783_v47  ;;  %5706 = vmatprep.mubr.f32.mxu1 %v2211_v43  ;;  %v7892_v43 = vsub.f32 %v3162_v31, %v7879_v38 }
 0x2c4   :  { %5726 = vmatpush3.msra.mxu0 %v7783_v47  ;;  %5707 = vmatmul.mubr.f32.vlgmr.msra.gmra.mxu1 %v2221_v1 }
 0x2c5   :  { %5716 = vmatprep.subr.mxu1 %v7797_v0  ;;  %5727 = vmatprep.mubr.f32.mxu0 %v2724_v28 }
 0x2c6   :  { %5737 = vmatprep.subr.mxu0 %v7803_v34  ;;  %5717 = vmatpush3.msra.mxu1 %v7797_v0 }
 0x2c7   :  { %5728 = vmatmul.mubr.f32.vlgmr.msra.gmra.mxu0 %v2734_v27  ;;  %5718 = vmatprep.subr.mxu1 %v7783_v47 }
 0x2c8   :  { %5738 = vmatpush3.msra.mxu0 %v7803_v34  ;;  %5719 = vmatpush3.msra.mxu1 %v7783_v47 }
 0x2c9   :  { %5739 = vmatprep.subr.mxu0 %v7790_v49  ;;  %5720 = vmatprep.mubr.f32.mxu1 %v7758_v12  ;;  %v3243_v12 = vand.u32 4294901760, %v7892_v43 }
 0x2ca   :  { %5740 = vmatpush3.msra.mxu0 %v7790_v49  ;;  %5721 = vmatmul.mubr.f32.vlgmr.msra.gmra.mxu1 %v7772_v59  ;;  %v3701_v59 = vld [vmem:[%s8651_s7 + $0x68] sm:$0xff] }
 0x2cb   :  { %5730 = vmatprep.subr.mxu1 %v7831_v57  ;;  %5741 = vmatprep.mubr.f32.mxu0 %v7818_v56  ;;  %v3244_v6 = vsub.f32 %v7892_v43, %v3243_v12  ;;  %v7975_v58 = vand.u32 4294901760, %v3701_v59 }
 0x2cc   :  { %5751 = vmatprep.subr.mxu0 %v7813_v54  ;;  %5731 = vmatpush3.msra.mxu1 %v7831_v57 }
 0x2cd   :  { %5742 = vmatmul.mubr.f32.vlgmr.msra.gmra.mxu0 %v7828_v40  ;;  %5732 = vmatprep.subr.mxu1 %v7837_v63  ;;  %v3245_v30 = vand.u32 4294901760, %v3244_v6  ;;  %v8005_v1 = vsub.f32 %v3701_v59, %v7975_v58  ;;  %v8870_v40 = vand.u32 4294901760, %v8029_v13 }
 0x2ce   :  { %5752 = vmatpush3.msra.mxu0 %v7813_v54  ;;  %5733 = vmatpush3.msra.mxu1 %v7837_v63 }
 0x2cf   :  { %5753 = vmatprep.subr.mxu0 %v7806_v48  ;;  %5734 = vmatprep.mubr.f32.mxu1 %v7800_v11  ;;  %v8878_v18 = vand.u32 4294901760, %v8005_v1  ;;  %v3879_v45 = vsub.f32 %v8029_v13, %v8870_v40 }
 0x2d0   :  { %5754 = vmatpush3.msra.mxu0 %v7806_v48  ;;  %5735 = vmatmul.mubr.f32.vlgmr.msra.gmra.mxu1 %v7810_v60 }
 0x2d1   :  { %5744 = vmatprep.subr.mxu1 %v7797_v0  ;;  %5755 = vmatprep.mubr.f32.mxu0 %v7800_v11  ;;  %v3851_v10 = vsub.f32 %v8005_v1, %v8878_v18  ;;  %v3880_v31 = vand.u32 4294901760, %v3879_v45 }
 0x2d2   :  { %5765 = vmatprep.subr.mxu0 %v7797_v0  ;;  %5745 = vmatpush3.msra.mxu1 %v7797_v0 }
 0x2d3   :  { %5756 = vmatmul.mubr.f32.vlgmr.msra.gmra.mxu0 %v7810_v60  ;;  %5746 = vmatprep.subr.mxu1 %v7783_v47  ;;  %v3852_v61 = vand.u32 4294901760, %v3851_v10 }
 0x2d4   :  { %5766 = vmatpush3.msra.mxu0 %v7797_v0  ;;  %5747 = vmatpush3.msra.mxu1 %v7783_v47 }
 0x2d5   :  { %5767 = vmatprep.subr.mxu0 %v7783_v47  ;;  %5748 = vmatprep.mubr.f32.mxu1 %v2722_v44 }
 0x2d6   :  { %5768 = vmatpush3.msra.mxu0 %v7783_v47  ;;  %5749 = vmatmul.mubr.f32.vlgmr.msra.gmra.mxu1 %v2732_v55 }
 0x2d7   :  { %5758 = vmatprep.subr.mxu1 %v7797_v0  ;;  %5769 = vmatprep.mubr.f32.mxu0 %v3235_v50 }
 0x2d8   :  { %5779 = vmatprep.subr.mxu0 %v7803_v34  ;;  %5759 = vmatpush3.msra.mxu1 %v7797_v0 }
 0x2d9   :  { %5770 = vmatmul.mubr.f32.vlgmr.msra.gmra.mxu0 %v3245_v30  ;;  %5760 = vmatprep.subr.mxu1 %v7783_v47 }
 0x2da   :  { %5780 = vmatpush3.msra.mxu0 %v7803_v34  ;;  %5761 = vmatpush3.msra.mxu1 %v7783_v47 }
 0x2db   :  { %5781 = vmatprep.subr.mxu0 %v7790_v49  ;;  %5762 = vmatprep.mubr.f32.mxu1 %v7800_v11  ;;  %v8875_v11 = vand.u32 4294901760, %v8014_v42 }
 0x2dc   :  { %5782 = vmatpush3.msra.mxu0 %v7790_v49  ;;  %5763 = vmatmul.mubr.f32.vlgmr.msra.gmra.mxu1 %v7810_v60  ;;  %v8024_v49 = vand.u32 4294901760, %v3696_v41 }
 0x2dd   :  { %5772 = vmatprep.subr.mxu1 %v7831_v57  ;;  %5783 = vmatprep.mubr.f32.mxu0 %v7885_v25  ;;  %v3865_v20 = vsub.f32 %v8014_v42, %v8875_v11 }
 0x2de   :  { %5793 = vmatprep.subr.mxu0 %v7813_v54  ;;  %5773 = vmatpush3.msra.mxu1 %v7831_v57  ;;  %v8052_v56 = vsub.f32 %v3696_v41, %v8024_v49 }
 0x2df   :  { %5784 = vmatmul.mubr.f32.vlgmr.msra.gmra.mxu0 %v7892_v43  ;;  %5774 = vmatprep.subr.mxu1 %v7837_v63  ;;  %v3866_v53 = vand.u32 4294901760, %v3865_v20 }
 0x2e0   :  { %5794 = vmatpush3.msra.mxu0 %v7813_v54  ;;  %5775 = vmatpush3.msra.mxu1 %v7837_v63  ;;  %v3858_v54 = vsub.f32 %v8011_v32, %v8877_v62  ;;  %v8869_v55 = vand.u32 4294901760, %v8052_v56 }
 0x2e1   :  { %5795 = vmatprep.subr.mxu0 %v7806_v48  ;;  %5776 = vmatprep.mubr.f32.mxu1 %v7873_v5 }
 0x2e2   :  { %5796 = vmatpush3.msra.mxu0 %v7806_v48  ;;  %5777 = vmatmul.mubr.f32.vlgmr.msra.gmra.mxu1 %v7879_v38  ;;  %v3695_v48 = vld [vmem:[%s8651_s7 + $0x38] sm:$0xff]  ;;  %v3859_v44 = vand.u32 4294901760, %v3858_v54  ;;  %v3886_v28 = vsub.f32 %v8052_v56, %v8869_v55 }
 0x2e3   :  { %5786 = vmatprep.subr.mxu1 %v7797_v0  ;;  %5790 = vmatprep.mubr.f32.mxu1 %v3233_v26  ;;  %v8060_v57 = vand.u32 4294901760, %v3695_v48 }
 0x2e4   :  { %5787 = vmatpush3.msra.mxu1 %v7797_v0  ;;  %5797 = vmatprep.mubr.f32.mxu0 %v7873_v5 }
 0x2e5   :  { %5788 = vmatprep.subr.mxu1 %v7783_v47  ;;  %5798 = vmatmul.mubr.f32.vlgmr.msra.gmra.mxu0 %v7879_v38  ;;  %v8069_v33 = vsub.f32 %v3695_v48, %v8060_v57 }
 0x2e6   :  { %5789 = vmatpush3.msra.mxu1 %v7783_v47  ;;  %3721 = vmatprep.subr.mxu0 %v9057_v17 }
 0x2e7   :  { %5791 = vmatmul.mubr.f32.vlgmr.msra.gmra.mxu1 %v3243_v12  ;;  %5800 = vmatprep.subr.mxu1 %v7797_v0  ;;  %v8867_v4 = vand.u32 4294901760, %v8069_v33 }
 0x2e8   :  { %5801 = vmatpush3.msra.mxu1 %v7797_v0  ;;  %5804 = vmatprep.mubr.f32.mxu1 %v7873_v5  ;;  %v3844_v0 = vsub.f32 %v8002_v51, %v8879_v36  ;;  %v3887_v5 = vand.u32 4294901760, %v3886_v28 }
 0x2e9   :  { %5802 = vmatprep.subr.mxu1 %v7783_v47  ;;  %3723 = vmatpush1.msra.mxu0 %v7971_v37  ;;  %v3893_v27 = vsub.f32 %v8069_v33, %v8867_v4 }
 0x2ea   :  { %5803 = vmatpush3.msra.mxu1 %v7783_v47  ;;  %3724 = vmatprep.subr.mxu0 %v9057_v17  ;;  %v8018_v47 = vsub.f32 %v3698_v15, %v7990_v23  ;;  %v3845_v60 = vand.u32 4294901760, %v3844_v0 }
 0x2eb   :  { %5805 = vmatmul.mubr.f32.vlgmr.msra.gmra.mxu1 %v7879_v38  ;;  %3833 = vmatprep.subr.mxu1 %v9057_v17  ;;  %v3894_v38 = vand.u32 4294901760, %v3893_v27  ;;  %v3692_v27 = vld [vmem:[%s8651_s7 + $0x20] sm:$0xff] }
 0x2ec   :  { %3726 = vmatpush1.msra.mxu0 %v7973_v52  ;;  %v8874_v34 = vand.u32 4294901760, %v8018_v47  ;;  %3839 = vmatpush1.msra.mxu1 %v3838_v22 }
 0x2ed   :  { %3727 = vmatprep.subr.mxu0 %v9057_v17  ;;  %3840 = vmatprep.subr.mxu1 %v9057_v17 }
 0x2ee   :  { %3729 = vmatpush1.msra.mxu0 %v7975_v58  ;;  %3846 = vmatpush1.msra.mxu1 %v3845_v60  ;;  %v3872_v63 = vsub.f32 %v8018_v47, %v8874_v34 }
 0x2ef   :  { %3730 = vmatprep.subr.mxu0 %v9057_v17  ;;  %3847 = vmatprep.subr.mxu1 %v9057_v17 }
 0x2f0   :  { %3732 = vmatpush1.msra.mxu0 %v7986_v14  ;;  %3853 = vmatpush1.msra.mxu1 %v3852_v61  ;;  %v3873_v21 = vand.u32 4294901760, %v3872_v63  ;;  %v3694_v61 = vld [vmem:[%s8651_s7 + $0x30] sm:$0xff] }
 0x2f1   :  { %3733 = vmatprep.subr.mxu0 %v9057_v17  ;;  %3854 = vmatprep.subr.mxu1 %v9057_v17  ;;  %v8108_v63 = vand.u32 4294901760, %v3694_v61 }
 0x2f2   :  { %3735 = vmatpush1.msra.mxu0 %v7988_v9  ;;  %3860 = vmatpush1.msra.mxu1 %v3859_v44 }
 0x2f3   :  { %3736 = vmatprep.subr.mxu0 %v9057_v17  ;;  %3861 = vmatprep.subr.mxu1 %v9057_v17 }
 0x2f4   :  { %3738 = vmatpush1.msra.mxu0 %v7990_v23  ;;  %3867 = vmatpush1.msra.mxu1 %v3866_v53  ;;  %v3693_v53 = vld [vmem:[%s8651_s7 + $0x28] sm:$0xff] }
 0x2f5   :  { %3739 = vmatprep.subr.mxu0 %v9057_v17  ;;  %3868 = vmatprep.subr.mxu1 %v9057_v17  ;;  %v8116_v28 = vand.u32 4294901760, %v3693_v53 }
 0x2f6   :  { %3741 = vmatpush1.msra.mxu0 %v8008_v35  ;;  %3874 = vmatpush1.msra.mxu1 %v3873_v21  ;;  %v8114_v21 = vsub.f32 %v3694_v61, %v8108_v63 }
 0x2f7   :  { %3742 = vmatprep.subr.mxu0 %v9057_v17  ;;  %3875 = vmatprep.subr.mxu1 %v9057_v17 }
 0x2f8   :  { %3744 = vmatpush1.msra.mxu0 %v8024_v49  ;;  %3881 = vmatpush1.msra.mxu1 %v3880_v31 }
 0x2f9   :  { %3745 = vmatprep.subr.mxu0 %v9057_v17  ;;  %3882 = vmatprep.subr.mxu1 %v9057_v17 }
 0x2fa   :  { %3747 = vmatpush1.msra.mxu0 %v8060_v57  ;;  %3888 = vmatpush1.msra.mxu1 %v3887_v5  ;;  %v8866_v5 = vand.u32 4294901760, %v8114_v21 }
 0x2fb   :  { %3748 = vmatprep.subr.mxu0 %v9057_v17  ;;  %3889 = vmatprep.subr.mxu1 %v9057_v17 }
 0x2fc   :  { %3895 = vmatpush1.msra.mxu1 %v3894_v38  ;;  %3750 = vmatpush1.msra.mxu0 %v8108_v63  ;;  %v8127_v38 = vsub.f32 %v3693_v53, %v8116_v28 }
 0x2fd   :  { %3896 = vmatprep.subr.mxu1 %v9057_v17  ;;  %3751 = vmatprep.subr.mxu0 %v9057_v17 }
 0x2fe   :  { %3753 = vmatpush1.msra.mxu0 %v8116_v28 }
 0x2ff   :  { %3754 = vmatprep.subr.mxu0 %v9057_v17 }
 0x376   :  { %v5687_v25 = vpop.f32.mrf.mxu0 }
 0x378   :  { %v2215_v43 = vpop.f32.mrf.mxu0 }
 0x37b   :  { %v5701_v26 = vpop.f32.mrf.mxu0 }
 0x37d   :  { %v2388_v12 = vpop.f32.mrf.mxu0 }
 0x37e   :  { %v5694_v39 = vpop.f32.mrf.mxu1 }
 0x37f   :  { %v2313_v6 = vadd.f32 %v5694_v39, %v5687_v25  ;;  %v8129_v25 = vand.u32 4294901760, %v3692_v27 }
 0x380   :  { %v2306_v50 = vpop.f32.mrf.mxu1 }
 0x381   :  { %v2307_v30 = vadd.f32 %v2306_v50, %v2215_v43  ;;  %v2396_v24 = vadd.f32 %v5701_v26, %v2313_v6  ;;  %v5715_v8 = vpop.f32.mrf.mxu0  ;;  %v3691_v26 = vld [vmem:[%s8651_s7 + $0x18] sm:$0xff]  ;;  %v3900_v6 = vsub.f32 %v8114_v21, %v8866_v5  ;;  %v8865_v50 = vand.u32 4294901760, %v8127_v38  ;;  %3756 = vmatpush1.msra.mxu0 %v8129_v25 }
 0x382   :  { %3757 = vmatprep.subr.mxu0 %v9057_v17 }
 0x383   :  { %v2389_v59 = vadd.f32 %v2388_v12, %v2307_v30  ;;  %v2555_v7 = vpop.f32.mrf.mxu0  ;;  %v8144_v30 = vsub.f32 %v3692_v27, %v8129_v25 }
 0x384   :  { %v5708_v29 = vpop.f32.mrf.mxu1 }
 0x385   :  { %v2479_v15 = vadd.f32 %v5708_v29, %v2396_v24  ;;  %v8146_v24 = vand.u32 4294901760, %v3691_v26 }
 0x386   :  { %v2470_v46 = vpop.f32.mrf.mxu1 }
 0x387   :  { %v2471_v41 = vadd.f32 %v2470_v46, %v2389_v59  ;;  %v2562_v3 = vadd.f32 %v5715_v8, %v2479_v15  ;;  %v8097_v0 = vpop.f32.mrf.mxu0  ;;  %v3690_v8 = vld [vmem:[%s8651_s7 + $0x10] sm:$0xff]  ;;  %v3689_v59 = vld [vmem:[%s8651_s7 + $0x8] sm:$0xff]  ;;  %v3901_v15 = vand.u32 4294901760, %v3900_v6  ;;  %v3907_v46 = vsub.f32 %v8127_v38, %v8865_v50  ;;  %3759 = vmatpush1.msra.mxu0 %v8146_v24 }
 0x388   :  { %3760 = vmatprep.subr.mxu0 %v9057_v17 }
 0x389   :  { %v2556_v10 = vadd.f32 %v2555_v7, %v2471_v41  ;;  %v2726_v48 = vpop.f32.mrf.mxu0  ;;  %v8158_v41 = vand.u32 4294901760, %v3690_v8  ;;  %3902 = vmatpush1.msra.mxu1 %v3901_v15 }
 0x38a   :  { %v5722_v22 = vpop.f32.mrf.mxu1  ;;  %3903 = vmatprep.subr.mxu1 %v9057_v17 }
 0x38b   :  { %v8099_v60 = vadd.f32 %v5722_v22, %v2562_v3  ;;  %v8166_v22 = vand.u32 4294901760, %v3689_v59  ;;  %v8170_v61 = vsub.f32 %v3690_v8, %v8158_v41  ;;  %3762 = vmatpush1.msra.mxu0 %v8158_v41 }
 0x38c   :  { %v2634_v54 = vpop.f32.mrf.mxu1  ;;  %3763 = vmatprep.subr.mxu0 %v9057_v17 }
 0x38d   :  { %v8104_v20 = vadd.f32 %v2634_v54, %v2556_v10  ;;  %v8106_v44 = vpop.f32.mrf.mxu0  ;;  %v8864_v10 = vand.u32 4294901760, %v8144_v30  ;;  %v3908_v54 = vand.u32 4294901760, %v3907_v46  ;;  %v8872_v8 = vand.u32 4294901760, %v8170_v61  ;;  %v3704_v46 = vld [vmem:[%s8651_s7 + $0x80] sm:$0x1]  ;;  %3765 = vmatpush1.msra.mxu0 %v8166_v22 }
 0x38e   :  { %v3719_v4 = vsel %vm3717_vm14, %v3704_v46, 0  ;;  %3766 = vmatprep.subr.mxu0 %v9057_v17 }
 0x38f   :  { %v2899_v45 = vpop.f32.mrf.mxu0  ;;  %3909 = vmatpush1.msra.mxu1 %v3908_v54  ;;  %v3928_v50 = vsub.f32 %v8170_v61, %v8872_v8  ;;  %v8208_v40 = vand.u32 4294901760, %v3719_v4 }
 0x390   :  { %v8119_v31 = vpop.f32.mrf.mxu1  ;;  %3910 = vmatprep.subr.mxu1 %v9057_v17 }
 0x392   :  { %v2817_v43 = vpop.f32.mrf.mxu1 }
 0x393   :  { %v2818_v12 = vadd.f32 %v2817_v43, %v2726_v48  ;;  %v8136_v39 = vpop.f32.mrf.mxu0  ;;  %v8164_v48 = vsub.f32 %v3691_v26, %v8146_v24  ;;  %v8179_v43 = vsub.f32 %v3689_v59, %v8166_v22  ;;  %v3688_v26 = vld [vmem:[%s8651_s7] sm:$0xff]  ;;  %s5980_s7 = smov 43  }
 0x394   :  { %v8186_v15 = vand.u32 4294901760, %v3688_v26 }
 0x395   :  { %v2900_v7 = vadd.f32 %v2899_v45, %v2818_v12  ;;  %v3066_v29 = vpop.f32.mrf.mxu0  ;;  %v3914_v45 = vsub.f32 %v8144_v30, %v8864_v10  ;;  %v8868_v27 = vand.u32 4294901760, %v8164_v48 }
 0x396   :  { %v8160_v3 = vpop.f32.mrf.mxu1  ;;  %v8202_v5 = vsub.f32 %v3688_v26, %v8186_v15  ;;  %3768 = vmatpush1.msra.mxu0 %v8186_v15 }
 0x397   :  { %v3915_v59 = vand.u32 4294901760, %v3914_v45  ;;  %v3921_v10 = vsub.f32 %v8164_v48, %v8868_v27  ;;  %3799 = vmatprep.subr.mxu0 %v9057_v17 }
 0x398   :  { %v2981_v53 = vpop.f32.mrf.mxu1  ;;  %v8873_v26 = vand.u32 4294901760, %v8202_v5  ;;  %3801 = vmatpush2.msra.mxu0 %v8208_v40 }
 0x399   :  { %v2982_v12 = vadd.f32 %v2981_v53, %v2900_v7  ;;  %v5771_v6 = vpop.f32.mrf.mxu0  ;;  %v8871_v7 = vand.u32 4294901760, %v8179_v43  ;;  %3916 = vmatpush1.msra.mxu1 %v3915_v59  ;;  %v3922_v27 = vand.u32 4294901760, %v3921_v10  ;;  %v8215_v10 = vsub.f32 %v3719_v4, %v8208_v40  ;;  %3997 = vmatprep.subr.mxu0 %v9057_v17 }
 0x39a   :  { %3917 = vmatprep.subr.mxu1 %v9057_v17  ;;  %v2824_v4 = vadd.f32 %v8119_v31, %v8097_v0 }
 0x39b   :  { %v3067_v54 = vadd.f32 %v3066_v29, %v2982_v12  ;;  %v3237_v53 = vpop.f32.mrf.mxu0  ;;  %v3935_v55 = vsub.f32 %v8179_v43, %v8871_v7  ;;  %v3929_v29 = vand.u32 4294901760, %v3928_v50  ;;  %3923 = vmatpush1.msra.mxu1 %v3922_v27  ;;  %v3942_v50 = vsub.f32 %v8202_v5, %v8873_v26 }
 0x39c   :  { %v5764_v45 = vpop.f32.mrf.mxu1  ;;  %3924 = vmatprep.subr.mxu1 %v9057_v17  ;;  %v8876_v8 = vand.u32 4294901760, %v8215_v10 }
 0x39d   :  { %v3936_v46 = vand.u32 4294901760, %v3935_v55  ;;  %3930 = vmatpush1.msra.mxu1 %v3929_v29  ;;  %v3943_v55 = vand.u32 4294901760, %v3942_v50 }
 0x39e   :  { %v3145_v12 = vpop.f32.mrf.mxu1  ;;  %3931 = vmatprep.subr.mxu1 %v9057_v17 }
 0x39f   :  { %v3146_v59 = vadd.f32 %v3145_v12, %v3067_v54  ;;  %v5785_v7 = vpop.f32.mrf.mxu0  ;;  %3937 = vmatpush1.msra.mxu1 %v3936_v46  ;;  %v3979_v54 = vsub.f32 %v8215_v10, %v8876_v8 }
 0x3a0   :  { %3938 = vmatprep.subr.mxu1 %v9057_v17 }
 0x3a1   :  { %3668 = vrot.lane.b32.xlu0 %v3146_v59, %s5980_s7  ;;  %v3410_v12 = vpop.f32.mrf.mxu0  ;;  %3944 = vmatpush1.msra.mxu1 %v3943_v55  ;;  %v3980_v26 = vand.u32 4294901760, %v3979_v54  ;;  %v2907_v59 = vadd.f32 %v8106_v44, %v2824_v4 }
 0x3a2   :  { %v5778_v27 = vpop.f32.mrf.mxu1  ;;  %3975 = vmatprep.subr.mxu1 %v9057_v17 }
 0x3a3   :  { %v3335_v50 = vadd.f32 %v5778_v27, %v5771_v6  ;;  %3981 = vmatpush2.msra.mxu1 %v3980_v26  ;;  %v2990_v8 = vadd.f32 %v8160_v3, %v2907_v59 }
 0x3a4   :  { %v3328_v29 = vpop.f32.mrf.mxu1  ;;  %4114 = vmatprep.subr.mxu1 %v9057_v17 }
 0x3a5   :  { %v3329_v34 = vadd.f32 %v3328_v29, %v3237_v53  ;;  %v5799_v46 = vpop.f32.mrf.mxu0  ;;  %v3418_v62 = vadd.f32 %v5785_v7, %v3335_v50  ;;  %v3073_v29 = vadd.f32 %v8136_v39, %v2990_v8 }
 0x3a7   :  { %v3411_v0 = vadd.f32 %v3410_v12, %v3329_v34  ;;  %v5792_v31 = vpop.f32.mrf.mxu1  ;;  %v3577_v36 = vpop.f32.mrf.mxu0  ;;  %v3152_v34 = vadd.f32 %v5764_v45, %v3073_v29 }
 0x3a8   :  { %v3501_v16 = vadd.f32 %v5792_v31, %v3418_v62 }
 0x3a9   :  { %v3492_v11 = vpop.f32.mrf.mxu1 }
 0x3aa   :  { %v3493_v18 = vadd.f32 %v3492_v11, %v3411_v0  ;;  %v3584_v6 = vadd.f32 %v5799_v46, %v3501_v16 }
 0x3ab   :  { %v5806_v55 = vpop.f32.mrf.mxu1 }
 0x3ac   :  { %v3578_v54 = vadd.f32 %v3577_v36, %v3493_v18  ;;  %v3663_v26 = vadd.f32 %v5806_v55, %v3584_v6 }
 0x3ad   :  { %v3656_v53 = vpop.f32.mrf.mxu1 }
 0x3ae   :  { %v3657_v44 = vadd.f32 %v3656_v53, %v3578_v54 }
 0x3b0   :  { %3676 = vrot.lane.b32.xlu1 %v3657_v44, %s5981_s20 }
 0x3b4   :  { %3670 = vrot.lane.b32.xlu1 %v3152_v34, %s5980_s7 }
 0x3b8   :  { %3678 = vrot.lane.b32.xlu1 %v3663_v26, %s5981_s20 }
 0x413   :  { %v3669_v3 = vpop.permute.xlu0 %3668 }
 0x414   :  { %v3683_v36 = vsel %vm3682_vm15, %v8104_v20, %v3669_v3 }
 0x422   :  { %v3677_v18 = vpop.permute.xlu1 %3676 }
 0x423   :  { %v3686_v11 = vsel %vm3685_vm0, %v3683_v36, %v3677_v18  ;;  %v3713_v62 = vsel %vm3712_vm1, %v3677_v18, 0 }
 0x424   :  { %v8242_v39 = vand.u32 4294901760, %v3713_v62  ;;  %v8244_v8 = vand.u32 4294901760, %v3686_v11 }
 0x426   :  { %v3803_v16 = vsub.f32 %v3713_v62, %v8242_v39  ;;  %v8248_v7 = vsub.f32 %v3686_v11, %v8244_v8  ;;  %3983 = vmatprep.mubr.f32.mxu1 %v8242_v39  ;;  %v3671_v45 = vpop.permute.xlu1 %3670 }
 0x427   :  { %3985 = vmatmul.mubr.f32.vlgmr.msra.gmra.mxu1 %v8244_v8  ;;  %v3684_v12 = vsel %vm3682_vm15, %v8099_v60, %v3671_v45 }
 0x428   :  { %v3810_v20 = vand.u32 4294901760, %v8248_v7  ;;  %4116 = vmatpush1.msra.mxu1 %v7971_v37  ;;  %v3804_v4 = vand.u32 4294901760, %v3803_v16 }
 0x429   :  { %4117 = vmatprep.subr.mxu1 %v9057_v17 }
 0x42a   :  { %v3811_v27 = vsub.f32 %v8248_v7, %v3810_v20  ;;  %4119 = vmatpush1.msra.mxu1 %v7973_v52  ;;  %v3679_v59 = vpop.permute.xlu1 %3678  ;;  %v3805_v50 = vsub.f32 %v3803_v16, %v3804_v4 }
 0x42b   :  { %v3687_v0 = vsel %vm3685_vm0, %v3684_v12, %v3679_v59  ;;  %v3715_v31 = vsel %vm3712_vm1, %v3679_v59, 0  ;;  %4120 = vmatprep.subr.mxu1 %v9057_v17 }
 0x42c   :  { %v8264_v46 = vand.u32 4294901760, %v3715_v31  ;;  %v8266_v55 = vand.u32 4294901760, %v3687_v0  ;;  %4122 = vmatpush1.msra.mxu1 %v7975_v58  ;;  %v3806_v54 = vand.u32 4294901760, %v3805_v50  ;;  %v3812_v53 = vand.u32 4294901760, %v3811_v27 }
 0x42d   :  { %4123 = vmatprep.subr.mxu1 %v9057_v17 }
 0x42e   :  { %v8271_v60 = vsub.f32 %v3715_v31, %v8264_v46  ;;  %v8274_v29 = vsub.f32 %v3687_v0, %v8266_v55  ;;  %4125 = vmatpush1.msra.mxu1 %v7986_v14  ;;  %3807 = vmatprep.mubr.f32.mxu0 %v3806_v54 }
 0x42f   :  { %3990 = vmatprep.mubr.f32.mxu1 %v8264_v46  ;;  %4126 = vmatprep.subr.mxu1 %v9057_v17 }
 0x430   :  { %3813 = vmatmul.mubr.f32.vlgmr.msra.gmra.mxu0 %v3812_v53  ;;  %3992 = vmatmul.mubr.f32.gmra.mxu1 %v8266_v55  ;;  %v3819_v44 = vand.u32 4294901760, %v8271_v60  ;;  %v3825_v34 = vand.u32 4294901760, %v8274_v29 }
 0x431   :  { %4000 = vmatpush1.msra.mxu0 %v7999_v2  ;;  %4128 = vmatpush1.msra.mxu1 %v7988_v9 }
 0x432   :  { %4001 = vmatprep.subr.mxu0 %v9057_v17  ;;  %4129 = vmatprep.subr.mxu1 %v9057_v17  ;;  %v3820_v6 = vsub.f32 %v8271_v60, %v3819_v44  ;;  %v3826_v26 = vsub.f32 %v8274_v29, %v3825_v34 }
 0x433   :  { %4198 = vmatprep.mubr.f32.mxu1 %v3804_v4  ;;  %4004 = vmatpush1.msra.mxu0 %v8002_v51 }
 0x434   :  { %4131 = vmatpush1.msra.mxu1 %v7990_v23  ;;  %4005 = vmatprep.subr.mxu0 %v9057_v17  ;;  %v3821_v3 = vand.u32 4294901760, %v3820_v6  ;;  %v3827_v36 = vand.u32 4294901760, %v3826_v26 }
 0x435   :  { %4132 = vmatprep.subr.mxu1 %v9057_v17  ;;  %4008 = vmatpush1.msra.mxu0 %v8005_v1 }
 0x436   :  { %4134 = vmatpush1.msra.mxu1 %v8008_v35  ;;  %4009 = vmatprep.subr.mxu0 %v9057_v17 }
 0x437   :  { %4135 = vmatprep.subr.mxu1 %v9057_v17  ;;  %4012 = vmatpush1.msra.mxu0 %v8011_v32 }
 0x438   :  { %4137 = vmatpush1.msra.mxu1 %v8024_v49  ;;  %3822 = vmatprep.mubr.f32.mxu0 %v3821_v3 }
 0x439   :  { %4013 = vmatprep.subr.mxu0 %v9057_v17  ;;  %4138 = vmatprep.subr.mxu1 %v9057_v17 }
 0x43a   :  { %3828 = vmatmul.mubr.f32.gmra.mxu0 %v3827_v36  ;;  %4140 = vmatpush1.msra.mxu1 %v8060_v57 }
 0x43b   :  { %4016 = vmatpush1.msra.mxu0 %v8014_v42  ;;  %4097 = vmatprep.mubr.f32.mxu0 %v3803_v16 }
 0x43c   :  { %4017 = vmatprep.subr.mxu0 %v9057_v17  ;;  %4141 = vmatprep.subr.mxu1 %v9057_v17 }
 0x43d   :  { %4020 = vmatpush1.msra.mxu0 %v8018_v47  ;;  %4143 = vmatpush1.msra.mxu1 %v8108_v63 }
 0x43e   :  { %4021 = vmatprep.subr.mxu0 %v9057_v17  ;;  %4144 = vmatprep.subr.mxu1 %v9057_v17 }
 0x43f   :  { %4024 = vmatpush1.msra.mxu0 %v8029_v13  ;;  %4146 = vmatpush1.msra.mxu1 %v8116_v28 }
 0x440   :  { %4025 = vmatprep.subr.mxu0 %v9057_v17  ;;  %4147 = vmatprep.subr.mxu1 %v9057_v17 }
 0x441   :  { %4028 = vmatpush1.msra.mxu0 %v8052_v56  ;;  %4149 = vmatpush1.msra.mxu1 %v8129_v25 }
 0x442   :  { %4029 = vmatprep.subr.mxu0 %v9057_v17  ;;  %4150 = vmatprep.subr.mxu1 %v9057_v17 }
 0x443   :  { %4032 = vmatpush1.msra.mxu0 %v8069_v33  ;;  %4152 = vmatpush1.msra.mxu1 %v8146_v24 }
 0x444   :  { %4033 = vmatprep.subr.mxu0 %v9057_v17  ;;  %4153 = vmatprep.subr.mxu1 %v9057_v17 }
 0x445   :  { %4036 = vmatpush1.msra.mxu0 %v8114_v21  ;;  %4155 = vmatpush1.msra.mxu1 %v8158_v41 }
 0x446   :  { %4037 = vmatprep.subr.mxu0 %v9057_v17  ;;  %4156 = vmatprep.subr.mxu1 %v9057_v17 }
 0x447   :  { %4040 = vmatpush1.msra.mxu0 %v8127_v38  ;;  %4158 = vmatpush1.msra.mxu1 %v8166_v22 }
 0x448   :  { %4041 = vmatprep.subr.mxu0 %v9057_v17  ;;  %4159 = vmatprep.subr.mxu1 %v9057_v17 }
 0x449   :  { %4044 = vmatpush1.msra.mxu0 %v8144_v30  ;;  %4161 = vmatpush1.msra.mxu1 %v8186_v15 }
 0x44a   :  { %4045 = vmatprep.subr.mxu0 %v9057_v17  ;;  %4192 = vmatprep.subr.mxu1 %v9057_v17 }
 0x44b   :  { %4048 = vmatpush1.msra.mxu0 %v8164_v48  ;;  %4194 = vmatpush2.msra.mxu1 %v8208_v40 }
 0x44c   :  { %4049 = vmatprep.subr.mxu0 %v9057_v17  ;;  %4202 = vmatmul.mubr.f32.vlgmr.msra.gmra.mxu1 %v3810_v20 }
 0x44d   :  { %4348 = vmatprep.subr.mxu1 %v9057_v17  ;;  %4052 = vmatpush1.msra.mxu0 %v8170_v61 }
 0x44e   :  { %4209 = vmatprep.mubr.f32.mxu1 %v3819_v44  ;;  %4350 = vmatpush1.msra.mxu1 %v7971_v37  ;;  %v9131_v37 = vand.u32 4294901760, %v7999_v2  ;;  %v9137_v2 = vand.u32 4294901760, %v8029_v13  ;;  %v9145_v13 = vand.u32 4294901760, %v8179_v43  ;;  %v5541_v44 = vld [vmem:[%s8652_s8] ss:$0 sm:$0xff] }
 0x44f   :  { %4053 = vmatprep.subr.mxu0 %v9057_v17  ;;  %4351 = vmatprep.subr.mxu1 %v9057_v17 }
 0x450   :  { %4056 = vmatpush1.msra.mxu0 %v8179_v43  ;;  %4353 = vmatpush1.msra.mxu1 %v7973_v52  ;;  %v9132_v52 = vand.u32 4294901760, %v8002_v51  ;;  %v9138_v51 = vand.u32 4294901760, %v8052_v56  ;;  %v9146_v56 = vand.u32 4294901760, %v8202_v5 }
 0x451   :  { %4057 = vmatprep.subr.mxu0 %v9057_v17  ;;  %4213 = vmatmul.mubr.f32.gmra.mxu1 %v3825_v34 }
 0x452   :  { %4354 = vmatprep.subr.mxu1 %v9057_v17  ;;  %4060 = vmatpush1.msra.mxu0 %v8202_v5 }
 0x453   :  { %4356 = vmatpush1.msra.mxu1 %v7975_v58  ;;  %4430 = vmatprep.mubr.f32.mxu1 %v8242_v39  ;;  %v9133_v58 = vand.u32 4294901760, %v8005_v1  ;;  %v9139_v1 = vand.u32 4294901760, %v8069_v33 }
 0x454   :  { %4091 = vmatprep.subr.mxu0 %v9057_v17  ;;  %4357 = vmatprep.subr.mxu1 %v9057_v17 }
 0x455   :  { %4094 = vmatpush2.msra.mxu0 %v8215_v10  ;;  %4359 = vmatpush1.msra.mxu1 %v7986_v14  ;;  %v9134_v14 = vand.u32 4294901760, %v8011_v32  ;;  %v9141_v32 = vand.u32 4294901760, %v8127_v38  ;;  %v4453_v38 = vld [vmem:[%s8653_s9 + $0x18] sm:$0xff] }
 0x456   :  { %4100 = vmatmul.mubr.f32.vlgmr.msra.gmra.mxu0 %v8248_v7  ;;  %4218 = vmatprep.subr.mxu0 %v9057_v17 }
 0x457   :  { %4360 = vmatprep.subr.mxu1 %v9057_v17  ;;  %4106 = vmatprep.mubr.f32.mxu0 %v8271_v60 }
 0x458   :  { %4222 = vmatpush1.msra.mxu0 %v9131_v37  ;;  %4362 = vmatpush1.msra.mxu1 %v7988_v9  ;;  %v9135_v9 = vand.u32 4294901760, %v8014_v42  ;;  %v9142_v42 = vand.u32 4294901760, %v8144_v30 }
 0x459   :  { %4223 = vmatprep.subr.mxu0 %v9057_v17  ;;  %4363 = vmatprep.subr.mxu1 %v9057_v17 }
 0x45a   :  { %4227 = vmatpush1.msra.mxu0 %v9132_v52  ;;  %4365 = vmatpush1.msra.mxu1 %v7990_v23  ;;  %v9136_v23 = vand.u32 4294901760, %v8018_v47  ;;  %v9143_v47 = vand.u32 4294901760, %v8164_v48 }
 0x45b   :  { %4109 = vmatmul.mubr.f32.gmra.mxu0 %v8274_v29  ;;  %4228 = vmatprep.subr.mxu0 %v9057_v17 }
 0x45c   :  { %4366 = vmatprep.subr.mxu1 %v9057_v17  ;;  %4232 = vmatpush1.msra.mxu0 %v9133_v58 }
 0x45d   :  { %4334 = vmatprep.mubr.f32.mxu0 %v8242_v39  ;;  %4368 = vmatpush1.msra.mxu1 %v8008_v35  ;;  %v9140_v35 = vand.u32 4294901760, %v8114_v21  ;;  %v4454_v21 = vld [vmem:[%s8653_s9 + $0x20] sm:$0xff] }
 0x45e   :  { %4233 = vmatprep.subr.mxu0 %v9057_v17  ;;  %4369 = vmatprep.subr.mxu1 %v9057_v17  ;;  %v8459_v5 = vand.u32 4294901760, %v4454_v21 }
 0x45f   :  { %4237 = vmatpush1.msra.mxu0 %v9134_v14  ;;  %4371 = vmatpush1.msra.mxu1 %v8024_v49  ;;  %v9144_v49 = vand.u32 4294901760, %v8170_v61 }
 0x460   :  { %4238 = vmatprep.subr.mxu0 %v9057_v17  ;;  %4372 = vmatprep.subr.mxu1 %v9057_v17  ;;  %v8470_v30 = vsub.f32 %v4454_v21, %v8459_v5 }
 0x461   :  { %4242 = vmatpush1.msra.mxu0 %v9135_v9  ;;  %4374 = vmatpush1.msra.mxu1 %v8060_v57  ;;  %v4455_v57 = vld [vmem:[%s8653_s9 + $0x28] sm:$0x7] }
 0x462   :  { %4243 = vmatprep.subr.mxu0 %v9057_v17  ;;  %4375 = vmatprep.subr.mxu1 %v9057_v17  ;;  %v4464_v33 = vsel %vm4462_vm2, %v4455_v57, 0 }
 0x463   :  { %4247 = vmatpush1.msra.mxu0 %v9136_v23  ;;  %4377 = vmatpush1.msra.mxu1 %v8108_v63  ;;  %v8451_v63 = vand.u32 4294901760, %v4464_v33 }
 0x464   :  { %4248 = vmatprep.subr.mxu0 %v9057_v17  ;;  %4378 = vmatprep.subr.mxu1 %v9057_v17 }
 0x465   :  { %4252 = vmatpush1.msra.mxu0 %v9137_v2  ;;  %4380 = vmatpush1.msra.mxu1 %v8116_v28  ;;  %v8457_v28 = vsub.f32 %v4464_v33, %v8451_v63 }
 0x466   :  { %4253 = vmatprep.subr.mxu0 %v9057_v17  ;;  %4381 = vmatprep.subr.mxu1 %v9057_v17 }
 0x467   :  { %4257 = vmatpush1.msra.mxu0 %v9138_v51  ;;  %4383 = vmatpush1.msra.mxu1 %v8129_v25  ;;  %v8467_v25 = vand.u32 4294901760, %v8457_v28 }
 0x468   :  { %4258 = vmatprep.subr.mxu0 %v9057_v17  ;;  %4384 = vmatprep.subr.mxu1 %v9057_v17 }
 0x469   :  { %4262 = vmatpush1.msra.mxu0 %v9139_v1  ;;  %4386 = vmatpush1.msra.mxu1 %v8146_v24  ;;  %v8472_v24 = vand.u32 4294901760, %v4453_v38  ;;  %v4581_v48 = vsub.f32 %v8457_v28, %v8467_v25 }
 0x46a   :  { %4263 = vmatprep.subr.mxu0 %v9057_v17  ;;  %4387 = vmatprep.subr.mxu1 %v9057_v17 }
 0x46b   :  { %4267 = vmatpush1.msra.mxu0 %v9140_v35  ;;  %4389 = vmatpush1.msra.mxu1 %v8158_v41  ;;  %v4452_v41 = vld [vmem:[%s8653_s9 + $0x10] sm:$0xff]  ;;  %v8485_v61 = vsub.f32 %v4453_v38, %v8472_v24 }
 0x46c   :  { %4268 = vmatprep.subr.mxu0 %v9057_v17  ;;  %4390 = vmatprep.subr.mxu1 %v9057_v17  ;;  %v8487_v43 = vand.u32 4294901760, %v4452_v41 }
 0x46d   :  { %4272 = vmatpush1.msra.mxu0 %v9141_v32  ;;  %4392 = vmatpush1.msra.mxu1 %v8166_v22  ;;  %v8482_v22 = vand.u32 4294901760, %v8470_v30  ;;  %v8497_v11 = vand.u32 4294901760, %v8485_v61 }
 0x46e   :  { %4273 = vmatprep.subr.mxu0 %v9057_v17  ;;  %4393 = vmatprep.subr.mxu1 %v9057_v17  ;;  %v8500_v62 = vsub.f32 %v4452_v41, %v8487_v43 }
 0x46f   :  { %4277 = vmatpush1.msra.mxu0 %v9142_v42  ;;  %4395 = vmatpush1.msra.mxu1 %v8186_v15  ;;  %v4451_v15 = vld [vmem:[%s8653_s9 + $0x8] sm:$0xff]  ;;  %v4588_v18 = vsub.f32 %v8470_v30, %v8482_v22  ;;  %v4595_v7 = vsub.f32 %v8485_v61, %v8497_v11 }
 0x470   :  { %4278 = vmatprep.subr.mxu0 %v9057_v17  ;;  %4426 = vmatprep.subr.mxu1 %v9057_v17  ;;  %v8503_v39 = vand.u32 4294901760, %v4451_v15  ;;  %v8512_v45 = vand.u32 4294901760, %v8500_v62 }
 0x471   :  { %4282 = vmatpush1.msra.mxu0 %v9143_v47  ;;  %4428 = vmatpush2.msra.mxu1 %v8208_v40  ;;  %v9147_v40 = vand.u32 4294901760, %v8215_v10  ;;  %v4582_v10 = vand.u32 4294901760, %v4581_v48  ;;  %v4589_v16 = vand.u32 4294901760, %v4588_v18  ;;  %v4596_v27 = vand.u32 4294901760, %v4595_v7 }
 0x472   :  { %4283 = vmatprep.subr.mxu0 %v9057_v17  ;;  %4432 = vmatmul.mubr.f32.vlgmr.msra.gmra.mxu1 %v8244_v8  ;;  %v8517_v4 = vsub.f32 %v4451_v15, %v8503_v39  ;;  %v4602_v12 = vsub.f32 %v8500_v62, %v8512_v45 }
 0x473   :  { %4287 = vmatpush1.msra.mxu0 %v9144_v49  ;;  %4437 = vmatprep.mubr.f32.mxu1 %v8264_v46 }
 0x474   :  { %4288 = vmatprep.subr.mxu0 %v9057_v17  ;;  %5822 = vmatprep.subr.mxu1 %v4582_v10  ;;  %v8527_v50 = vand.u32 4294901760, %v8517_v4  ;;  %v4603_v0 = vand.u32 4294901760, %v4602_v12 }
 0x475   :  { %4292 = vmatpush1.msra.mxu0 %v9145_v13  ;;  %5823 = vmatpush3.msra.mxu1 %v4582_v10 }
 0x476   :  { %4293 = vmatprep.subr.mxu0 %v9057_v17  ;;  %4439 = vmatmul.mubr.f32.gmra.mxu1 %v8266_v55 }
 0x477   :  { %4297 = vmatpush1.msra.mxu0 %v9146_v56  ;;  %5824 = vmatprep.subr.mxu1 %v4589_v16 }
 0x478   :  { %4328 = vmatprep.subr.mxu0 %v9057_v17  ;;  %5825 = vmatpush3.msra.mxu1 %v4589_v16 }
 0x479   :  { %4332 = vmatpush2.msra.mxu0 %v9147_v40  ;;  %5826 = vmatprep.subr.mxu1 %v4596_v27 }
 0x47a   :  { %4336 = vmatmul.mubr.f32.vlgmr.msra.gmra.mxu0 %v8244_v8  ;;  %5807 = vmatprep.subr.mxu0 %v8451_v63  ;;  %v4450_v8 = vld [vmem:[%s8653_s9] sm:$0xff] }
 0x47b   :  { %4341 = vmatprep.mubr.f32.mxu0 %v8264_v46  ;;  %5808 = vmatpush3.msra.mxu0 %v8451_v63  ;;  %v8514_v20 = vand.u32 4294901760, %v4450_v8  ;;  %v4609_v46 = vsub.f32 %v8517_v4, %v8527_v50 }
 0x47c   :  { %5809 = vmatprep.subr.mxu0 %v8459_v5  ;;  %5827 = vmatpush3.msra.mxu1 %v4596_v27 }
 0x47d   :  { %5810 = vmatpush3.msra.mxu0 %v8459_v5  ;;  %v8523_v59 = vsub.f32 %v4450_v8, %v8514_v20  ;;  %5828 = vmatprep.subr.mxu1 %v4603_v0  ;;  %v4610_v54 = vand.u32 4294901760, %v4609_v46 }
 0x47e   :  { %4343 = vmatmul.mubr.f32.gmra.mxu0 %v8266_v55  ;;  %5811 = vmatprep.subr.mxu0 %v8472_v24 }
 0x47f   :  { %5812 = vmatpush3.msra.mxu0 %v8472_v24  ;;  %v8531_v31 = vand.u32 4294901760, %v8523_v59  ;;  %5829 = vmatpush3.msra.mxu1 %v4603_v0 }
 0x480   :  { %5813 = vmatprep.subr.mxu0 %v8487_v43  ;;  %5830 = vmatprep.subr.mxu1 %v4610_v54 }
 0x481   :  { %5814 = vmatpush3.msra.mxu0 %v8487_v43  ;;  %v4616_v55 = vsub.f32 %v8523_v59, %v8531_v31  ;;  %5831 = vmatpush3.msra.mxu1 %v4610_v54 }
 0x482   :  { %5815 = vmatprep.subr.mxu0 %v8503_v39 }
 0x483   :  { %5816 = vmatpush3.msra.mxu0 %v8503_v39  ;;  %v4617_v53 = vand.u32 4294901760, %v4616_v55 }
 0x484   :  { %5817 = vmatprep.subr.mxu0 %v8514_v20 }
 0x485   :  { %5818 = vmatpush3.msra.mxu0 %v8514_v20  ;;  %5832 = vmatprep.subr.mxu1 %v4617_v53 }
 0x486   :  { %5837 = vmatprep.subr.mxu0 %v8457_v28  ;;  %5833 = vmatpush3.msra.mxu1 %v4617_v53 }
 0x487   :  { %5852 = vmatprep.subr.mxu1 %v8451_v63 }
 0x4e7   :  { %v3986_v60 = vpop.f32.mrf.mxu1 }
 0x4e9   :  { %v3988_v29 = vpop.f32.mrf.mxu1 }
 0x4f0   :  { %v3814_v34 = vpop.f32.mrf.mxu0  ;;  %v3993_v6 = vpop.f32.mrf.mxu1 }
 0x4f1   :  { %v3815_v26 = vadd.f32 %v5541_v44, %v3814_v34 }
 0x4f2   :  { %v3816_v3 = vpop.f32.mrf.mxu0  ;;  %v3995_v36 = vpop.f32.mrf.mxu1 }
 0x4f3   :  { %v3987_v37 = vadd.f32 %v3986_v60, %v3815_v26 }
 0x4fa   :  { %v3829_v52 = vpop.f32.mrf.mxu0 }
 0x4fb   :  { %v3830_v47 = vadd.f32 %v5541_v44, %v3829_v52 }
 0x4fc   :  { %v3831_v58 = vpop.f32.mrf.mxu0 }
 0x4fd   :  { %v3994_v40 = vadd.f32 %v3993_v6, %v3830_v47 }
 0x50c   :  { %v4203_v14 = vpop.f32.mrf.mxu1 }
 0x50e   :  { %v4205_v9 = vpop.f32.mrf.mxu1 }
 0x511   :  { %v4214_v23 = vpop.f32.mrf.mxu1 }
 0x513   :  { %v4216_v2 = vpop.f32.mrf.mxu1 }
 0x514   :  { %v5037_v2 = vld [vmem:[%s8655_s11] sm:$0x3] }
 0x516   :  { %v4101_v51 = vpop.f32.mrf.mxu0 }
 0x517   :  { %v4102_v13 = vadd.f32 %v4101_v51, %v3987_v37  ;;  %v5040_v51 = vsel %vm2135_vm10, %v5037_v2, 0 }
 0x518   :  { %v4103_v1 = vpop.f32.mrf.mxu0 }
 0x519   :  { %v4204_v21 = vadd.f32 %v4203_v14, %v4102_v13  ;;  %v5109_v1 = vand.u32 4294901760, %v5040_v51 }
 0x51b   :  { %v4110_v35 = vpop.f32.mrf.mxu0 }
 0x51c   :  { %v4111_v33 = vadd.f32 %v4110_v35, %v3994_v40  ;;  %v5110_v35 = vsub.f32 %v5040_v51, %v5109_v1 }
 0x51d   :  { %v4112_v32 = vpop.f32.mrf.mxu0 }
 0x51e   :  { %v4215_v10 = vadd.f32 %v4214_v23, %v4111_v33  ;;  %v5111_v32 = vand.u32 4294901760, %v5110_v35 }
 0x520   :  { %v5112_v13 = vsub.f32 %v5110_v35, %v5111_v32 }
 0x532   :  { %v4433_v42 = vpop.f32.mrf.mxu1 }
 0x534   :  { %v4435_v49 = vpop.f32.mrf.mxu1 }
 0x535   :  { %v5020_v49 = vld [vmem:[%s8654_s10] sm:$0xff] }
 0x536   :  { %v4440_v56 = vpop.f32.mrf.mxu1 }
 0x538   :  { %v4442_v57 = vpop.f32.mrf.mxu1 }
 0x53a   :  { %v4337_v38 = vpop.f32.mrf.mxu0 }
 0x53b   :  { %v4338_v41 = vadd.f32 %v4337_v38, %v4204_v21  ;;  %v5113_v21 = vand.u32 4294901760, %v5112_v13 }
 0x53c   :  { %v4339_v48 = vpop.f32.mrf.mxu0 }
 0x53d   :  { %v4434_v15 = vadd.f32 %v4433_v42, %v4338_v41  ;;  %v5021_v42 = vld [vmem:[%s8654_s10 + $0x8] sm:$0xff] }
 0x53e   :  { %v4344_v18 = vpop.f32.mrf.mxu0 }
 0x53f   :  { %vm4444_vm3 = vcmp.gt.f32.partialorder %v4434_v15, 0.0  ;;  %v4446_v8 = vmul.f32 0.01, %v4434_v15  ;;  %v4345_v16 = vadd.f32 %v4344_v18, %v4215_v10 }
 0x540   :  { %v4346_v7 = vpop.f32.mrf.mxu0 }
 0x541   :  { %v4448_v27 = vsel %vm4444_vm3, %v4434_v15, %v4446_v8  ;;  %v4441_v12 = vadd.f32 %v4440_v56, %v4345_v16 }
 0x542   :  { %v4457_v0 = vsel %vm3682_vm15, %v4448_v27, 0  ;;  %v5034_v27 = vld [vmem:[%s8645_s1] sm:$0x3] }
 0x543   :  { %vm4445_vm4 = vcmp.gt.f32.partialorder %v4441_v12, 0.0  ;;  %v4447_v46 = vmul.f32 0.01, %v4441_v12  ;;  %v4537_v55 = vand.u32 4294901760, %v4457_v0 }
 0x545   :  { %v4449_v54 = vsel %vm4445_vm4, %v4441_v12, %v4447_v46  ;;  %5834 = vmatprep.mubr.f32.mxu1 %v4537_v55  ;;  %v4538_v53 = vsub.f32 %v4457_v0, %v4537_v55  ;;  %v5036_v12 = vsel %vm5035_vm6, 0.0, %v5034_v27 }
 0x546   :  { %v4460_v60 = vsel %vm3682_vm15, %v4449_v54, 0  ;;  %v5038_v46 = vmul.f32 0.009512655, %v5036_v12 }
 0x547   :  { %v8545_v29 = vand.u32 4294901760, %v4460_v60  ;;  %v4539_v44 = vand.u32 4294901760, %v4538_v53 }
 0x549   :  { %v4548_v34 = vsub.f32 %v4460_v60, %v8545_v29  ;;  %5835 = vmatmul.mubr.f32.vlgmr.msra.gmra.mxu1 %v8545_v29  ;;  %v4540_v6 = vsub.f32 %v4538_v53, %v4539_v44 }
 0x54a   :  { %5853 = vmatpush3.msra.mxu1 %v8451_v63  ;;  %5864 = vmatprep.mubr.f32.mxu1 %v4539_v44 }
 0x54b   :  { %v4549_v26 = vand.u32 4294901760, %v4548_v34  ;;  %5854 = vmatprep.subr.mxu1 %v8459_v5  ;;  %v4541_v3 = vand.u32 4294901760, %v4540_v6 }
 0x54c   :  { %5855 = vmatpush3.msra.mxu1 %v8459_v5 }
 0x54d   :  { %5856 = vmatprep.subr.mxu1 %v8472_v24  ;;  %5819 = vmatprep.mubr.f32.mxu0 %v4541_v3  ;;  %v4550_v36 = vsub.f32 %v4548_v34, %v4549_v26 }
 0x54e   :  { %5857 = vmatpush3.msra.mxu1 %v8472_v24 }
 0x54f   :  { %5858 = vmatprep.subr.mxu1 %v8487_v43  ;;  %v4551_v37 = vand.u32 4294901760, %v4550_v36 }
 0x550   :  { %5859 = vmatpush3.msra.mxu1 %v8487_v43 }
 0x551   :  { %5860 = vmatprep.subr.mxu1 %v8503_v39  ;;  %5820 = vmatmul.mubr.f32.vlgmr.msra.gmra.mxu0 %v4551_v37 }
 0x552   :  { %5838 = vmatpush3.msra.mxu0 %v8457_v28  ;;  %5861 = vmatpush3.msra.mxu1 %v8503_v39 }
 0x553   :  { %5839 = vmatprep.subr.mxu0 %v8470_v30  ;;  %5849 = vmatprep.mubr.f32.mxu0 %v4538_v53 }
 0x554   :  { %5862 = vmatprep.subr.mxu1 %v8514_v20  ;;  %5840 = vmatpush3.msra.mxu0 %v8470_v30 }
 0x555   :  { %5863 = vmatpush3.msra.mxu1 %v8514_v20  ;;  %5841 = vmatprep.subr.mxu0 %v8485_v61 }
 0x556   :  { %5865 = vmatmul.mubr.f32.vlgmr.msra.gmra.mxu1 %v4549_v26  ;;  %5882 = vmatprep.subr.mxu1 %v8451_v63 }
 0x557   :  { %5842 = vmatpush3.msra.mxu0 %v8485_v61  ;;  %5883 = vmatpush3.msra.mxu1 %v8451_v63  ;;  %v5982_v63 = vmov 0  }
 0x558   :  { %5894 = vmatprep.mubr.f32.mxu1 %v4537_v55  ;;  %5843 = vmatprep.subr.mxu0 %v8500_v62 }
 0x559   :  { %5884 = vmatprep.subr.mxu1 %v8459_v5  ;;  %5844 = vmatpush3.msra.mxu0 %v8500_v62 }
 0x55a   :  { %5885 = vmatpush3.msra.mxu1 %v8459_v5  ;;  %5845 = vmatprep.subr.mxu0 %v8517_v4 }
 0x55b   :  { %5886 = vmatprep.subr.mxu1 %v8472_v24  ;;  %5846 = vmatpush3.msra.mxu0 %v8517_v4 }
 0x55c   :  { %5887 = vmatpush3.msra.mxu1 %v8472_v24  ;;  %5847 = vmatprep.subr.mxu0 %v8523_v59 }
 0x55d   :  { %5888 = vmatprep.subr.mxu1 %v8487_v43  ;;  %5848 = vmatpush3.msra.mxu0 %v8523_v59 }
 0x55e   :  { %5889 = vmatpush3.msra.mxu1 %v8487_v43  ;;  %5850 = vmatmul.mubr.f32.vlgmr.msra.gmra.mxu0 %v4548_v34 }
 0x55f   :  { %5867 = vmatprep.subr.mxu0 %v8467_v25  ;;  %5890 = vmatprep.subr.mxu1 %v8503_v39 }
 0x560   :  { %5868 = vmatpush3.msra.mxu0 %v8467_v25  ;;  %5879 = vmatprep.mubr.f32.mxu0 %v4537_v55 }
 0x561   :  { %5891 = vmatpush3.msra.mxu1 %v8503_v39  ;;  %5869 = vmatprep.subr.mxu0 %v8482_v22 }
 0x562   :  { %5892 = vmatprep.subr.mxu1 %v8514_v20  ;;  %5870 = vmatpush3.msra.mxu0 %v8482_v22 }
 0x563   :  { %5893 = vmatpush3.msra.mxu1 %v8514_v20  ;;  %5871 = vmatprep.subr.mxu0 %v8497_v11 }
 0x564   :  { %5895 = vmatmul.mubr.f32.vlgmr.msra.gmra.mxu1 %v8545_v29  ;;  %5872 = vmatpush3.msra.mxu0 %v8497_v11 }
 0x565   :  { %5873 = vmatprep.subr.mxu0 %v8512_v45  ;;  %5904 = vmatprep.subr.mxu1 %v9057_v17 }
 0x566   :  { %5874 = vmatpush3.msra.mxu0 %v8512_v45  ;;  %5946 = vset.pattern.permute.xlu0 %v5982_v63 }
 0x567   :  { %5875 = vmatprep.subr.mxu0 %v8527_v50  ;;  %5947 = vset.pattern.permute.xlu1 %v5982_v63 }
 0x568   :  { %5876 = vmatpush3.msra.mxu0 %v8527_v50  ;;  %5908 = vmatprep.mubr.msk.f32.mxu1 %vm5983_vm5, %v9057_v17 }
 0x569   :  { %5877 = vmatprep.subr.mxu0 %v8531_v31 }
 0x56a   :  { %5878 = vmatpush3.msra.mxu0 %v8531_v31 }
 0x56b   :  { %5880 = vmatmul.mubr.f32.vlgmr.msra.gmra.mxu0 %v8545_v29  ;;  %5897 = vmatprep.subr.mxu0 %v9057_v17 }
 0x56c   :  { %5901 = vmatprep.mubr.msk.f32.mxu0 %vm5983_vm5, %v9057_v17 }
 0x609   :  { %v5836_v5 = vpop.f32.mrf.mxu1 }
 0x60b   :  { %v4654_v24 = vpop.f32.mrf.mxu1 }
 0x611   :  { %v5821_v28 = vpop.f32.mrf.mxu0 }
 0x612   :  { %v4661_v22 = vadd.f32 %v5836_v5, %v5821_v28 }
 0x613   :  { %v4543_v25 = vpop.f32.mrf.mxu0 }
 0x614   :  { %v4655_v11 = vadd.f32 %v4654_v24, %v4543_v25 }
 0x616   :  { %v5866_v61 = vpop.f32.mrf.mxu1 }
 0x618   :  { %v4830_v45 = vpop.f32.mrf.mxu1 }
 0x61e   :  { %v5851_v30 = vpop.f32.mrf.mxu0 }
 0x61f   :  { %v4752_v62 = vadd.f32 %v5851_v30, %v4661_v22 }
 0x620   :  { %v4744_v43 = vpop.f32.mrf.mxu0 }
 0x621   :  { %v4745_v39 = vadd.f32 %v4744_v43, %v4655_v11  ;;  %v4839_v20 = vadd.f32 %v5866_v61, %v4752_v62 }
 0x623   :  { %v4831_v31 = vadd.f32 %v4830_v45, %v4745_v39 }
 0x624   :  { %v5896_v4 = vpop.f32.mrf.mxu1 }
 0x626   :  { %v5010_v9 = vpop.f32.mrf.mxu1 }
 0x62b   :  { %v5881_v59 = vpop.f32.mrf.mxu0 }
 0x62c   :  { %v4934_v50 = vadd.f32 %v5881_v59, %v4839_v20 }
 0x62d   :  { %v4927_v52 = vpop.f32.mrf.mxu0 }
 0x62e   :  { %v5017_v58 = vadd.f32 %v5896_v4, %v4934_v50  ;;  %v4928_v14 = vadd.f32 %v4927_v52, %v4831_v31 }
 0x630   :  { %v5011_v23 = vadd.f32 %v5010_v9, %v4928_v14  ;;  %5029 = vperm.xlu0 %5946, %v5017_v58  }
 0x632   :  { %5024 = vperm.xlu1 %5947, %v5011_v23  }
 0x6ab   :  { %v5030_v47 = vpop.permute.xlu0 %5029 }
 0x6ac   :  { %v5033_v56 = vmul.f32 %v5030_v47, %v5021_v42 }
 0x6ad   :  { %v5025_v40 = vpop.permute.xlu1 %5024 }
 0x6ae   :  { %v5071_v57 = vand.u32 4294901760, %v5033_v56  ;;  %v5032_v33 = vmul.f32 %v5025_v40, %v5020_v49 }
 0x6b0   :  { %v5149_v38 = vsub.f32 %v5033_v56, %v5071_v57  ;;  %v5074_v41 = vand.u32 4294901760, %v5032_v33  ;;  %5898 = vmatpush3.msra.mxu0 %v5071_v57 }
 0x6b1   :  { %5899 = vmatprep.subr.mxu0 %v9057_v17 }
 0x6b2   :  { %v5150_v48 = vand.u32 4294901760, %v5149_v38  ;;  %v5156_v15 = vsub.f32 %v5032_v33, %v5074_v41  ;;  %5900 = vmatpush3.msra.mxu0 %v5074_v41 }
 0x6b3   :  { %5911 = vmatprep.subr.mxu0 %v9057_v17  ;;  %5902 = vmatmul.mubr.f32.vlgmr.msra.gmra.mxu0 %v5113_v21 }
 0x6b4   :  { %v5151_v10 = vsub.f32 %v5149_v38, %v5150_v48  ;;  %v5157_v18 = vand.u32 4294901760, %v5156_v15  ;;  %5912 = vmatpush3.msra.mxu0 %v5149_v38  ;;  %5915 = vmatprep.mubr.msk.f32.mxu0 %vm5983_vm5, %v9057_v17 }
 0x6b5   :  { %5913 = vmatprep.subr.mxu0 %v9057_v17 }
 0x6b6   :  { %v5158_v8 = vsub.f32 %v5156_v15, %v5157_v18  ;;  %5914 = vmatpush3.msra.mxu0 %v5156_v15  ;;  %v5152_v16 = vand.u32 4294901760, %v5151_v10 }
 0x6b7   :  { %5925 = vmatprep.subr.mxu0 %v9057_v17  ;;  %5916 = vmatmul.mubr.f32.vlgmr.msra.gmra.mxu0 %v5110_v35 }
 0x6b8   :  { %5905 = vmatpush3.msra.mxu1 %v5152_v16  ;;  %5926 = vmatpush3.msra.mxu0 %v5150_v48  ;;  %v5159_v7 = vand.u32 4294901760, %v5158_v8 }
 0x6b9   :  { %5906 = vmatprep.subr.mxu1 %v9057_v17  ;;  %5927 = vmatprep.subr.mxu0 %v9057_v17 }
 0x6ba   :  { %5907 = vmatpush3.msra.mxu1 %v5159_v7  ;;  %5928 = vmatpush3.msra.mxu0 %v5157_v18 }
 0x6bb   :  { %5909 = vmatmul.mubr.f32.vlgmr.msra.gmra.mxu1 %v5109_v1  ;;  %5918 = vmatprep.subr.mxu1 %v9057_v17 }
 0x6bc   :  { %5919 = vmatpush3.msra.mxu1 %v5071_v57  ;;  %5922 = vmatprep.mubr.msk.f32.mxu1 %vm5983_vm5, %v9057_v17 }
 0x6bd   :  { %5920 = vmatprep.subr.mxu1 %v9057_v17  ;;  %5929 = vmatprep.mubr.msk.f32.mxu0 %vm5983_vm5, %v9057_v17 }
 0x6be   :  { %5921 = vmatpush3.msra.mxu1 %v5074_v41  ;;  %5930 = vmatmul.mubr.f32.vlgmr.msra.gmra.mxu0 %v5109_v1 }
 0x6bf   :  { %5923 = vmatmul.mubr.f32.vlgmr.msra.gmra.mxu1 %v5111_v32  ;;  %5932 = vmatprep.subr.mxu1 %v9057_v17 }
 0x6c0   :  { %5933 = vmatpush3.msra.mxu1 %v5071_v57  ;;  %5936 = vmatprep.mubr.msk.f32.mxu1 %vm5983_vm5, %v9057_v17 }
 0x6c1   :  { %5934 = vmatprep.subr.mxu1 %v9057_v17 }
 0x6c2   :  { %5935 = vmatpush3.msra.mxu1 %v5074_v41 }
 0x6c3   :  { %5937 = vmatmul.mubr.f32.vlgmr.msra.gmra.mxu1 %v5109_v1 }
 0x773   :  { %v5115_v0 = vpop.f32.mrf.mxu0 }
 0x774   :  { %v5116_v53 = vadd.f32 %v5115_v0, %v5038_v46 }
 0x775   :  { %v5903_v55 = vpop.f32.mrf.mxu0 }
 0x777   :  { %v5272_v54 = vpop.f32.mrf.mxu0 }
 0x779   :  { %v5917_v60 = vpop.f32.mrf.mxu0 }
 0x77b   :  { %v5196_v29 = vpop.f32.mrf.mxu1 }
 0x77c   :  { %v5197_v44 = vadd.f32 %v5196_v29, %v5116_v53 }
 0x77d   :  { %v5910_v34 = vpop.f32.mrf.mxu1 }
 0x77e   :  { %v5273_v6 = vadd.f32 %v5272_v54, %v5197_v44  ;;  %v5424_v17 = vpop.f32.mrf.mxu0 }
 0x77f   :  { %v5347_v26 = vpop.f32.mrf.mxu1 }
 0x780   :  { %v5348_v3 = vadd.f32 %v5347_v26, %v5273_v6  ;;  %v5931_v36 = vpop.f32.mrf.mxu0 }
 0x781   :  { %v5924_v37 = vpop.f32.mrf.mxu1 }
 0x782   :  { %v5425_v63 = vadd.f32 %v5424_v17, %v5348_v3 }
 0x783   :  { %v5497_v28 = vpop.f32.mrf.mxu1 }
 0x784   :  { %v5498_v5 = vadd.f32 %v5497_v28, %v5425_v63 }
 0x785   :  { %v5938_v25 = vpop.f32.mrf.mxu1 }
 0x786   :  { %v5508_v30 = vadd.f32 %v5542_v19, %v5498_v5 }
 0x788   :  { %v5510_v24 = vsel %vm5509_vm7, %v5508_v30, -inf }
 0x789   :  { %5511 = vmax.xlane.f32.xlu1 %v5510_v24 }
 0x812   :  { %v5512_v22 = vpop.xlane.xlu1 %5511 }
 0x813   :  { %v5513_v61 = vsub.f32 %v5508_v30, %v5512_v22 }
 0x815   :  { %v5514_v43 = vmul.f32 1.442695, %v5513_v61 }
 0x817   :  { %5948 = vpow2.f32 %v5514_v43 }
 0x824   :  { %v5949_v11 = vpop.eup %5948 }
 0x825   :  { %v5516_v62 = vsel %vm5509_vm7, %v5949_v11, 0.0 }
 0x826   :  { %5517 = vadd.xlane.f32.xlu0 %v5516_v62 }
 0x8af   :  { %v5518_v39 = vpop.xlane.xlu0 %5517 }
 0x8b0   :  { %5950 = vrcp.f32 %v5518_v39 }
 0x8bd   :  { %v5951_v45 = vpop.eup %5950 }
 0x8be   :  { %v5520_v20 = vmul.f32 %v5951_v45, %v5949_v11 }
 0x8c0   :  { %5521 = vst.msk [vmem:[#allocation2] sm:$0x3] %vm5509_vm7, %v5520_v20 }
 0x8c1   :  { %5967 = shalt.err (!%p5964_p4)
}
 0x8c2   :  { %5531 = dma.vmem_to_hbm [thread:$0]  %s5529_s0, 32, %s8657_s13, [#allocation3]  }
 0x8c3   :  { %5976 = dma.done.wait [#allocation3], 32  }
 0x8c4   :  { %5977 = vsyncadd [#allocation3], 4294967264 }
 0x8c5   :  { %5535 = vsyncpa [#allocation3], 1 }

</bundles_post_ra>
